<compile_context>
chip_gen: v5e
topology: v5e:2x2
jax: 0.10.0
libtpu: 0.0.40
codegen_flags: <defaults>
</compile_context>

<pallas_src>
import functools

import jax
import jax.numpy as jnp
from jax import lax
from jax.experimental import pallas as pl
from jax.experimental.pallas import tpu as pltpu


def lstm_kernel(x_ref, wih_ref, bias_ref, whh_ref, lin_ref, out_ref):
    """Fused LSTM recurrence + Linear head.

    x_ref    : (B, T)     raw inputs (input_size == 1 squeezed out)
    wih_ref  : (4, 1, H)  input->gate weight rows, torch gate order [i, f, g, o]
    bias_ref : (4, 1, H)  fused bias  b_ih + b_hh, per gate
    whh_ref  : (4, H, H)  recurrent weights per gate, pre-transposed (h_in -> gate)
    lin_ref  : (2, H)     row 0 = linear weight row, row 1 = [b_lin, 0, ..., 0]
    out_ref  : (B, 1)     linear(h_T)  (== x.view(b, -1)[:, -1:] in the torch module)
    """
    B, T = x_ref.shape
    H = whh_ref.shape[-1]

    xv = x_ref[...]                                   # (B, T) -- one tiny load

    # Per-gate weights / biases, loaded once and kept resident.
    wih_i, wih_f, wih_g, wih_o = wih_ref[0], wih_ref[1], wih_ref[2], wih_ref[3]
    b_i, b_f, b_g, b_o = bias_ref[0], bias_ref[1], bias_ref[2], bias_ref[3]
    whh_i, whh_f, whh_g, whh_o = whh_ref[0], whh_ref[1], whh_ref[2], whh_ref[3]

    # hidden_cell is zero-initialized (standard usage of MyLSTM) -> init in-kernel and
    # drop the h0/c0 input DMAs.
    # TODO(synk): if a caller carries a non-zero hidden_cell across calls, add h0/c0
    # back as two tiny (B, H) VMEM inputs.
    h = jnp.zeros((B, H), jnp.float32)
    c = jnp.zeros((B, H), jnp.float32)

    # Full-precision f32 MXU dot: keeps the 1e-5 match vs. the f32 reference.
    dot_hh = functools.partial(jnp.dot, preferred_element_type=jnp.float32,
                               precision=lax.Precision.HIGHEST)

    # Static unroll over the small, static time axis: the whole dependency chain is
    # visible to the scheduler; whh is ~16 vregs so nothing spills.
    # TODO(synk): if H grows to >=128, switch to lax.fori_loop(..., unroll=True) or a
    # grid axis so live ranges stay bounded (Python unroll does not bound them).
    for t in range(T):
        # Input projection for step t (input_size == 1): broadcast mul + add per gate.
        # Independent of h/c -> off the serial recurrence chain; results are already
        # lane-0-aligned (B, H) slabs.
        x_t = xv[:, t:t + 1]                          # (B, 1)
        xi = x_t * wih_i + b_i
        xf = x_t * wih_f + b_f
        xg = x_t * wih_g + b_g
        xo = x_t * wih_o + b_o

        # Per-gate recurrent dots: each gate lands lane-aligned with h/c, so there are
        # no 32-lane band slices (no XLU lane rotates) on the critical path.
        # TODO(synk): on v5e, if a bundle dump shows MXU push/pop latency dominating,
        # try a VPU broadcast multiply-add recurrence instead of these small dots.
        i_g = jax.nn.sigmoid(xi + dot_hh(h, whh_i))
        f_g = jax.nn.sigmoid(xf + dot_hh(h, whh_f))
        o_g = jax.nn.sigmoid(xo + dot_hh(h, whh_o))
        g_g = jnp.tanh(xg + dot_hh(h, whh_g))         # tanh only on the cell gate

        c = f_g * c + i_g * g_g
        h = o_g * jnp.tanh(c)

    # Linear head on the last hidden state: VPU multiply + lane reduce (avoids MXU tail
    # latency of a (B,H)x(H,1) dot).  b_lin is folded into lin_ref[1, 0].
    w_lin = lin_ref[0:1, :]                           # (1, H)
    b_lin = lin_ref[1:2, 0:1]                         # (1, 1)
    out_ref[...] = jnp.sum(h * w_lin, axis=-1, keepdims=True) + b_lin


def prepare_lstm_params(params):
    """One-time repack of PyTorch-layout parameters into kernel-ready arrays."""
    H = params["w_hh"].shape[1]
    I = params["w_ih"].shape[1]
    assert I == 1, "kernel fuses the input projection assuming input_size == 1"
    # TODO(synk): for input_size > 1, precompute x @ w_ih.T in the wrapper (or add a
    # per-gate (B,I)x(I,H) dot in-kernel) instead of the broadcast mul.

    f32 = jnp.float32
    wih = params["w_ih"].astype(f32).reshape(4, 1, H)                      # (4, 1, H)
    bias = (params["b_ih"] + params["b_hh"]).astype(f32).reshape(4, 1, H)  # (4, 1, H)
    whh_t = jnp.transpose(params["w_hh"].astype(f32).reshape(4, H, H),
                          (0, 2, 1))                                       # (4, H, H)
    b_row = jnp.zeros((1, H), f32).at[0, 0].set(params["b_lin"].reshape(-1)[0])
    lin = jnp.concatenate([params["w_lin"].astype(f32).reshape(1, H), b_row], axis=0)
    return {"wih": wih, "bias": bias, "whh_t": whh_t, "lin": lin}


@jax.jit
def my_lstm_forward(x, kparams):
    """x: (B, T, 1) float32, batch_first (like PyTorch). Returns (B, 1) == linear(h_T)."""
    B, T, I = x.shape
    x_bt = x.reshape(B, T)   # input_size == 1: pure bitcast, no wrapper compute

    # TODO(synk): when batching many independent sequences (B >> 8), add a leading
    # "parallel" grid axis over batch tiles with
    # pltpu.CompilerParams(dimension_semantics=("parallel", ...)) so v7x's two
    # TensorCores split the work; keep the time recurrence inside the body.
    # TODO(synk): for large T, stream inputs with a time-chunk grid sized so
    # 2 (double-buffer) x chunk*B*4H*4B stays well under v7x's ~32 MiB scoped-VMEM
    # default (64 MiB physical), not v5e/v6e's 128 MiB.
    vmem = pl.BlockSpec(memory_space=pltpu.MemorySpace.VMEM)
    return pl.pallas_call(
        lstm_kernel,
        out_shape=jax.ShapeDtypeStruct((B, 1), jnp.float32),
        in_specs=[vmem] * 5,
        out_specs=vmem,
    )(x_bt, kparams["wih"], kparams["bias"], kparams["whh_t"], kparams["lin"])


def my_lstm_reference(x, params):
    """Pure-JAX reference with identical semantics (zero-initialized hidden_cell)."""
    H = params["w_hh"].shape[1]
    B = x.shape[0]
    wih_t = params["w_ih"].T
    whh_t = params["w_hh"].T
    b = params["b_ih"] + params["b_hh"]
    hp = functools.partial(jnp.dot, precision=lax.Precision.HIGHEST)

    def step(carry, x_t):
        h, c = carry
        gates = hp(x_t, wih_t) + hp(h, whh_t) + b
        i_g = jax.nn.sigmoid(gates[:, 0 * H:1 * H])
        f_g = jax.nn.sigmoid(gates[:, 1 * H:2 * H])
        g_g = jnp.tanh(gates[:, 2 * H:3 * H])
        o_g = jax.nn.sigmoid(gates[:, 3 * H:4 * H])
        c = f_g * c + i_g * g_g
        h = o_g * jnp.tanh(c)
        return (h, c), h

    h0 = jnp.zeros((B, H), jnp.float32)
    c0 = jnp.zeros((B, H), jnp.float32)
    (h_last, _), _ = lax.scan(step, (h0, c0), jnp.transpose(x, (1, 0, 2)))
    return hp(h_last, params["w_lin"].T) + params["b_lin"]


if __name__ == "__main__":
    B, T, I, H, O = 2, 8, 1, 32, 1   # small shapes consistent with MyLSTM(input_size=1, output_size=1)

    key = jax.random.PRNGKey(0)
    ks = jax.random.split(key, 8)
    bound = 1.0 / (H ** 0.5)
    params = {
        "w_ih": jax.random.uniform(ks[0], (4 * H, I), jnp.float32, -bound, bound),
        "w_hh": jax.random.uniform(ks[1], (4 * H, H), jnp.float32, -bound, bound),
        "b_ih": jax.random.uniform(ks[2], (4 * H,), jnp.float32, -bound, bound),
        "b_hh": jax.random.uniform(ks[3], (4 * H,), jnp.float32, -bound, bound),
        "w_lin": jax.random.uniform(ks[4], (O, H), jnp.float32, -bound, bound),
        "b_lin": jax.random.uniform(ks[5], (O,), jnp.float32, -bound, bound),
    }
    x = jax.random.normal(ks[6], (B, T, I), jnp.float32)

    kparams = prepare_lstm_params(params)   # one-time parameter repack

    out = my_lstm_forward(x, kparams)
    jax.block_until_ready(out)

    ref = my_lstm_reference(x, params)
    assert out.shape == (B, 1)
    assert jnp.allclose(out, ref, atol=1e-5, rtol=1e-5)

    print("KERNEL_OK")
</pallas_src>

<mosaic_0001>
module attributes {stable_mosaic.version = 11 : i64} {
  func.func @lstm_kernel(%arg0: memref<2x8xf32, #tpu.memory_space<vmem>>, %arg1: memref<4x1x32xf32, #tpu.memory_space<vmem>>, %arg2: memref<4x1x32xf32, #tpu.memory_space<vmem>>, %arg3: memref<4x32x32xf32, #tpu.memory_space<vmem>>, %arg4: memref<2x32xf32, #tpu.memory_space<vmem>>, %arg5: memref<2x1xf32, #tpu.memory_space<vmem>>) attributes {dimension_semantics = [], scalar_prefetch = 0 : i64, scratch_operands = 0 : i64, tpu.core_type = #tpu.core_type<tc>} {
    %c0 = arith.constant 0 : index
    %c0_0 = arith.constant 0 : index
    %0 = vector.load %arg0[%c0, %c0_0] : memref<2x8xf32, #tpu.memory_space<vmem>>, vector<2x8xf32>
    %c0_1 = arith.constant 0 : index
    %c0_2 = arith.constant 0 : index
    %c0_3 = arith.constant 0 : index
    %1 = vector.load %arg1[%c0_1, %c0_2, %c0_3] : memref<4x1x32xf32, #tpu.memory_space<vmem>>, vector<1x1x32xf32>
    %2 = vector.shape_cast %1 : vector<1x1x32xf32> to vector<1x32xf32>
    %c1 = arith.constant 1 : index
    %c0_4 = arith.constant 0 : index
    %c0_5 = arith.constant 0 : index
    %3 = vector.load %arg1[%c1, %c0_4, %c0_5] : memref<4x1x32xf32, #tpu.memory_space<vmem>>, vector<1x1x32xf32>
    %4 = vector.shape_cast %3 : vector<1x1x32xf32> to vector<1x32xf32>
    %c2 = arith.constant 2 : index
    %c0_6 = arith.constant 0 : index
    %c0_7 = arith.constant 0 : index
    %5 = vector.load %arg1[%c2, %c0_6, %c0_7] : memref<4x1x32xf32, #tpu.memory_space<vmem>>, vector<1x1x32xf32>
    %6 = vector.shape_cast %5 : vector<1x1x32xf32> to vector<1x32xf32>
    %c3 = arith.constant 3 : index
    %c0_8 = arith.constant 0 : index
    %c0_9 = arith.constant 0 : index
    %7 = vector.load %arg1[%c3, %c0_8, %c0_9] : memref<4x1x32xf32, #tpu.memory_space<vmem>>, vector<1x1x32xf32>
    %8 = vector.shape_cast %7 : vector<1x1x32xf32> to vector<1x32xf32>
    %c0_10 = arith.constant 0 : index
    %c0_11 = arith.constant 0 : index
    %c0_12 = arith.constant 0 : index
    %9 = vector.load %arg2[%c0_10, %c0_11, %c0_12] : memref<4x1x32xf32, #tpu.memory_space<vmem>>, vector<1x1x32xf32>
    %10 = vector.shape_cast %9 : vector<1x1x32xf32> to vector<1x32xf32>
    %c1_13 = arith.constant 1 : index
    %c0_14 = arith.constant 0 : index
    %c0_15 = arith.constant 0 : index
    %11 = vector.load %arg2[%c1_13, %c0_14, %c0_15] : memref<4x1x32xf32, #tpu.memory_space<vmem>>, vector<1x1x32xf32>
    %12 = vector.shape_cast %11 : vector<1x1x32xf32> to vector<1x32xf32>
    %c2_16 = arith.constant 2 : index
    %c0_17 = arith.constant 0 : index
    %c0_18 = arith.constant 0 : index
    %13 = vector.load %arg2[%c2_16, %c0_17, %c0_18] : memref<4x1x32xf32, #tpu.memory_space<vmem>>, vector<1x1x32xf32>
    %14 = vector.shape_cast %13 : vector<1x1x32xf32> to vector<1x32xf32>
    %c3_19 = arith.constant 3 : index
    %c0_20 = arith.constant 0 : index
    %c0_21 = arith.constant 0 : index
    %15 = vector.load %arg2[%c3_19, %c0_20, %c0_21] : memref<4x1x32xf32, #tpu.memory_space<vmem>>, vector<1x1x32xf32>
    %16 = vector.shape_cast %15 : vector<1x1x32xf32> to vector<1x32xf32>
    %c0_22 = arith.constant 0 : index
    %c0_23 = arith.constant 0 : index
    %c0_24 = arith.constant 0 : index
    %17 = vector.load %arg3[%c0_22, %c0_23, %c0_24] : memref<4x32x32xf32, #tpu.memory_space<vmem>>, vector<1x32x32xf32>
    %18 = vector.shape_cast %17 : vector<1x32x32xf32> to vector<32x32xf32>
    %c1_25 = arith.constant 1 : index
    %c0_26 = arith.constant 0 : index
    %c0_27 = arith.constant 0 : index
    %19 = vector.load %arg3[%c1_25, %c0_26, %c0_27] : memref<4x32x32xf32, #tpu.memory_space<vmem>>, vector<1x32x32xf32>
    %20 = vector.shape_cast %19 : vector<1x32x32xf32> to vector<32x32xf32>
    %c2_28 = arith.constant 2 : index
    %c0_29 = arith.constant 0 : index
    %c0_30 = arith.constant 0 : index
    %21 = vector.load %arg3[%c2_28, %c0_29, %c0_30] : memref<4x32x32xf32, #tpu.memory_space<vmem>>, vector<1x32x32xf32>
    %22 = vector.shape_cast %21 : vector<1x32x32xf32> to vector<32x32xf32>
    %c3_31 = arith.constant 3 : index
    %c0_32 = arith.constant 0 : index
    %c0_33 = arith.constant 0 : index
    %23 = vector.load %arg3[%c3_31, %c0_32, %c0_33] : memref<4x32x32xf32, #tpu.memory_space<vmem>>, vector<1x32x32xf32>
    %24 = vector.shape_cast %23 : vector<1x32x32xf32> to vector<32x32xf32>
    %cst = arith.constant 0.000000e+00 : f32
    %25 = vector.broadcast %cst : f32 to vector<2x32xf32>
    %cst_34 = arith.constant 0.000000e+00 : f32
    %26 = vector.broadcast %cst_34 : f32 to vector<2x32xf32>
    %27 = vector.extract_strided_slice %0 {offsets = [0, 0], sizes = [2, 1], strides = [1, 1]} : vector<2x8xf32> to vector<2x1xf32>
    %28 = vector.broadcast %27 : vector<2x1xf32> to vector<2x32xf32>
    %29 = vector.broadcast %2 : vector<1x32xf32> to vector<2x32xf32>
    %30 = arith.mulf %28, %29 : vector<2x32xf32>
    %31 = vector.broadcast %10 : vector<1x32xf32> to vector<2x32xf32>
    %32 = arith.addf %30, %31 : vector<2x32xf32>
    %33 = vector.broadcast %27 : vector<2x1xf32> to vector<2x32xf32>
    %34 = vector.broadcast %4 : vector<1x32xf32> to vector<2x32xf32>
    %35 = arith.mulf %33, %34 : vector<2x32xf32>
    %36 = vector.broadcast %12 : vector<1x32xf32> to vector<2x32xf32>
    %37 = arith.addf %35, %36 : vector<2x32xf32>
    %38 = vector.broadcast %27 : vector<2x1xf32> to vector<2x32xf32>
    %39 = vector.broadcast %6 : vector<1x32xf32> to vector<2x32xf32>
    %40 = arith.mulf %38, %39 : vector<2x32xf32>
    %41 = vector.broadcast %14 : vector<1x32xf32> to vector<2x32xf32>
    %42 = arith.addf %40, %41 : vector<2x32xf32>
    %43 = vector.broadcast %27 : vector<2x1xf32> to vector<2x32xf32>
    %44 = vector.broadcast %8 : vector<1x32xf32> to vector<2x32xf32>
    %45 = arith.mulf %43, %44 : vector<2x32xf32>
    %46 = vector.broadcast %16 : vector<1x32xf32> to vector<2x32xf32>
    %47 = arith.addf %45, %46 : vector<2x32xf32>
    %cst_35 = arith.constant dense<0.000000e+00> : vector<2x32xf32>
    %48 = tpu.matmul %25, %18, %cst_35 {dimension_numbers = #tpu.dot_dimension_numbers<[1], [0], [0], [1], [0, 0, 1, 1], [], []>, precision = #tpu.contract_precision<fp32>} : vector<2x32xf32>, vector<32x32xf32>, vector<2x32xf32> -> vector<2x32xf32>
    %49 = arith.addf %32, %48 : vector<2x32xf32>
    %50 = arith.negf %49 : vector<2x32xf32>
    %51 = math.exp %50 : vector<2x32xf32>
    %cst_36 = arith.constant 1.000000e+00 : f32
    %52 = vector.broadcast %cst_36 : f32 to vector<2x32xf32>
    %53 = arith.addf %52, %51 : vector<2x32xf32>
    %54 = arith.divf %52, %53 : vector<2x32xf32>
    %cst_37 = arith.constant dense<0.000000e+00> : vector<2x32xf32>
    %55 = tpu.matmul %25, %20, %cst_37 {dimension_numbers = #tpu.dot_dimension_numbers<[1], [0], [0], [1], [0, 0, 1, 1], [], []>, precision = #tpu.contract_precision<fp32>} : vector<2x32xf32>, vector<32x32xf32>, vector<2x32xf32> -> vector<2x32xf32>
    %56 = arith.addf %37, %55 : vector<2x32xf32>
    %57 = arith.negf %56 : vector<2x32xf32>
    %58 = math.exp %57 : vector<2x32xf32>
    %cst_38 = arith.constant 1.000000e+00 : f32
    %59 = vector.broadcast %cst_38 : f32 to vector<2x32xf32>
    %60 = arith.addf %59, %58 : vector<2x32xf32>
    %61 = arith.divf %59, %60 : vector<2x32xf32>
    %cst_39 = arith.constant dense<0.000000e+00> : vector<2x32xf32>
    %62 = tpu.matmul %25, %24, %cst_39 {dimension_numbers = #tpu.dot_dimension_numbers<[1], [0], [0], [1], [0, 0, 1, 1], [], []>, precision = #tpu.contract_precision<fp32>} : vector<2x32xf32>, vector<32x32xf32>, vector<2x32xf32> -> vector<2x32xf32>
    %63 = arith.addf %47, %62 : vector<2x32xf32>
    %64 = arith.negf %63 : vector<2x32xf32>
    %65 = math.exp %64 : vector<2x32xf32>
    %cst_40 = arith.constant 1.000000e+00 : f32
    %66 = vector.broadcast %cst_40 : f32 to vector<2x32xf32>
    %67 = arith.addf %66, %65 : vector<2x32xf32>
    %68 = arith.divf %66, %67 : vector<2x32xf32>
    %cst_41 = arith.constant dense<0.000000e+00> : vector<2x32xf32>
    %69 = tpu.matmul %25, %22, %cst_41 {dimension_numbers = #tpu.dot_dimension_numbers<[1], [0], [0], [1], [0, 0, 1, 1], [], []>, precision = #tpu.contract_precision<fp32>} : vector<2x32xf32>, vector<32x32xf32>, vector<2x32xf32> -> vector<2x32xf32>
    %70 = arith.addf %42, %69 : vector<2x32xf32>
    %71 = math.tanh %70 : vector<2x32xf32>
    %72 = arith.mulf %61, %26 : vector<2x32xf32>
    %73 = arith.mulf %54, %71 : vector<2x32xf32>
    %74 = arith.addf %72, %73 : vector<2x32xf32>
    %75 = math.tanh %74 : vector<2x32xf32>
    %76 = arith.mulf %68, %75 : vector<2x32xf32>
    %77 = vector.extract_strided_slice %0 {offsets = [0, 1], sizes = [2, 1], strides = [1, 1]} : vector<2x8xf32> to vector<2x1xf32>
    %78 = vector.broadcast %77 : vector<2x1xf32> to vector<2x32xf32>
    %79 = vector.broadcast %2 : vector<1x32xf32> to vector<2x32xf32>
    %80 = arith.mulf %78, %79 : vector<2x32xf32>
    %81 = vector.broadcast %10 : vector<1x32xf32> to vector<2x32xf32>
    %82 = arith.addf %80, %81 : vector<2x32xf32>
    %83 = vector.broadcast %77 : vector<2x1xf32> to vector<2x32xf32>
    %84 = vector.broadcast %4 : vector<1x32xf32> to vector<2x32xf32>
    %85 = arith.mulf %83, %84 : vector<2x32xf32>
    %86 = vector.broadcast %12 : vector<1x32xf32> to vector<2x32xf32>
    %87 = arith.addf %85, %86 : vector<2x32xf32>
    %88 = vector.broadcast %77 : vector<2x1xf32> to vector<2x32xf32>
    %89 = vector.broadcast %6 : vector<1x32xf32> to vector<2x32xf32>
    %90 = arith.mulf %88, %89 : vector<2x32xf32>
    %91 = vector.broadcast %14 : vector<1x32xf32> to vector<2x32xf32>
    %92 = arith.addf %90, %91 : vector<2x32xf32>
    %93 = vector.broadcast %77 : vector<2x1xf32> to vector<2x32xf32>
    %94 = vector.broadcast %8 : vector<1x32xf32> to vector<2x32xf32>
    %95 = arith.mulf %93, %94 : vector<2x32xf32>
    %96 = vector.broadcast %16 : vector<1x32xf32> to vector<2x32xf32>
    %97 = arith.addf %95, %96 : vector<2x32xf32>
    %cst_42 = arith.constant dense<0.000000e+00> : vector<2x32xf32>
    %98 = tpu.matmul %76, %18, %cst_42 {dimension_numbers = #tpu.dot_dimension_numbers<[1], [0], [0], [1], [0, 0, 1, 1], [], []>, precision = #tpu.contract_precision<fp32>} : vector<2x32xf32>, vector<32x32xf32>, vector<2x32xf32> -> vector<2x32xf32>
    %99 = arith.addf %82, %98 : vector<2x32xf32>
    %100 = arith.negf %99 : vector<2x32xf32>
    %101 = math.exp %100 : vector<2x32xf32>
    %cst_43 = arith.constant 1.000000e+00 : f32
    %102 = vector.broadcast %cst_43 : f32 to vector<2x32xf32>
    %103 = arith.addf %102, %101 : vector<2x32xf32>
    %104 = arith.divf %102, %103 : vector<2x32xf32>
    %cst_44 = arith.constant dense<0.000000e+00> : vector<2x32xf32>
    %105 = tpu.matmul %76, %20, %cst_44 {dimension_numbers = #tpu.dot_dimension_numbers<[1], [0], [0], [1], [0, 0, 1, 1], [], []>, precision = #tpu.contract_precision<fp32>} : vector<2x32xf32>, vector<32x32xf32>, vector<2x32xf32> -> vector<2x32xf32>
    %106 = arith.addf %87, %105 : vector<2x32xf32>
    %107 = arith.negf %106 : vector<2x32xf32>
    %108 = math.exp %107 : vector<2x32xf32>
    %cst_45 = arith.constant 1.000000e+00 : f32
    %109 = vector.broadcast %cst_45 : f32 to vector<2x32xf32>
    %110 = arith.addf %109, %108 : vector<2x32xf32>
    %111 = arith.divf %109, %110 : vector<2x32xf32>
    %cst_46 = arith.constant dense<0.000000e+00> : vector<2x32xf32>
    %112 = tpu.matmul %76, %24, %cst_46 {dimension_numbers = #tpu.dot_dimension_numbers<[1], [0], [0], [1], [0, 0, 1, 1], [], []>, precision = #tpu.contract_precision<fp32>} : vector<2x32xf32>, vector<32x32xf32>, vector<2x32xf32> -> vector<2x32xf32>
    %113 = arith.addf %97, %112 : vector<2x32xf32>
    %114 = arith.negf %113 : vector<2x32xf32>
    %115 = math.exp %114 : vector<2x32xf32>
    %cst_47 = arith.constant 1.000000e+00 : f32
    %116 = vector.broadcast %cst_47 : f32 to vector<2x32xf32>
    %117 = arith.addf %116, %115 : vector<2x32xf32>
    %118 = arith.divf %116, %117 : vector<2x32xf32>
    %cst_48 = arith.constant dense<0.000000e+00> : vector<2x32xf32>
    %119 = tpu.matmul %76, %22, %cst_48 {dimension_numbers = #tpu.dot_dimension_numbers<[1], [0], [0], [1], [0, 0, 1, 1], [], []>, precision = #tpu.contract_precision<fp32>} : vector<2x32xf32>, vector<32x32xf32>, vector<2x32xf32> -> vector<2x32xf32>
    %120 = arith.addf %92, %119 : vector<2x32xf32>
    %121 = math.tanh %120 : vector<2x32xf32>
    %122 = arith.mulf %111, %74 : vector<2x32xf32>
    %123 = arith.mulf %104, %121 : vector<2x32xf32>
    %124 = arith.addf %122, %123 : vector<2x32xf32>
    %125 = math.tanh %124 : vector<2x32xf32>
    %126 = arith.mulf %118, %125 : vector<2x32xf32>
    %127 = vector.extract_strided_slice %0 {offsets = [0, 2], sizes = [2, 1], strides = [1, 1]} : vector<2x8xf32> to vector<2x1xf32>
    %128 = vector.broadcast %127 : vector<2x1xf32> to vector<2x32xf32>
    %129 = vector.broadcast %2 : vector<1x32xf32> to vector<2x32xf32>
    %130 = arith.mulf %128, %129 : vector<2x32xf32>
    %131 = vector.broadcast %10 : vector<1x32xf32> to vector<2x32xf32>
    %132 = arith.addf %130, %131 : vector<2x32xf32>
    %133 = vector.broadcast %127 : vector<2x1xf32> to vector<2x32xf32>
    %134 = vector.broadcast %4 : vector<1x32xf32> to vector<2x32xf32>
    %135 = arith.mulf %133, %134 : vector<2x32xf32>
    %136 = vector.broadcast %12 : vector<1x32xf32> to vector<2x32xf32>
    %137 = arith.addf %135, %136 : vector<2x32xf32>
    %138 = vector.broadcast %127 : vector<2x1xf32> to vector<2x32xf32>
    %139 = vector.broadcast %6 : vector<1x32xf32> to vector<2x32xf32>
    %140 = arith.mulf %138, %139 : vector<2x32xf32>
    %141 = vector.broadcast %14 : vector<1x32xf32> to vector<2x32xf32>
    %142 = arith.addf %140, %141 : vector<2x32xf32>
    %143 = vector.broadcast %127 : vector<2x1xf32> to vector<2x32xf32>
    %144 = vector.broadcast %8 : vector<1x32xf32> to vector<2x32xf32>
    %145 = arith.mulf %143, %144 : vector<2x32xf32>
    %146 = vector.broadcast %16 : vector<1x32xf32> to vector<2x32xf32>
    %147 = arith.addf %145, %146 : vector<2x32xf32>
    %cst_49 = arith.constant dense<0.000000e+00> : vector<2x32xf32>
    %148 = tpu.matmul %126, %18, %cst_49 {dimension_numbers = #tpu.dot_dimension_numbers<[1], [0], [0], [1], [0, 0, 1, 1], [], []>, precision = #tpu.contract_precision<fp32>} : vector<2x32xf32>, vector<32x32xf32>, vector<2x32xf32> -> vector<2x32xf32>
    %149 = arith.addf %132, %148 : vector<2x32xf32>
    %150 = arith.negf %149 : vector<2x32xf32>
    %151 = math.exp %150 : vector<2x32xf32>
    %cst_50 = arith.constant 1.000000e+00 : f32
    %152 = vector.broadcast %cst_50 : f32 to vector<2x32xf32>
    %153 = arith.addf %152, %151 : vector<2x32xf32>
    %154 = arith.divf %152, %153 : vector<2x32xf32>
    %cst_51 = arith.constant dense<0.000000e+00> : vector<2x32xf32>
    %155 = tpu.matmul %126, %20, %cst_51 {dimension_numbers = #tpu.dot_dimension_numbers<[1], [0], [0], [1], [0, 0, 1, 1], [], []>, precision = #tpu.contract_precision<fp32>} : vector<2x32xf32>, vector<32x32xf32>, vector<2x32xf32> -> vector<2x32xf32>
    %156 = arith.addf %137, %155 : vector<2x32xf32>
    %157 = arith.negf %156 : vector<2x32xf32>
    %158 = math.exp %157 : vector<2x32xf32>
    %cst_52 = arith.constant 1.000000e+00 : f32
    %159 = vector.broadcast %cst_52 : f32 to vector<2x32xf32>
    %160 = arith.addf %159, %158 : vector<2x32xf32>
    %161 = arith.divf %159, %160 : vector<2x32xf32>
    %cst_53 = arith.constant dense<0.000000e+00> : vector<2x32xf32>
    %162 = tpu.matmul %126, %24, %cst_53 {dimension_numbers = #tpu.dot_dimension_numbers<[1], [0], [0], [1], [0, 0, 1, 1], [], []>, precision = #tpu.contract_precision<fp32>} : vector<2x32xf32>, vector<32x32xf32>, vector<2x32xf32> -> vector<2x32xf32>
    %163 = arith.addf %147, %162 : vector<2x32xf32>
    %164 = arith.negf %163 : vector<2x32xf32>
    %165 = math.exp %164 : vector<2x32xf32>
    %cst_54 = arith.constant 1.000000e+00 : f32
    %166 = vector.broadcast %cst_54 : f32 to vector<2x32xf32>
    %167 = arith.addf %166, %165 : vector<2x32xf32>
    %168 = arith.divf %166, %167 : vector<2x32xf32>
    %cst_55 = arith.constant dense<0.000000e+00> : vector<2x32xf32>
    %169 = tpu.matmul %126, %22, %cst_55 {dimension_numbers = #tpu.dot_dimension_numbers<[1], [0], [0], [1], [0, 0, 1, 1], [], []>, precision = #tpu.contract_precision<fp32>} : vector<2x32xf32>, vector<32x32xf32>, vector<2x32xf32> -> vector<2x32xf32>
    %170 = arith.addf %142, %169 : vector<2x32xf32>
    %171 = math.tanh %170 : vector<2x32xf32>
    %172 = arith.mulf %161, %124 : vector<2x32xf32>
    %173 = arith.mulf %154, %171 : vector<2x32xf32>
    %174 = arith.addf %172, %173 : vector<2x32xf32>
    %175 = math.tanh %174 : vector<2x32xf32>
    %176 = arith.mulf %168, %175 : vector<2x32xf32>
    %177 = vector.extract_strided_slice %0 {offsets = [0, 3], sizes = [2, 1], strides = [1, 1]} : vector<2x8xf32> to vector<2x1xf32>
    %178 = vector.broadcast %177 : vector<2x1xf32> to vector<2x32xf32>
    %179 = vector.broadcast %2 : vector<1x32xf32> to vector<2x32xf32>
    %180 = arith.mulf %178, %179 : vector<2x32xf32>
    %181 = vector.broadcast %10 : vector<1x32xf32> to vector<2x32xf32>
    %182 = arith.addf %180, %181 : vector<2x32xf32>
    %183 = vector.broadcast %177 : vector<2x1xf32> to vector<2x32xf32>
    %184 = vector.broadcast %4 : vector<1x32xf32> to vector<2x32xf32>
    %185 = arith.mulf %183, %184 : vector<2x32xf32>
    %186 = vector.broadcast %12 : vector<1x32xf32> to vector<2x32xf32>
    %187 = arith.addf %185, %186 : vector<2x32xf32>
    %188 = vector.broadcast %177 : vector<2x1xf32> to vector<2x32xf32>
    %189 = vector.broadcast %6 : vector<1x32xf32> to vector<2x32xf32>
    %190 = arith.mulf %188, %189 : vector<2x32xf32>
    %191 = vector.broadcast %14 : vector<1x32xf32> to vector<2x32xf32>
    %192 = arith.addf %190, %191 : vector<2x32xf32>
    %193 = vector.broadcast %177 : vector<2x1xf32> to vector<2x32xf32>
    %194 = vector.broadcast %8 : vector<1x32xf32> to vector<2x32xf32>
    %195 = arith.mulf %193, %194 : vector<2x32xf32>
    %196 = vector.broadcast %16 : vector<1x32xf32> to vector<2x32xf32>
    %197 = arith.addf %195, %196 : vector<2x32xf32>
    %cst_56 = arith.constant dense<0.000000e+00> : vector<2x32xf32>
    %198 = tpu.matmul %176, %18, %cst_56 {dimension_numbers = #tpu.dot_dimension_numbers<[1], [0], [0], [1], [0, 0, 1, 1], [], []>, precision = #tpu.contract_precision<fp32>} : vector<2x32xf32>, vector<32x32xf32>, vector<2x32xf32> -> vector<2x32xf32>
    %199 = arith.addf %182, %198 : vector<2x32xf32>
    %200 = arith.negf %199 : vector<2x32xf32>
    %201 = math.exp %200 : vector<2x32xf32>
    %cst_57 = arith.constant 1.000000e+00 : f32
    %202 = vector.broadcast %cst_57 : f32 to vector<2x32xf32>
    %203 = arith.addf %202, %201 : vector<2x32xf32>
    %204 = arith.divf %202, %203 : vector<2x32xf32>
    %cst_58 = arith.constant dense<0.000000e+00> : vector<2x32xf32>
    %205 = tpu.matmul %176, %20, %cst_58 {dimension_numbers = #tpu.dot_dimension_numbers<[1], [0], [0], [1], [0, 0, 1, 1], [], []>, precision = #tpu.contract_precision<fp32>} : vector<2x32xf32>, vector<32x32xf32>, vector<2x32xf32> -> vector<2x32xf32>
    %206 = arith.addf %187, %205 : vector<2x32xf32>
    %207 = arith.negf %206 : vector<2x32xf32>
    %208 = math.exp %207 : vector<2x32xf32>
    %cst_59 = arith.constant 1.000000e+00 : f32
    %209 = vector.broadcast %cst_59 : f32 to vector<2x32xf32>
    %210 = arith.addf %209, %208 : vector<2x32xf32>
    %211 = arith.divf %209, %210 : vector<2x32xf32>
    %cst_60 = arith.constant dense<0.000000e+00> : vector<2x32xf32>
    %212 = tpu.matmul %176, %24, %cst_60 {dimension_numbers = #tpu.dot_dimension_numbers<[1], [0], [0], [1], [0, 0, 1, 1], [], []>, precision = #tpu.contract_precision<fp32>} : vector<2x32xf32>, vector<32x32xf32>, vector<2x32xf32> -> vector<2x32xf32>
    %213 = arith.addf %197, %212 : vector<2x32xf32>
    %214 = arith.negf %213 : vector<2x32xf32>
    %215 = math.exp %214 : vector<2x32xf32>
    %cst_61 = arith.constant 1.000000e+00 : f32
    %216 = vector.broadcast %cst_61 : f32 to vector<2x32xf32>
    %217 = arith.addf %216, %215 : vector<2x32xf32>
    %218 = arith.divf %216, %217 : vector<2x32xf32>
    %cst_62 = arith.constant dense<0.000000e+00> : vector<2x32xf32>
    %219 = tpu.matmul %176, %22, %cst_62 {dimension_numbers = #tpu.dot_dimension_numbers<[1], [0], [0], [1], [0, 0, 1, 1], [], []>, precision = #tpu.contract_precision<fp32>} : vector<2x32xf32>, vector<32x32xf32>, vector<2x32xf32> -> vector<2x32xf32>
    %220 = arith.addf %192, %219 : vector<2x32xf32>
    %221 = math.tanh %220 : vector<2x32xf32>
    %222 = arith.mulf %211, %174 : vector<2x32xf32>
    %223 = arith.mulf %204, %221 : vector<2x32xf32>
    %224 = arith.addf %222, %223 : vector<2x32xf32>
    %225 = math.tanh %224 : vector<2x32xf32>
    %226 = arith.mulf %218, %225 : vector<2x32xf32>
    %227 = vector.extract_strided_slice %0 {offsets = [0, 4], sizes = [2, 1], strides = [1, 1]} : vector<2x8xf32> to vector<2x1xf32>
    %228 = vector.broadcast %227 : vector<2x1xf32> to vector<2x32xf32>
    %229 = vector.broadcast %2 : vector<1x32xf32> to vector<2x32xf32>
    %230 = arith.mulf %228, %229 : vector<2x32xf32>
    %231 = vector.broadcast %10 : vector<1x32xf32> to vector<2x32xf32>
    %232 = arith.addf %230, %231 : vector<2x32xf32>
    %233 = vector.broadcast %227 : vector<2x1xf32> to vector<2x32xf32>
    %234 = vector.broadcast %4 : vector<1x32xf32> to vector<2x32xf32>
    %235 = arith.mulf %233, %234 : vector<2x32xf32>
    %236 = vector.broadcast %12 : vector<1x32xf32> to vector<2x32xf32>
    %237 = arith.addf %235, %236 : vector<2x32xf32>
    %238 = vector.broadcast %227 : vector<2x1xf32> to vector<2x32xf32>
    %239 = vector.broadcast %6 : vector<1x32xf32> to vector<2x32xf32>
    %240 = arith.mulf %238, %239 : vector<2x32xf32>
    %241 = vector.broadcast %14 : vector<1x32xf32> to vector<2x32xf32>
    %242 = arith.addf %240, %241 : vector<2x32xf32>
    %243 = vector.broadcast %227 : vector<2x1xf32> to vector<2x32xf32>
    %244 = vector.broadcast %8 : vector<1x32xf32> to vector<2x32xf32>
    %245 = arith.mulf %243, %244 : vector<2x32xf32>
    %246 = vector.broadcast %16 : vector<1x32xf32> to vector<2x32xf32>
    %247 = arith.addf %245, %246 : vector<2x32xf32>
    %cst_63 = arith.constant dense<0.000000e+00> : vector<2x32xf32>
    %248 = tpu.matmul %226, %18, %cst_63 {dimension_numbers = #tpu.dot_dimension_numbers<[1], [0], [0], [1], [0, 0, 1, 1], [], []>, precision = #tpu.contract_precision<fp32>} : vector<2x32xf32>, vector<32x32xf32>, vector<2x32xf32> -> vector<2x32xf32>
    %249 = arith.addf %232, %248 : vector<2x32xf32>
    %250 = arith.negf %249 : vector<2x32xf32>
    %251 = math.exp %250 : vector<2x32xf32>
    %cst_64 = arith.constant 1.000000e+00 : f32
    %252 = vector.broadcast %cst_64 : f32 to vector<2x32xf32>
    %253 = arith.addf %252, %251 : vector<2x32xf32>
    %254 = arith.divf %252, %253 : vector<2x32xf32>
    %cst_65 = arith.constant dense<0.000000e+00> : vector<2x32xf32>
    %255 = tpu.matmul %226, %20, %cst_65 {dimension_numbers = #tpu.dot_dimension_numbers<[1], [0], [0], [1], [0, 0, 1, 1], [], []>, precision = #tpu.contract_precision<fp32>} : vector<2x32xf32>, vector<32x32xf32>, vector<2x32xf32> -> vector<2x32xf32>
    %256 = arith.addf %237, %255 : vector<2x32xf32>
    %257 = arith.negf %256 : vector<2x32xf32>
    %258 = math.exp %257 : vector<2x32xf32>
    %cst_66 = arith.constant 1.000000e+00 : f32
    %259 = vector.broadcast %cst_66 : f32 to vector<2x32xf32>
    %260 = arith.addf %259, %258 : vector<2x32xf32>
    %261 = arith.divf %259, %260 : vector<2x32xf32>
    %cst_67 = arith.constant dense<0.000000e+00> : vector<2x32xf32>
    %262 = tpu.matmul %226, %24, %cst_67 {dimension_numbers = #tpu.dot_dimension_numbers<[1], [0], [0], [1], [0, 0, 1, 1], [], []>, precision = #tpu.contract_precision<fp32>} : vector<2x32xf32>, vector<32x32xf32>, vector<2x32xf32> -> vector<2x32xf32>
    %263 = arith.addf %247, %262 : vector<2x32xf32>
    %264 = arith.negf %263 : vector<2x32xf32>
    %265 = math.exp %264 : vector<2x32xf32>
    %cst_68 = arith.constant 1.000000e+00 : f32
    %266 = vector.broadcast %cst_68 : f32 to vector<2x32xf32>
    %267 = arith.addf %266, %265 : vector<2x32xf32>
    %268 = arith.divf %266, %267 : vector<2x32xf32>
    %cst_69 = arith.constant dense<0.000000e+00> : vector<2x32xf32>
    %269 = tpu.matmul %226, %22, %cst_69 {dimension_numbers = #tpu.dot_dimension_numbers<[1], [0], [0], [1], [0, 0, 1, 1], [], []>, precision = #tpu.contract_precision<fp32>} : vector<2x32xf32>, vector<32x32xf32>, vector<2x32xf32> -> vector<2x32xf32>
    %270 = arith.addf %242, %269 : vector<2x32xf32>
    %271 = math.tanh %270 : vector<2x32xf32>
    %272 = arith.mulf %261, %224 : vector<2x32xf32>
    %273 = arith.mulf %254, %271 : vector<2x32xf32>
    %274 = arith.addf %272, %273 : vector<2x32xf32>
    %275 = math.tanh %274 : vector<2x32xf32>
    %276 = arith.mulf %268, %275 : vector<2x32xf32>
    %277 = vector.extract_strided_slice %0 {offsets = [0, 5], sizes = [2, 1], strides = [1, 1]} : vector<2x8xf32> to vector<2x1xf32>
    %278 = vector.broadcast %277 : vector<2x1xf32> to vector<2x32xf32>
    %279 = vector.broadcast %2 : vector<1x32xf32> to vector<2x32xf32>
    %280 = arith.mulf %278, %279 : vector<2x32xf32>
    %281 = vector.broadcast %10 : vector<1x32xf32> to vector<2x32xf32>
    %282 = arith.addf %280, %281 : vector<2x32xf32>
    %283 = vector.broadcast %277 : vector<2x1xf32> to vector<2x32xf32>
    %284 = vector.broadcast %4 : vector<1x32xf32> to vector<2x32xf32>
    %285 = arith.mulf %283, %284 : vector<2x32xf32>
    %286 = vector.broadcast %12 : vector<1x32xf32> to vector<2x32xf32>
    %287 = arith.addf %285, %286 : vector<2x32xf32>
    %288 = vector.broadcast %277 : vector<2x1xf32> to vector<2x32xf32>
    %289 = vector.broadcast %6 : vector<1x32xf32> to vector<2x32xf32>
    %290 = arith.mulf %288, %289 : vector<2x32xf32>
    %291 = vector.broadcast %14 : vector<1x32xf32> to vector<2x32xf32>
    %292 = arith.addf %290, %291 : vector<2x32xf32>
    %293 = vector.broadcast %277 : vector<2x1xf32> to vector<2x32xf32>
    %294 = vector.broadcast %8 : vector<1x32xf32> to vector<2x32xf32>
    %295 = arith.mulf %293, %294 : vector<2x32xf32>
    %296 = vector.broadcast %16 : vector<1x32xf32> to vector<2x32xf32>
    %297 = arith.addf %295, %296 : vector<2x32xf32>
    %cst_70 = arith.constant dense<0.000000e+00> : vector<2x32xf32>
    %298 = tpu.matmul %276, %18, %cst_70 {dimension_numbers = #tpu.dot_dimension_numbers<[1], [0], [0], [1], [0, 0, 1, 1], [], []>, precision = #tpu.contract_precision<fp32>} : vector<2x32xf32>, vector<32x32xf32>, vector<2x32xf32> -> vector<2x32xf32>
    %299 = arith.addf %282, %298 : vector<2x32xf32>
    %300 = arith.negf %299 : vector<2x32xf32>
    %301 = math.exp %300 : vector<2x32xf32>
    %cst_71 = arith.constant 1.000000e+00 : f32
    %302 = vector.broadcast %cst_71 : f32 to vector<2x32xf32>
    %303 = arith.addf %302, %301 : vector<2x32xf32>
    %304 = arith.divf %302, %303 : vector<2x32xf32>
    %cst_72 = arith.constant dense<0.000000e+00> : vector<2x32xf32>
    %305 = tpu.matmul %276, %20, %cst_72 {dimension_numbers = #tpu.dot_dimension_numbers<[1], [0], [0], [1], [0, 0, 1, 1], [], []>, precision = #tpu.contract_precision<fp32>} : vector<2x32xf32>, vector<32x32xf32>, vector<2x32xf32> -> vector<2x32xf32>
    %306 = arith.addf %287, %305 : vector<2x32xf32>
    %307 = arith.negf %306 : vector<2x32xf32>
    %308 = math.exp %307 : vector<2x32xf32>
    %cst_73 = arith.constant 1.000000e+00 : f32
    %309 = vector.broadcast %cst_73 : f32 to vector<2x32xf32>
    %310 = arith.addf %309, %308 : vector<2x32xf32>
    %311 = arith.divf %309, %310 : vector<2x32xf32>
    %cst_74 = arith.constant dense<0.000000e+00> : vector<2x32xf32>
    %312 = tpu.matmul %276, %24, %cst_74 {dimension_numbers = #tpu.dot_dimension_numbers<[1], [0], [0], [1], [0, 0, 1, 1], [], []>, precision = #tpu.contract_precision<fp32>} : vector<2x32xf32>, vector<32x32xf32>, vector<2x32xf32> -> vector<2x32xf32>
    %313 = arith.addf %297, %312 : vector<2x32xf32>
    %314 = arith.negf %313 : vector<2x32xf32>
    %315 = math.exp %314 : vector<2x32xf32>
    %cst_75 = arith.constant 1.000000e+00 : f32
    %316 = vector.broadcast %cst_75 : f32 to vector<2x32xf32>
    %317 = arith.addf %316, %315 : vector<2x32xf32>
    %318 = arith.divf %316, %317 : vector<2x32xf32>
    %cst_76 = arith.constant dense<0.000000e+00> : vector<2x32xf32>
    %319 = tpu.matmul %276, %22, %cst_76 {dimension_numbers = #tpu.dot_dimension_numbers<[1], [0], [0], [1], [0, 0, 1, 1], [], []>, precision = #tpu.contract_precision<fp32>} : vector<2x32xf32>, vector<32x32xf32>, vector<2x32xf32> -> vector<2x32xf32>
    %320 = arith.addf %292, %319 : vector<2x32xf32>
    %321 = math.tanh %320 : vector<2x32xf32>
    %322 = arith.mulf %311, %274 : vector<2x32xf32>
    %323 = arith.mulf %304, %321 : vector<2x32xf32>
    %324 = arith.addf %322, %323 : vector<2x32xf32>
    %325 = math.tanh %324 : vector<2x32xf32>
    %326 = arith.mulf %318, %325 : vector<2x32xf32>
    %327 = vector.extract_strided_slice %0 {offsets = [0, 6], sizes = [2, 1], strides = [1, 1]} : vector<2x8xf32> to vector<2x1xf32>
    %328 = vector.broadcast %327 : vector<2x1xf32> to vector<2x32xf32>
    %329 = vector.broadcast %2 : vector<1x32xf32> to vector<2x32xf32>
    %330 = arith.mulf %328, %329 : vector<2x32xf32>
    %331 = vector.broadcast %10 : vector<1x32xf32> to vector<2x32xf32>
    %332 = arith.addf %330, %331 : vector<2x32xf32>
    %333 = vector.broadcast %327 : vector<2x1xf32> to vector<2x32xf32>
    %334 = vector.broadcast %4 : vector<1x32xf32> to vector<2x32xf32>
    %335 = arith.mulf %333, %334 : vector<2x32xf32>
    %336 = vector.broadcast %12 : vector<1x32xf32> to vector<2x32xf32>
    %337 = arith.addf %335, %336 : vector<2x32xf32>
    %338 = vector.broadcast %327 : vector<2x1xf32> to vector<2x32xf32>
    %339 = vector.broadcast %6 : vector<1x32xf32> to vector<2x32xf32>
    %340 = arith.mulf %338, %339 : vector<2x32xf32>
    %341 = vector.broadcast %14 : vector<1x32xf32> to vector<2x32xf32>
    %342 = arith.addf %340, %341 : vector<2x32xf32>
    %343 = vector.broadcast %327 : vector<2x1xf32> to vector<2x32xf32>
    %344 = vector.broadcast %8 : vector<1x32xf32> to vector<2x32xf32>
    %345 = arith.mulf %343, %344 : vector<2x32xf32>
    %346 = vector.broadcast %16 : vector<1x32xf32> to vector<2x32xf32>
    %347 = arith.addf %345, %346 : vector<2x32xf32>
    %cst_77 = arith.constant dense<0.000000e+00> : vector<2x32xf32>
    %348 = tpu.matmul %326, %18, %cst_77 {dimension_numbers = #tpu.dot_dimension_numbers<[1], [0], [0], [1], [0, 0, 1, 1], [], []>, precision = #tpu.contract_precision<fp32>} : vector<2x32xf32>, vector<32x32xf32>, vector<2x32xf32> -> vector<2x32xf32>
    %349 = arith.addf %332, %348 : vector<2x32xf32>
    %350 = arith.negf %349 : vector<2x32xf32>
    %351 = math.exp %350 : vector<2x32xf32>
    %cst_78 = arith.constant 1.000000e+00 : f32
    %352 = vector.broadcast %cst_78 : f32 to vector<2x32xf32>
    %353 = arith.addf %352, %351 : vector<2x32xf32>
    %354 = arith.divf %352, %353 : vector<2x32xf32>
    %cst_79 = arith.constant dense<0.000000e+00> : vector<2x32xf32>
    %355 = tpu.matmul %326, %20, %cst_79 {dimension_numbers = #tpu.dot_dimension_numbers<[1], [0], [0], [1], [0, 0, 1, 1], [], []>, precision = #tpu.contract_precision<fp32>} : vector<2x32xf32>, vector<32x32xf32>, vector<2x32xf32> -> vector<2x32xf32>
    %356 = arith.addf %337, %355 : vector<2x32xf32>
    %357 = arith.negf %356 : vector<2x32xf32>
    %358 = math.exp %357 : vector<2x32xf32>
    %cst_80 = arith.constant 1.000000e+00 : f32
    %359 = vector.broadcast %cst_80 : f32 to vector<2x32xf32>
    %360 = arith.addf %359, %358 : vector<2x32xf32>
    %361 = arith.divf %359, %360 : vector<2x32xf32>
    %cst_81 = arith.constant dense<0.000000e+00> : vector<2x32xf32>
    %362 = tpu.matmul %326, %24, %cst_81 {dimension_numbers = #tpu.dot_dimension_numbers<[1], [0], [0], [1], [0, 0, 1, 1], [], []>, precision = #tpu.contract_precision<fp32>} : vector<2x32xf32>, vector<32x32xf32>, vector<2x32xf32> -> vector<2x32xf32>
    %363 = arith.addf %347, %362 : vector<2x32xf32>
    %364 = arith.negf %363 : vector<2x32xf32>
    %365 = math.exp %364 : vector<2x32xf32>
    %cst_82 = arith.constant 1.000000e+00 : f32
    %366 = vector.broadcast %cst_82 : f32 to vector<2x32xf32>
    %367 = arith.addf %366, %365 : vector<2x32xf32>
    %368 = arith.divf %366, %367 : vector<2x32xf32>
    %cst_83 = arith.constant dense<0.000000e+00> : vector<2x32xf32>
    %369 = tpu.matmul %326, %22, %cst_83 {dimension_numbers = #tpu.dot_dimension_numbers<[1], [0], [0], [1], [0, 0, 1, 1], [], []>, precision = #tpu.contract_precision<fp32>} : vector<2x32xf32>, vector<32x32xf32>, vector<2x32xf32> -> vector<2x32xf32>
    %370 = arith.addf %342, %369 : vector<2x32xf32>
    %371 = math.tanh %370 : vector<2x32xf32>
    %372 = arith.mulf %361, %324 : vector<2x32xf32>
    %373 = arith.mulf %354, %371 : vector<2x32xf32>
    %374 = arith.addf %372, %373 : vector<2x32xf32>
    %375 = math.tanh %374 : vector<2x32xf32>
    %376 = arith.mulf %368, %375 : vector<2x32xf32>
    %377 = vector.extract_strided_slice %0 {offsets = [0, 7], sizes = [2, 1], strides = [1, 1]} : vector<2x8xf32> to vector<2x1xf32>
    %378 = vector.broadcast %377 : vector<2x1xf32> to vector<2x32xf32>
    %379 = vector.broadcast %2 : vector<1x32xf32> to vector<2x32xf32>
    %380 = arith.mulf %378, %379 : vector<2x32xf32>
    %381 = vector.broadcast %10 : vector<1x32xf32> to vector<2x32xf32>
    %382 = arith.addf %380, %381 : vector<2x32xf32>
    %383 = vector.broadcast %377 : vector<2x1xf32> to vector<2x32xf32>
    %384 = vector.broadcast %4 : vector<1x32xf32> to vector<2x32xf32>
    %385 = arith.mulf %383, %384 : vector<2x32xf32>
    %386 = vector.broadcast %12 : vector<1x32xf32> to vector<2x32xf32>
    %387 = arith.addf %385, %386 : vector<2x32xf32>
    %388 = vector.broadcast %377 : vector<2x1xf32> to vector<2x32xf32>
    %389 = vector.broadcast %6 : vector<1x32xf32> to vector<2x32xf32>
    %390 = arith.mulf %388, %389 : vector<2x32xf32>
    %391 = vector.broadcast %14 : vector<1x32xf32> to vector<2x32xf32>
    %392 = arith.addf %390, %391 : vector<2x32xf32>
    %393 = vector.broadcast %377 : vector<2x1xf32> to vector<2x32xf32>
    %394 = vector.broadcast %8 : vector<1x32xf32> to vector<2x32xf32>
    %395 = arith.mulf %393, %394 : vector<2x32xf32>
    %396 = vector.broadcast %16 : vector<1x32xf32> to vector<2x32xf32>
    %397 = arith.addf %395, %396 : vector<2x32xf32>
    %cst_84 = arith.constant dense<0.000000e+00> : vector<2x32xf32>
    %398 = tpu.matmul %376, %18, %cst_84 {dimension_numbers = #tpu.dot_dimension_numbers<[1], [0], [0], [1], [0, 0, 1, 1], [], []>, precision = #tpu.contract_precision<fp32>} : vector<2x32xf32>, vector<32x32xf32>, vector<2x32xf32> -> vector<2x32xf32>
    %399 = arith.addf %382, %398 : vector<2x32xf32>
    %400 = arith.negf %399 : vector<2x32xf32>
    %401 = math.exp %400 : vector<2x32xf32>
    %cst_85 = arith.constant 1.000000e+00 : f32
    %402 = vector.broadcast %cst_85 : f32 to vector<2x32xf32>
    %403 = arith.addf %402, %401 : vector<2x32xf32>
    %404 = arith.divf %402, %403 : vector<2x32xf32>
    %cst_86 = arith.constant dense<0.000000e+00> : vector<2x32xf32>
    %405 = tpu.matmul %376, %20, %cst_86 {dimension_numbers = #tpu.dot_dimension_numbers<[1], [0], [0], [1], [0, 0, 1, 1], [], []>, precision = #tpu.contract_precision<fp32>} : vector<2x32xf32>, vector<32x32xf32>, vector<2x32xf32> -> vector<2x32xf32>
    %406 = arith.addf %387, %405 : vector<2x32xf32>
    %407 = arith.negf %406 : vector<2x32xf32>
    %408 = math.exp %407 : vector<2x32xf32>
    %cst_87 = arith.constant 1.000000e+00 : f32
    %409 = vector.broadcast %cst_87 : f32 to vector<2x32xf32>
    %410 = arith.addf %409, %408 : vector<2x32xf32>
    %411 = arith.divf %409, %410 : vector<2x32xf32>
    %cst_88 = arith.constant dense<0.000000e+00> : vector<2x32xf32>
    %412 = tpu.matmul %376, %24, %cst_88 {dimension_numbers = #tpu.dot_dimension_numbers<[1], [0], [0], [1], [0, 0, 1, 1], [], []>, precision = #tpu.contract_precision<fp32>} : vector<2x32xf32>, vector<32x32xf32>, vector<2x32xf32> -> vector<2x32xf32>
    %413 = arith.addf %397, %412 : vector<2x32xf32>
    %414 = arith.negf %413 : vector<2x32xf32>
    %415 = math.exp %414 : vector<2x32xf32>
    %cst_89 = arith.constant 1.000000e+00 : f32
    %416 = vector.broadcast %cst_89 : f32 to vector<2x32xf32>
    %417 = arith.addf %416, %415 : vector<2x32xf32>
    %418 = arith.divf %416, %417 : vector<2x32xf32>
    %cst_90 = arith.constant dense<0.000000e+00> : vector<2x32xf32>
    %419 = tpu.matmul %376, %22, %cst_90 {dimension_numbers = #tpu.dot_dimension_numbers<[1], [0], [0], [1], [0, 0, 1, 1], [], []>, precision = #tpu.contract_precision<fp32>} : vector<2x32xf32>, vector<32x32xf32>, vector<2x32xf32> -> vector<2x32xf32>
    %420 = arith.addf %392, %419 : vector<2x32xf32>
    %421 = math.tanh %420 : vector<2x32xf32>
    %422 = arith.mulf %411, %374 : vector<2x32xf32>
    %423 = arith.mulf %404, %421 : vector<2x32xf32>
    %424 = arith.addf %422, %423 : vector<2x32xf32>
    %425 = math.tanh %424 : vector<2x32xf32>
    %426 = arith.mulf %418, %425 : vector<2x32xf32>
    %c0_91 = arith.constant 0 : index
    %c0_92 = arith.constant 0 : index
    %427 = vector.load %arg4[%c0_91, %c0_92] : memref<2x32xf32, #tpu.memory_space<vmem>>, vector<1x32xf32>
    %c1_93 = arith.constant 1 : index
    %c0_94 = arith.constant 0 : index
    %428 = vector.load %arg4[%c1_93, %c0_94] : memref<2x32xf32, #tpu.memory_space<vmem>>, vector<1x1xf32>
    %429 = vector.broadcast %427 : vector<1x32xf32> to vector<2x32xf32>
    %430 = arith.mulf %426, %429 : vector<2x32xf32>
    %cst_95 = arith.constant dense<0.000000e+00> : vector<2xf32>
    %431 = vector.multi_reduction <add>, %430, %cst_95 [1] : vector<2x32xf32> to vector<2xf32>
    %432 = vector.shape_cast %431 : vector<2xf32> to vector<2x1xf32>
    %433 = vector.broadcast %428 : vector<1x1xf32> to vector<2x1xf32>
    %434 = arith.addf %432, %433 : vector<2x1xf32>
    %c0_96 = arith.constant 0 : index
    %c0_97 = arith.constant 0 : index
    %435 = vector.load %arg5[%c0_96, %c0_97] : memref<2x1xf32, #tpu.memory_space<vmem>>, vector<2x1xf32>
    tpu.vector_store %arg5[%c0_96, %c0_97], %434 {strides = array<i32>} : memref<2x1xf32, #tpu.memory_space<vmem>>, vector<2x1xf32>,
    return
  }
}

</mosaic_0001>

<bundles_post_ra>
// kernel: my_lstm_forward.1
= control target key start
LH: loop header
LB: loop body
LE: loop exit
PB: predicated region body
PF: predicated region fallthrough
CT: control target
= control target key end

     0   :  { %10 = vsyncpa [#allocation3], 0  ;;  %s8578_s0 = inlined_call_operand.hbm [shape: f32[2,8], index: 0, kind: input, shape index: {}]   ;;  %s8579_s1 = inlined_call_operand.vmem [shape: f32[4,1,32], index: 1, kind: input, shape index: {}]   ;;  %s8580_s2 = inlined_call_operand.hbm [shape: f32[4,1,32], index: 2, kind: input, shape index: {}]   ;;  %s8581_s3 = inlined_call_operand.hbm [shape: f32[4,32,32], index: 3, kind: input, shape index: {}]   ;;  %s8582_s4 = inlined_call_operand.hbm [shape: f32[2,32], index: 4, kind: input, shape index: {}]   ;;  %s8583_s5 = inlined_call_operand.vmem [shape: f32[2,1], index: 5, kind: output, shape index: {}]  }
   0x1   :  { %11 = vsyncpa [#allocation5], 0  ;;  %s30_s20 = sshll.u32 %s8580_s2, 4  ;;  %s31_s20 = int_to_ptr.hbm [resolvable:$true] %s30_s20 }
   0x2   :  { %12 = vsyncpa [#allocation8], 0  ;;  %s7045_s21 = smov [#allocation4]   ;;  %s18_s25 = sshll.u32 %s8578_s0, 4  ;;  %s19_s25 = int_to_ptr.hbm [resolvable:$true] %s18_s25 }
   0x3   :  { %s32_s22 = sshll.u32 %s7045_s21, 4  ;;  %s7046_s26 = smov 16   ;;  %s33_s22 = int_to_ptr.vmem [resolvable:$true] %s32_s22 }
   0x4   :  { %s7047_s27 = smov 1   ;;  %s7048_s28 = smov [#allocation2]  }
   0x5   :  { %38 = dma.hbm_to_vmem [thread:$0]  %s31_s20, 64, %s33_s22, [#allocation5], %s7046_s26, %s7046_s26, %s7047_s27  }
   0x6   :  { %s20_s29 = sshll.u32 %s7048_s28, 4  ;;  %s43_s7 = sshll.u32 %s8581_s3, 4  ;;  %s21_s29 = int_to_ptr.vmem [resolvable:$true] %s20_s29  ;;  %s44_s7 = int_to_ptr.hbm [resolvable:$true] %s43_s7 }
   0x7   :  { %23 = dma.hbm_to_vmem [thread:$0]  %s19_s25, 32, %s21_s29, [#allocation3]  }
   0x8   :  { %s7049_s2 = smov [#allocation6]   ;;  %s57_s0 = sshll.u32 %s8582_s4, 4  ;;  %s58_s0 = int_to_ptr.hbm [resolvable:$true] %s57_s0 }
   0x9   :  { %s45_s8 = sshll.u32 %s7049_s2, 4  ;;  %s7050_s11 = smov 128   ;;  %s46_s8 = int_to_ptr.vmem [resolvable:$true] %s45_s8 }
   0xa   :  { %s7051_s12 = smov 8   ;;  %s7052_s13 = smov [#allocation7]  }
   0xb   :  { %51 = dma.hbm_to_vmem [thread:$0]  %s44_s7, 2048, %s46_s8, [#allocation5], %s7050_s11, %s7050_s11, %s7051_s12  }
   0xc   :  { %s59_s14 = sshll.u32 %s7052_s13, 4  ;;  %s60_s14 = int_to_ptr.vmem [resolvable:$true] %s59_s14 }
   0xd   :  { %62 = dma.hbm_to_vmem [thread:$0]  %s58_s0, 32, %s60_s14, [#allocation8]  }
   0xe   :  { %7039 = dma.done.wait [#allocation3], 32  }
   0xf   :  { %7040 = vsyncadd [#allocation3], 4294967264 }
  0x10   :  { %7041 = dma.done.wait [#allocation5], 2112  }
  0x11   :  { %7042 = vsyncadd [#allocation5], 4294965184 }
  0x12   :  { %7043 = dma.done.wait [#allocation8], 32  }
  0x13   :  { %7044 = vsyncadd [#allocation8], 4294967264  ;;  %v97_v0 = vld [vmem:[#allocation6 + $0x18] sm:$0xff]  ;;  %v96_v1 = vld [vmem:[#allocation6 + $0x10] sm:$0xff]  ;;  %v8584_v40 = vmov 0.0   ;;  %vm150_vm12 = vcmask 261120  }
  0x14   :  { %v95_v2 = vld [vmem:[#allocation6 + $0x8] sm:$0xff]  ;;  %v7104_v3 = vand.u32 4294901760, %v97_v0  ;;  %v7106_v4 = vand.u32 4294901760, %v96_v1  ;;  %v94_v6 = vld [vmem:[#allocation6] sm:$0xff]  ;;  %v102_v7 = vld [vmem:[#allocation6 + $0x38] sm:$0xff] }
  0x15   :  { %v7108_v5 = vand.u32 4294901760, %v95_v2  ;;  %v101_v8 = vld [vmem:[#allocation6 + $0x30] sm:$0xff]  ;;  %v7110_v9 = vand.u32 4294901760, %v94_v6  ;;  %v7112_v10 = vand.u32 4294901760, %v102_v7  ;;  %v100_v12 = vld [vmem:[#allocation6 + $0x28] sm:$0xff]  ;;  %v99_v13 = vld [vmem:[#allocation6 + $0x20] sm:$0xff] }
  0x16   :  { %8714 = vst [vmem:[#allocation12_spill] sm:$0xff] %v7104_v3  ;;  %v7114_v11 = vand.u32 4294901760, %v101_v8  ;;  %167 = vmatpush.msra.mxu0 %v7104_v3  ;;  %v7118_v14 = vsub.f32 %v97_v0, %v7104_v3  ;;  %267 = vmatpush.msra.mxu3 %v7104_v3  ;;  %v7122_v15 = vsub.f32 %v96_v1, %v7106_v4  ;;  %v7127_v17 = vand.u32 4294901760, %v100_v12  ;;  %v112_v48 = vld [vmem:[#allocation6 + $0x78] sm:$0xff]  ;;  %v111_v50 = vld [vmem:[#allocation6 + $0x70] sm:$0xff]  ;;  %v110_v52 = vld [vmem:[#allocation6 + $0x68] sm:$0xff] }
  0x17   :  { %8715 = vst [vmem:[#allocation13_spill] sm:$0xff] %v7106_v4  ;;  %v7125_v16 = vsub.f32 %v95_v2, %v7108_v5  ;;  %v7130_v18 = vsub.f32 %v94_v6, %v7110_v9  ;;  %v7133_v19 = vsub.f32 %v102_v7, %v7112_v10  ;;  %v7138_v21 = vand.u32 4294901760, %v99_v13  ;;  %v109_v56 = vld [vmem:[#allocation6 + $0x60] sm:$0xff]  ;;  %v107_v57 = vld [vmem:[#allocation6 + $0x58] sm:$0xff]  ;;  %v106_v59 = vld [vmem:[#allocation6 + $0x50] sm:$0xff] }
  0x18   :  { %8716 = vst [vmem:[#allocation14_spill] sm:$0xff] %v7108_v5  ;;  %v7136_v20 = vsub.f32 %v101_v8, %v7114_v11  ;;  %238 = vmatpush.msra.mxu2 %v7118_v14  ;;  %169 = vmatpush.msra.mxu0 %v7106_v4  ;;  %v7143_v22 = vand.u32 4294901760, %v7118_v14  ;;  %v7146_v23 = vand.u32 4294901760, %v7122_v15  ;;  %v7152_v25 = vsub.f32 %v100_v12, %v7127_v17  ;;  %v105_v0 = vld [vmem:[#allocation6 + $0x48] sm:$0xff]  ;;  %v104_v6 = vld [vmem:[#allocation6 + $0x40] sm:$0xff] }
  0x19   :  { %8717 = vst [vmem:[#allocation15_spill] sm:$0xff] %v7110_v9  ;;  %v7149_v24 = vand.u32 4294901760, %v7125_v16  ;;  %269 = vmatpush.msra.mxu3 %v7106_v4  ;;  %v7156_v26 = vand.u32 4294901760, %v7133_v19  ;;  %v7159_v27 = vand.u32 4294901760, %v7130_v18  ;;  %v7165_v29 = vsub.f32 %v99_v13, %v7138_v21 }
  0x1a   :  { %8718 = vst [vmem:[#allocation16_spill] sm:$0xff] %v7118_v14  ;;  %v7162_v28 = vand.u32 4294901760, %v7136_v20  ;;  %241 = vmatpush.msra.mxu2 %v7122_v15  ;;  %171 = vmatpush.msra.mxu0 %v7108_v5  ;;  %v198_v30 = vsub.f32 %v7118_v14, %v7143_v22  ;;  %v204_v31 = vsub.f32 %v7122_v15, %v7146_v23  ;;  %v7176_v33 = vand.u32 4294901760, %v7152_v25 }
  0x1b   :  { %8719 = vst [vmem:[#allocation17_spill] sm:$0xff] %v7122_v15  ;;  %v210_v32 = vsub.f32 %v7125_v16, %v7149_v24  ;;  %271 = vmatpush.msra.mxu3 %v7108_v5  ;;  %v403_v34 = vsub.f32 %v7133_v19, %v7156_v26  ;;  %v216_v38 = vsub.f32 %v7130_v18, %v7159_v27  ;;  %v7192_v39 = vand.u32 4294901760, %v7165_v29 }
  0x1c   :  { %8720 = vst [vmem:[#allocation18_spill] sm:$0xff] %v7125_v16  ;;  %v409_v35 = vsub.f32 %v7136_v20, %v7162_v28  ;;  %v7183_v36 = vand.u32 4294901760, %v198_v30  ;;  %244 = vmatpush.msra.mxu2 %v7125_v16  ;;  %173 = vmatpush.msra.mxu0 %v7110_v9  ;;  %v7187_v37 = vand.u32 4294901760, %v204_v31  ;;  %v415_v43 = vsub.f32 %v7152_v25, %v7176_v33 }
  0x1d   :  { %8721 = vst [vmem:[#allocation19_spill] sm:$0xff] %v7130_v18  ;;  %273 = vmatpush.msra.mxu3 %v7110_v9  ;;  %179 = vmatmul.f32.vlgmr.msra.gmra.mxu0 %v8584_v40  ;;  %v7196_v41 = vand.u32 4294901760, %v403_v34  ;;  %v7200_v42 = vand.u32 4294901760, %v210_v32  ;;  %v7210_v45 = vand.u32 4294901760, %v216_v38  ;;  %v421_v46 = vsub.f32 %v7165_v29, %v7192_v39 }
  0x1e   :  { %8722 = vst [vmem:[#allocation20_spill] sm:$0xff] %v7143_v22  ;;  %200 = vmatpush.msra.mxu1 %v7183_v36  ;;  %247 = vmatpush.msra.mxu2 %v7130_v18  ;;  %v7206_v44 = vand.u32 4294901760, %v409_v35  ;;  %v7218_v47 = vand.u32 4294901760, %v415_v43  ;;  %v7230_v51 = vand.u32 4294901760, %v112_v48  ;;  %v7236_v53 = vand.u32 4294901760, %v111_v50 }
  0x1f   :  { %8723 = vst [vmem:[#allocation21_spill] sm:$0xff] %v7146_v23  ;;  %250 = vmatmul.f32.vlgmr.msra.gmra.mxu2 %v8584_v40  ;;  %277 = vmatmul.f32.vlgmr.msra.gmra.mxu3 %v8584_v40  ;;  %v7224_v49 = vand.u32 4294901760, %v421_v46  ;;  %v7245_v55 = vand.u32 4294901760, %v110_v52  ;;  %v7256_v60 = vand.u32 4294901760, %v109_v56  ;;  %v7258_v61 = vand.u32 4294901760, %v107_v57 }
  0x20   :  { %8724 = vst [vmem:[#allocation22_spill] sm:$0xff] %v7149_v24  ;;  %206 = vmatpush.msra.mxu1 %v7187_v37  ;;  %372 = vmatpush.msrb.mxu2 %v7112_v10  ;;  %v7243_v54 = vsub.f32 %v112_v48, %v7230_v51  ;;  %v7252_v58 = vsub.f32 %v111_v50, %v7236_v53  ;;  %v7270_v1 = vand.u32 4294901760, %v106_v59  ;;  %v7285_v12 = vand.u32 4294901760, %v105_v0 }
  0x21   :  { %8725 = vst [vmem:[#allocation23_spill] sm:$0xff] %v7152_v25  ;;  %296 = vmatpush.msrb.mxu0 %v7143_v22  ;;  %405 = vmatpush.msrb.mxu3 %v7196_v41  ;;  %v7266_v63 = vsub.f32 %v110_v52, %v7245_v55  ;;  %v7280_v7 = vsub.f32 %v109_v56, %v7256_v60  ;;  %v7299_v32 = vand.u32 4294901760, %v104_v6  ;;  %v7054_v56 = vmov 0  }
  0x22   :  { %8726 = vst [vmem:[#allocation24_spill] sm:$0xff] %v7159_v27  ;;  %212 = vmatpush.msra.mxu1 %v7200_v42  ;;  %374 = vmatpush.msrb.mxu2 %v7114_v11  ;;  %v7263_v62 = vand.u32 4294901760, %v7243_v54  ;;  %v7275_v2 = vand.u32 4294901760, %v7252_v58  ;;  %v7283_v8 = vsub.f32 %v107_v57, %v7258_v61  ;;  %v7297_v31 = vsub.f32 %v106_v59, %v7270_v1  ;;  %v7331_v57 = vld [vmem:[#allocation2] sm:$0x3] }
  0x23   :  { %8727 = vst [vmem:[#allocation25_spill] sm:$0xff] %v7165_v29  ;;  %300 = vmatpush.msrb.mxu0 %v7146_v23  ;;  %411 = vmatpush.msrb.mxu3 %v7206_v44  ;;  %v7292_v30 = vand.u32 4294901760, %v7266_v63  ;;  %v7311_v38 = vand.u32 4294901760, %v7280_v7  ;;  %v7314_v43 = vsub.f32 %v105_v0, %v7285_v12  ;;  %v7328_v52 = vsub.f32 %v104_v6, %v7299_v32 }
  0x24   :  { %8728 = vst [vmem:[#allocation26_spill] sm:$0xff] %v7183_v36  ;;  %218 = vmatpush.msra.mxu1 %v7210_v45  ;;  %376 = vmatpush.msrb.mxu2 %v7127_v17  ;;  %v608_v13 = vsub.f32 %v7243_v54, %v7263_v62  ;;  %v614_v34 = vsub.f32 %v7252_v58, %v7275_v2  ;;  %v7308_v35 = vand.u32 4294901760, %v7283_v8  ;;  %v7325_v50 = vand.u32 4294901760, %v7297_v31 }
  0x25   :  { %8729 = vst [vmem:[#allocation27_spill] sm:$0xff] %v7187_v37  ;;  %220 = vmatmul.f32.vlgmr.msra.gmra.mxu1 %v8584_v40  ;;  %304 = vmatpush.msrb.mxu0 %v7149_v24  ;;  %v620_v48 = vsub.f32 %v7266_v63, %v7292_v30  ;;  %v7342_v6 = vand.u32 4294901760, %v7314_v43 }
  0x26   :  { %8730 = vst [vmem:[#allocation28_spill] sm:$0xff] %v7196_v41  ;;  %327 = vmatpush.msrb.mxu1 %v7104_v3  ;;  %417 = vmatpush.msrb.mxu3 %v7218_v47  ;;  %v7318_v46 = vand.u32 4294901760, %v608_v13  ;;  %v7333_v59 = vand.u32 4294901760, %v614_v34  ;;  %v813_v0 = vsub.f32 %v7283_v8, %v7308_v35  ;;  %v626_v13 = vsub.f32 %v7280_v7, %v7311_v38 }
  0x27   :  { %8731 = vst [vmem:[#allocation29_spill] sm:$0xff] %v7200_v42  ;;  %378 = vmatpush.msrb.mxu2 %v7138_v21  ;;  %308 = vmatpush.msrb.mxu0 %v7159_v27  ;;  %v819_v34 = vsub.f32 %v7297_v31, %v7325_v50 }
  0x28   :  { %8732 = vst [vmem:[#allocation30_spill] sm:$0xff] %v7206_v44  ;;  %329 = vmatpush.msrb.mxu1 %v7106_v4  ;;  %423 = vmatpush.msrb.mxu3 %v7224_v49 }
  0x29   :  { %8733 = vst [vmem:[#allocation31_spill] sm:$0xff] %v7210_v45  ;;  %310 = vmatmul.f32.vlgmr.msrb.gmra.mxu0 %v8584_v40  ;;  %384 = vmatmul.f32.vlgmr.msrb.gmra.mxu2 %v8584_v40 }
  0x2a   :  { %8734 = vst [vmem:[#allocation32_spill] sm:$0xff] %v7218_v47  ;;  %331 = vmatpush.msrb.mxu1 %v7108_v5  ;;  %425 = vmatmul.f32.vlgmr.msrb.gmra.mxu3 %v8584_v40 }
  0x2b   :  { %8735 = vst [vmem:[#allocation33_spill] sm:$0xff] %v7224_v49  ;;  %501 = vmatpush.msra.mxu2 %v7156_v26  ;;  %443 = vmatpush.msra.mxu0 %v7133_v19 }
  0x2c   :  { %532 = vmatpush.msra.mxu3 %v7112_v10  ;;  %333 = vmatpush.msrb.mxu1 %v7110_v9  ;;  %8736 = vst [vmem:[#allocation34_spill] sm:$0xff] %v7252_v58 }
  0x2d   :  { %505 = vmatpush.msra.mxu2 %v7162_v28  ;;  %446 = vmatpush.msra.mxu0 %v7136_v20  ;;  %8737 = vst [vmem:[#allocation35_spill] sm:$0xff] %v7266_v63 }
  0x2e   :  { %534 = vmatpush.msra.mxu3 %v7114_v11  ;;  %335 = vmatmul.f32.vlgmr.msrb.gmra.mxu1 %v8584_v40  ;;  %8738 = vst [vmem:[#allocation36_spill] sm:$0xff] %v7280_v7 }
  0x2f   :  { %472 = vmatpush.msra.mxu1 %v7112_v10  ;;  %509 = vmatpush.msra.mxu2 %v7176_v33  ;;  %8739 = vst [vmem:[#allocation37_spill] sm:$0xff] %v7283_v8 }
  0x30   :  { %449 = vmatpush.msra.mxu0 %v7152_v25  ;;  %536 = vmatpush.msra.mxu3 %v7127_v17  ;;  %8740 = vst [vmem:[#allocation38_spill] sm:$0xff] %v7292_v30 }
  0x31   :  { %474 = vmatpush.msra.mxu1 %v7114_v11  ;;  %513 = vmatpush.msra.mxu2 %v7192_v39  ;;  %8741 = vst [vmem:[#allocation39_spill] sm:$0xff] %v7297_v31 }
  0x32   :  { %452 = vmatpush.msra.mxu0 %v7165_v29  ;;  %538 = vmatpush.msra.mxu3 %v7138_v21  ;;  %8742 = vst [vmem:[#allocation40_spill] sm:$0xff] %v7311_v38  ;;  %v825_v29 = vsub.f32 %v7314_v43, %v7342_v6 }
  0x33   :  { %455 = vmatmul.f32.vlgmr.msra.gmra.mxu0 %v8584_v40  ;;  %476 = vmatpush.msra.mxu1 %v7127_v17  ;;  %8743 = vst [vmem:[#allocation41_spill] sm:$0xff] %v7314_v43 }
  0x34   :  { %515 = vmatmul.f32.vlgmr.msra.gmra.mxu2 %v8584_v40  ;;  %540 = vmatmul.f32.vlgmr.msra.gmra.mxu3 %v8584_v40  ;;  %8744 = vst [vmem:[#allocation42_spill] sm:$0xff] %v7325_v50 }
  0x35   :  { %648 = vmatpush.msrb.mxu2 %v7243_v54  ;;  %577 = vmatpush.msrb.mxu0 %v7230_v51  ;;  %8745 = vst [vmem:[#allocation43_spill] sm:$0xff] %v7328_v52 }
  0x36   :  { %677 = vmatpush.msrb.mxu3 %v7230_v51  ;;  %478 = vmatpush.msra.mxu1 %v7138_v21  ;;  %8746 = vst [vmem:[#allocation44_spill] sm:$0xff] %v7342_v6 }
  0x37   :  { %651 = vmatpush.msrb.mxu2 %v7252_v58  ;;  %579 = vmatpush.msrb.mxu0 %v7236_v53  ;;  %v8748_v58 = vmov 0.0  }
  0x38   :  { %679 = vmatpush.msrb.mxu3 %v7236_v53  ;;  %6778 = vset.pattern.permute.xlu0 %v7054_v56  ;;  %v7346_v56 = vand.u32 4294901760, %v620_v48  ;;  %v7359_v48 = vand.u32 4294901760, %v813_v0  ;;  %v7377_v0 = vand.u32 4294901760, %v825_v29 }
  0x39   :  { %482 = vmatmul.f32.vlgmr.msra.gmra.mxu1 %v8584_v40  ;;  %654 = vmatpush.msrb.mxu2 %v7266_v63  ;;  %v7353_v40 = vand.u32 4294901760, %v7328_v52  ;;  %v7361_v63 = vand.u32 4294901760, %v626_v13 }
  0x3a   :  { %610 = vmatpush.msrb.mxu1 %v7318_v46  ;;  %581 = vmatpush.msrb.mxu0 %v7245_v55 }
  0x3b   :  { %681 = vmatpush.msrb.mxu3 %v7245_v55  ;;  %115 = vperm.xlu0 %6778, %v7331_v57   ;;  %8747 = vst [vmem:[#allocation45_spill] sm:$0xff] %v7353_v40  ;;  %v831_v25 = vsub.f32 %v7328_v52, %v7353_v40 }
  0x3c   :  { %616 = vmatpush.msrb.mxu1 %v7333_v59  ;;  %657 = vmatpush.msrb.mxu2 %v7280_v7  ;;  %v7369_v7 = vand.u32 4294901760, %v819_v34 }
  0x3d   :  { %583 = vmatpush.msrb.mxu0 %v7256_v60  ;;  %683 = vmatpush.msrb.mxu3 %v7256_v60  ;;  %v7383_v13 = vand.u32 4294901760, %v831_v25 }
  0x3e   :  { %589 = vmatmul.f32.vlgmr.msrb.gmra.mxu0 %v8748_v58  ;;  %622 = vmatpush.msrb.mxu1 %v7346_v56 }
  0x3f   :  { %660 = vmatmul.f32.vlgmr.msrb.gmra.mxu2 %v8748_v58  ;;  %687 = vmatmul.f32.vlgmr.msrb.gmra.mxu3 %v8748_v58 }
  0x40   :  { %782 = vmatpush.msra.mxu2 %v7258_v61  ;;  %706 = vmatpush.msra.mxu0 %v7263_v62 }
  0x41   :  { %815 = vmatpush.msra.mxu3 %v7359_v48  ;;  %628 = vmatpush.msrb.mxu1 %v7361_v63 }
  0x42   :  { %784 = vmatpush.msra.mxu2 %v7270_v1  ;;  %710 = vmatpush.msra.mxu0 %v7275_v2 }
  0x43   :  { %821 = vmatpush.msra.mxu3 %v7369_v7  ;;  %630 = vmatmul.f32.vlgmr.msrb.gmra.mxu1 %v8748_v58 }
  0x44   :  { %737 = vmatpush.msra.mxu1 %v7230_v51  ;;  %786 = vmatpush.msra.mxu2 %v7285_v12 }
  0x45   :  { %714 = vmatpush.msra.mxu0 %v7292_v30  ;;  %827 = vmatpush.msra.mxu3 %v7377_v0 }
  0x46   :  { %739 = vmatpush.msra.mxu1 %v7236_v53  ;;  %788 = vmatpush.msra.mxu2 %v7299_v32 }
  0x47   :  { %718 = vmatpush.msra.mxu0 %v7311_v38  ;;  %833 = vmatpush.msra.mxu3 %v7383_v13 }
  0x48   :  { %720 = vmatmul.f32.vlgmr.msra.gmra.mxu0 %v8748_v58  ;;  %741 = vmatpush.msra.mxu1 %v7245_v55 }
  0x49   :  { %794 = vmatmul.f32.vlgmr.msra.gmra.mxu2 %v8748_v58  ;;  %835 = vmatmul.f32.vlgmr.msra.gmra.mxu3 %v8748_v58 }
  0x4a   :  { %911 = vmatpush.msrb.mxu2 %v7308_v35  ;;  %853 = vmatpush.msrb.mxu0 %v7283_v8 }
  0x4b   :  { %743 = vmatpush.msra.mxu1 %v7256_v60  ;;  %942 = vmatpush.msrb.mxu3 %v7258_v61 }
  0x4c   :  { %915 = vmatpush.msrb.mxu2 %v7325_v50  ;;  %856 = vmatpush.msrb.mxu0 %v7297_v31 }
  0x4d   :  { %745 = vmatmul.f32.vlgmr.msra.gmra.mxu1 %v8748_v58  ;;  %944 = vmatpush.msrb.mxu3 %v7270_v1 }
  0x4e   :  { %882 = vmatpush.msrb.mxu1 %v7258_v61  ;;  %919 = vmatpush.msrb.mxu2 %v7342_v6 }
  0x4f   :  { %859 = vmatpush.msrb.mxu0 %v7314_v43  ;;  %946 = vmatpush.msrb.mxu3 %v7285_v12 }
  0x50   :  { %884 = vmatpush.msrb.mxu1 %v7270_v1  ;;  %923 = vmatpush.msrb.mxu2 %v7353_v40 }
  0x51   :  { %862 = vmatpush.msrb.mxu0 %v7328_v52  ;;  %925 = vmatmul.f32.vlgmr.msrb.gmra.mxu2 %v8748_v58 }
  0x52   :  { %865 = vmatmul.f32.vlgmr.msrb.gmra.mxu0 %v8748_v58  ;;  %886 = vmatpush.msrb.mxu1 %v7285_v12 }
  0x53   :  { %948 = vmatpush.msrb.mxu3 %v7299_v32  ;;  %1060 = vmatpush.msra.mxu2 %v7118_v14 }
  0x54   :  { %888 = vmatpush.msrb.mxu1 %v7299_v32  ;;  %950 = vmatmul.f32.vlgmr.msrb.gmra.mxu3 %v8748_v58 }
  0x55   :  { %892 = vmatmul.f32.vlgmr.msrb.gmra.mxu1 %v8748_v58  ;;  %1063 = vmatpush.msra.mxu2 %v7122_v15 }
  0x56   :  { %1022 = vmatpush.msra.mxu1 %v7183_v36  ;;  %1089 = vmatpush.msra.mxu3 %v7104_v3 }
  0x57   :  { %1066 = vmatpush.msra.mxu2 %v7125_v16  ;;  %989 = vmatpush.msra.mxu0 %v7104_v3 }
  0x58   :  { %1028 = vmatpush.msra.mxu1 %v7187_v37  ;;  %1091 = vmatpush.msra.mxu3 %v7106_v4 }
  0x59   :  { %1069 = vmatpush.msra.mxu2 %v7130_v18  ;;  %991 = vmatpush.msra.mxu0 %v7106_v4 }
  0x5a   :  { %1034 = vmatpush.msra.mxu1 %v7200_v42  ;;  %1093 = vmatpush.msra.mxu3 %v7108_v5 }
  0x5b   :  { %1194 = vmatpush.msrb.mxu2 %v7112_v10  ;;  %993 = vmatpush.msra.mxu0 %v7108_v5 }
  0x5c   :  { %1040 = vmatpush.msra.mxu1 %v7210_v45  ;;  %1095 = vmatpush.msra.mxu3 %v7110_v9  ;;  %v7470_v45 = vld [vmem:[#allocation4 + $0x1] ss:$0 sm:$0xff] }
  0x5d   :  { %1196 = vmatpush.msrb.mxu2 %v7114_v11  ;;  %995 = vmatpush.msra.mxu0 %v7110_v9  ;;  %8752 = vst [vmem:[#allocation49_spill] sm:$0xff] %v7470_v45 }
  0x5e   :  { %1149 = vmatpush.msrb.mxu1 %v7104_v3  ;;  %1227 = vmatpush.msrb.mxu3 %v7196_v41 }
  0x5f   :  { %1198 = vmatpush.msrb.mxu2 %v7127_v17  ;;  %1118 = vmatpush.msrb.mxu0 %v7143_v22 }
  0x60   :  { %1151 = vmatpush.msrb.mxu1 %v7106_v4  ;;  %1233 = vmatpush.msrb.mxu3 %v7206_v44 }
  0x61   :  { %1200 = vmatpush.msrb.mxu2 %v7138_v21  ;;  %1122 = vmatpush.msrb.mxu0 %v7146_v23  ;;  %v7454_v23 = vld [vmem:[%s8579_s1] ss:$0 sm:$0xff] }
  0x62   :  { %1153 = vmatpush.msrb.mxu1 %v7108_v5  ;;  %1239 = vmatpush.msrb.mxu3 %v7218_v47  ;;  %8749 = vst [vmem:[#allocation46_spill] sm:$0xff] %v7454_v23 }
  0x63   :  { %1126 = vmatpush.msrb.mxu0 %v7149_v24 }
  0x64   :  { %1155 = vmatpush.msrb.mxu1 %v7110_v9  ;;  %1245 = vmatpush.msrb.mxu3 %v7224_v49  ;;  %v7456_v49 = vld [vmem:[#allocation4] ss:$0 sm:$0xff] }
  0x65   :  { %1130 = vmatpush.msrb.mxu0 %v7159_v27  ;;  %8750 = vst [vmem:[#allocation47_spill] sm:$0xff] %v7456_v49 }
  0x9a   :  { %v180_v25 = vpop.f32.mrf.mxu0 }
  0xa2   :  { %v221_v29 = vpop.f32.mrf.mxu1  ;;  %v251_v58 = vpop.f32.mrf.mxu2 }
  0xa3   :  { %v222_v34 = vadd.f32 %v221_v29, %v180_v25  ;;  %v278_v22 = vpop.f32.mrf.mxu3 }
  0xa5   :  { %v252_v44 = vadd.f32 %v251_v58, %v222_v34 }
  0xa6   :  { %v311_v18 = vpop.f32.mrf.mxu0 }
  0xa7   :  { %v279_v41 = vadd.f32 %v278_v22, %v252_v44 }
  0xa9   :  { %v312_v5 = vadd.f32 %v311_v18, %v279_v41  ;;  %v7466_v18 = vld [vmem:[%s8579_s1 + $0x1] ss:$0 sm:$0xff] }
  0xaa   :  { %8751 = vst [vmem:[#allocation48_spill] sm:$0xff] %v7466_v18 }
  0xab   :  { %v336_v47 = vpop.f32.mrf.mxu1 }
  0xac   :  { %v385_v27 = vpop.f32.mrf.mxu2  ;;  %v337_v25 = vadd.f32 %v336_v47, %v312_v5 }
  0xad   :  { %v7458_v24 = vpop.permute.xlu0 %115  ;;  %v426_v29 = vpop.f32.mrf.mxu3 }
  0xae   :  { %v121_v9 = vmul.f32 %v7454_v23, %v7458_v24  ;;  %v427_v41 = vadd.f32 %v426_v29, %v385_v27  ;;  %v129_v34 = vmul.f32 %v7466_v18, %v7458_v24 }
  0xb0   :  { %v125_v22 = vadd.f32 %v7456_v49, %v121_v9  ;;  %v456_v44 = vpop.f32.mrf.mxu0  ;;  %v133_v49 = vadd.f32 %v7470_v45, %v129_v34 }
  0xb1   :  { %v457_v16 = vadd.f32 %v456_v44, %v427_v41 }
  0xb2   :  { %v339_v58 = vadd.f32 %v337_v25, %v125_v22 }
  0xb4   :  { %v6737_v4 = vmul.f32 -1.442695, %v339_v58 }
  0xb6   :  { %v483_v23 = vpop.f32.mrf.mxu1  ;;  %6797 = vpow2.f32 %v6737_v4 }
  0xb7   :  { %v484_v5 = vadd.f32 %v483_v23, %v457_v16  ;;  %v516_v47 = vpop.f32.mrf.mxu2  ;;  %v541_v15 = vpop.f32.mrf.mxu3  ;;  %v7476_v16 = vld [vmem:[%s8579_s1 + $0x3] ss:$0 sm:$0xff] }
  0xb8   :  { %8753 = vst [vmem:[#allocation50_spill] sm:$0xff] %v7476_v16 }
  0xb9   :  { %v517_v9 = vadd.f32 %v516_v47, %v484_v5 }
  0xbb   :  { %v542_v42 = vadd.f32 %v541_v15, %v517_v9  ;;  %v590_v3 = vpop.f32.mrf.mxu0 }
  0xbc   :  { %v6798_v25 = vpop.eup %6797 }
  0xbd   :  { %v544_v27 = vadd.f32 %v542_v42, %v133_v49  ;;  %v7478_v23 = vadd.f32 1.0, %v6798_v25  ;;  %v145_v42 = vmul.f32 %v7476_v16, %v7458_v24 }
  0xbf   :  { %v6738_v29 = vmul.f32 -1.442695, %v544_v27  ;;  %vm349_vm4 = vweird.f32 %v7478_v23 }
  0xc0   :  { %v631_v22 = vpop.f32.mrf.mxu1 }
  0xc1   :  { %6799 = vpow2.f32 %v6738_v29  ;;  %v632_v18 = vadd.f32 %v631_v22, %v590_v3  ;;  %v7483_v3 = vld [vmem:[#allocation4 + $0x3] ss:$0 sm:$0xff] }
  0xc2   :  { %v661_v41 = vpop.f32.mrf.mxu2  ;;  %v688_v44 = vpop.f32.mrf.mxu3  ;;  %6801 = vrcp.f32 %v7478_v23  ;;  %8754 = vst [vmem:[#allocation51_spill] sm:$0xff] %v7483_v3  ;;  %v149_v9 = vadd.f32 %v7483_v3, %v145_v42 }
  0xc3   :  { %v662_v58 = vadd.f32 %v661_v41, %v632_v18 }
  0xc5   :  { %v689_v34 = vadd.f32 %v688_v44, %v662_v58  ;;  %v721_v4 = vpop.f32.mrf.mxu0 }
  0xc7   :  { %v6800_v15 = vpop.eup %6799  ;;  %v722_v49 = vadd.f32 %v721_v4, %v689_v34  ;;  %v7490_v34 = vld [vmem:[%s8579_s1 + $0x2] ss:$0 sm:$0xff] }
  0xc8   :  { %v548_v5 = vadd.f32 1.0, %v6800_v15  ;;  %v6802_v18 = vpop.eup %6801 }
  0xc9   :  { %v345_v16 = vmul.f32 %v6802_v18, %v7478_v23  ;;  %vm350_vm2 = vweird.f32 %v6802_v18 }
  0xca   :  { %6803 = vrcp.f32 %v548_v5  ;;  %v746_v47 = vpop.f32.mrf.mxu1  ;;  %vm554_vm1 = vweird.f32 %v548_v5  ;;  %vm351_vm5 = vmor %vm349_vm4, %vm350_vm2 }
  0xcb   :  { %v747_v27 = vadd.f32 %v746_v47, %v722_v49  ;;  %v346_v3 = vsub.f32 1.0, %v345_v16 }
  0xcc   :  { %v795_v29 = vpop.f32.mrf.mxu2  ;;  %v836_v25 = vpop.f32.mrf.mxu3 }
  0xcd   :  { %v749_v22 = vadd.f32 %v747_v27, %v149_v9  ;;  %v837_v41 = vadd.f32 %v836_v25, %v795_v29  ;;  %v137_v9 = vmul.f32 %v7490_v34, %v7458_v24  ;;  %v7494_v29 = vld [vmem:[#allocation4 + $0x2] ss:$0 sm:$0xff]  ;;  %v347_v43 = vmul.f32 %v6802_v18, %v346_v3 }
  0xce   :  { %8755 = vst [vmem:[#allocation52_spill] sm:$0xff] %v7494_v29  ;;  %v558_v24 = vand.u32 2147483647, %v548_v5  ;;  %v353_v3 = vand.u32 2147483647, %v7478_v23 }
  0xcf   :  { %v6739_v44 = vmul.f32 -1.442695, %v749_v22  ;;  %v866_v58 = vpop.f32.mrf.mxu0 }
  0xd0   :  { %v6804_v45 = vpop.eup %6803  ;;  %v867_v15 = vadd.f32 %v866_v58, %v837_v41  ;;  %v560_v58 = vand.u32 2147483648, %v548_v5  ;;  %vm559_vm6 = vcmp.eq.f32.partialorder %v558_v24, 8.507059e+37  ;;  %vm354_vm7 = vcmp.eq.f32.partialorder %v353_v3, 8.507059e+37 }
  0xd1   :  { %v550_v4 = vmul.f32 %v6804_v45, %v548_v5  ;;  %6805 = vpow2.f32 %v6739_v44  ;;  %v141_v44 = vadd.f32 %v7494_v29, %v137_v9  ;;  %vm555_vm0 = vweird.f32 %v6804_v45 }
  0xd2   :  { %v893_v42 = vpop.f32.mrf.mxu1  ;;  %vm556_vm3 = vmor %vm554_vm1, %vm555_vm0 }
  0xd3   :  { %v551_v49 = vsub.f32 1.0, %v550_v4  ;;  %v894_v47 = vadd.f32 %v893_v42, %v867_v15  ;;  %v348_v4 = vadd.f32 %v6802_v18, %v347_v43  ;;  %v561_v15 = vor.u32 1.1754944e-38, %v560_v58 }
  0xd4   :  { %v926_v52 = vpop.f32.mrf.mxu2  ;;  %v7055_v58 = vmov 1  }
  0xd5   :  { %v927_v27 = vadd.f32 %v926_v52, %v894_v47  ;;  %v552_v25 = vmul.f32 %v6804_v45, %v551_v49  ;;  %v355_v52 = vand.u32 2147483648, %v7478_v23  ;;  %v352_v49 = vsel %vm351_vm5, %v6802_v18, %v348_v4  ;;  %6779 = vset.pattern.permute.xlu0 %v7055_v58  ;;  %v8770_v58 = vld [vmem:[#allocation31_spill] sm:$0xff] }
  0xd6   :  { %962 = vperm.xlu0 %6779, %v7331_v57  }
  0xd7   :  { %v6806_v22 = vpop.eup %6805  ;;  %v951_v14 = vpop.f32.mrf.mxu3  ;;  %v553_v41 = vadd.f32 %v6804_v45, %v552_v25 }
  0xd8   :  { %v753_v37 = vadd.f32 1.0, %v6806_v22  ;;  %v952_v36 = vadd.f32 %v951_v14, %v927_v27 }
  0xd9   :  { %v557_v14 = vsel %vm556_vm3, %v6804_v45, %v553_v41 }
  0xda   :  { %6807 = vrcp.f32 %v753_v37  ;;  %v954_v16 = vadd.f32 %v952_v36, %v141_v44  ;;  %v356_v36 = vor.u32 1.1754944e-38, %v355_v52  ;;  %v562_v9 = vsel %vm559_vm6, %v561_v15, %v557_v14 }
  0xdb   :  { %v956_v25 = vmul.f32 0.0, %v562_v9  ;;  %v765_v45 = vand.u32 2147483648, %v753_v37  ;;  %vm759_vm9 = vweird.f32 %v753_v37  ;;  %v763_v23 = vand.u32 2147483647, %v753_v37  ;;  %v8759_v9 = vld [vmem:[#allocation35_spill] sm:$0xff] }
  0xdc   :  { %6809 = vtanh.f32 %v954_v16  ;;  %v357_v27 = vsel %vm354_vm7, %v356_v36, %v352_v49  ;;  %v8756_v49 = vld [vmem:[#allocation23_spill] sm:$0xff]  ;;  %v8758_v36 = vld [vmem:[#allocation25_spill] sm:$0xff] }
  0xdd   :  { %v766_v41 = vor.u32 1.1754944e-38, %v765_v45  ;;  %vm764_vm11 = vcmp.eq.f32.partialorder %v763_v23, 8.507059e+37  ;;  %v8766_v45 = vld [vmem:[#allocation12_spill] sm:$0xff]  ;;  %v8767_v23 = vld [vmem:[#allocation29_spill] sm:$0xff] }
  0xe0   :  { %v6808_v42 = vpop.eup %6807 }
  0xe1   :  { %v755_v47 = vmul.f32 %v6808_v42, %v753_v37  ;;  %vm760_vm8 = vweird.f32 %v6808_v42 }
  0xe2   :  { %v6810_v43 = vpop.eup %6809  ;;  %vm761_vm10 = vmor %vm759_vm9, %vm760_vm8 }
  0xe3   :  { %v756_v5 = vsub.f32 1.0, %v755_v47  ;;  %v957_v22 = vmul.f32 %v6810_v43, %v357_v27  ;;  %v8757_v47 = vld [vmem:[#allocation34_spill] sm:$0xff]  ;;  %v8760_v43 = vld [vmem:[#allocation36_spill] sm:$0xff]  ;;  %v8762_v27 = vld [vmem:[#allocation41_spill] sm:$0xff] }
  0xe5   :  { %v757_v44 = vmul.f32 %v6808_v42, %v756_v5  ;;  %v7500_v16 = vadd.f32 %v957_v22, %v956_v25  ;;  %v8761_v5 = vld [vmem:[#allocation26_spill] sm:$0xff]  ;;  %v8763_v25 = vld [vmem:[#allocation27_spill] sm:$0xff]  ;;  %v8764_v22 = vld [vmem:[#allocation16_spill] sm:$0xff] }
  0xe7   :  { %v758_v29 = vadd.f32 %v6808_v42, %v757_v44  ;;  %6811 = vtanh.f32 %v7500_v16  ;;  %v8765_v44 = vld [vmem:[#allocation43_spill] sm:$0xff] }
  0xe9   :  { %v762_v18 = vsel %vm761_vm10, %v6808_v42, %v758_v29 }
  0xea   :  { %v767_v24 = vsel %vm764_vm11, %v766_v41, %v762_v18  ;;  %v8768_v18 = vld [vmem:[#allocation17_spill] sm:$0xff] }
  0xeb   :  { %v8769_v41 = vld [vmem:[#allocation13_spill] sm:$0xff] }
  0xed   :  { %v6812_v4 = vpop.eup %6811 }
  0xee   :  { %v960_v52 = vmul.f32 %v6812_v4, %v767_v24  ;;  %v8771_v4 = vld [vmem:[#allocation18_spill] sm:$0xff] }
  0xef   :  { %v8772_v24 = vld [vmem:[#allocation14_spill] sm:$0xff] }
  0xf0   :  { %v974_v3 = vsel %vm150_vm12, %v960_v52, 0  ;;  %v8773_v52 = vld [vmem:[#allocation19_spill] sm:$0xff] }
  0xf1   :  { %v7505_v14 = vand.u32 4294901760, %v974_v3 }
  0xf3   :  { %1042 = vmatmul.f32.vlgmr.msra.gmra.mxu1 %v7505_v14  ;;  %v7509_v37 = vsub.f32 %v974_v3, %v7505_v14  ;;  %v8774_v3 = vld [vmem:[#allocation15_spill] sm:$0xff] }
  0xf4   :  { %1294 = vmatpush.msra.mxu1 %v7112_v10 }
  0xf5   :  { %1072 = vmatmul.f32.vlgmr.msra.gmra.mxu2 %v7509_v37  ;;  %v7514_v29 = vand.u32 4294901760, %v7509_v37 }
  0xf6   :  { %1296 = vmatpush.msra.mxu1 %v7114_v11  ;;  %1323 = vmatpush.msra.mxu2 %v7156_v26 }
  0xf7   :  { %1099 = vmatmul.f32.vlgmr.msra.gmra.mxu3 %v7514_v29  ;;  %v999_v15 = vsub.f32 %v7509_v37, %v7514_v29 }
  0xf8   :  { %1298 = vmatpush.msra.mxu1 %v7127_v17  ;;  %1327 = vmatpush.msra.mxu2 %v7162_v28 }
  0xf9   :  { %v1000_v42 = vand.u32 4294901760, %v999_v15  ;;  %1354 = vmatpush.msra.mxu3 %v7112_v10  ;;  %v8778_v15 = vld [vmem:[#allocation32_spill] sm:$0xff] }
  0xfa   :  { %1300 = vmatpush.msra.mxu1 %v7138_v21  ;;  %1331 = vmatpush.msra.mxu2 %v7176_v33 }
  0xfb   :  { %1001 = vmatmul.f32.vlgmr.msra.gmra.mxu0 %v1000_v42  ;;  %1157 = vmatmul.f32.vlgmr.msrb.gmra.mxu1 %v7505_v14 }
  0xfc   :  { %1356 = vmatpush.msra.mxu3 %v7114_v11  ;;  %1265 = vmatpush.msra.mxu0 %v7133_v19 }
  0xfd   :  { %1206 = vmatmul.f32.vlgmr.msrb.gmra.mxu2 %v1000_v42  ;;  %1432 = vmatpush.msrb.mxu1 %v7318_v46 }
  0xfe   :  { %1335 = vmatpush.msra.mxu2 %v7192_v39  ;;  %1358 = vmatpush.msra.mxu3 %v7127_v17 }
  0xff   :  { %1247 = vmatmul.f32.vlgmr.msrb.gmra.mxu3 %v7505_v14  ;;  %1268 = vmatpush.msra.mxu0 %v7136_v20 }
 0x100   :  { %1360 = vmatpush.msra.mxu3 %v7138_v21  ;;  %1438 = vmatpush.msrb.mxu1 %v7333_v59 }
 0x101   :  { %1470 = vmatpush.msrb.mxu2 %v7243_v54  ;;  %1271 = vmatpush.msra.mxu0 %v8756_v49 }
 0x102   :  { %1444 = vmatpush.msrb.mxu1 %v7346_v56  ;;  %1499 = vmatpush.msrb.mxu3 %v7230_v51 }
 0x103   :  { %1132 = vmatmul.f32.vlgmr.msrb.gmra.mxu0 %v7505_v14  ;;  %1304 = vmatmul.f32.vlgmr.msra.gmra.mxu1 %v7514_v29 }
 0x104   :  { %1473 = vmatpush.msrb.mxu2 %v8757_v47  ;;  %1274 = vmatpush.msra.mxu0 %v8758_v36 }
 0x105   :  { %1337 = vmatmul.f32.vlgmr.msra.gmra.mxu2 %v7505_v14  ;;  %1450 = vmatpush.msrb.mxu1 %v7361_v63 }
 0x106   :  { %1476 = vmatpush.msrb.mxu2 %v8759_v9  ;;  %1501 = vmatpush.msrb.mxu3 %v7236_v53 }
 0x107   :  { %1362 = vmatmul.f32.vlgmr.msra.gmra.mxu3 %v7505_v14  ;;  %1399 = vmatpush.msrb.mxu0 %v7230_v51 }
 0x108   :  { %1479 = vmatpush.msrb.mxu2 %v8760_v43  ;;  %1503 = vmatpush.msrb.mxu3 %v7245_v55 }
 0x109   :  { %1559 = vmatpush.msra.mxu1 %v7230_v51  ;;  %1401 = vmatpush.msrb.mxu0 %v7236_v53 }
 0x10a   :  { %1505 = vmatpush.msrb.mxu3 %v7256_v60  ;;  %1604 = vmatpush.msra.mxu2 %v7258_v61 }
 0x10b   :  { %1277 = vmatmul.f32.vlgmr.msra.gmra.mxu0 %v7509_v37  ;;  %1452 = vmatmul.f32.vlgmr.msrb.gmra.mxu1 %v7505_v14 }
 0x10c   :  { %1561 = vmatpush.msra.mxu1 %v7236_v53  ;;  %1403 = vmatpush.msrb.mxu0 %v7245_v55 }
 0x10d   :  { %1482 = vmatmul.f32.vlgmr.msrb.gmra.mxu2 %v7509_v37  ;;  %1637 = vmatpush.msra.mxu3 %v7359_v48 }
 0x10e   :  { %1563 = vmatpush.msra.mxu1 %v7245_v55  ;;  %1606 = vmatpush.msra.mxu2 %v7270_v1 }
 0x10f   :  { %1509 = vmatmul.f32.vlgmr.msrb.gmra.mxu3 %v7514_v29  ;;  %1405 = vmatpush.msrb.mxu0 %v7256_v60 }
 0x110   :  { %1565 = vmatpush.msra.mxu1 %v7256_v60  ;;  %1608 = vmatpush.msra.mxu2 %v7285_v12 }
 0x111   :  { %1643 = vmatpush.msra.mxu3 %v7369_v7  ;;  %1528 = vmatpush.msra.mxu0 %v7263_v62 }
 0x112   :  { %1610 = vmatpush.msra.mxu2 %v7299_v32  ;;  %1704 = vmatpush.msrb.mxu1 %v7258_v61 }
 0x113   :  { %1411 = vmatmul.f32.vlgmr.msrb.gmra.mxu0 %v1000_v42  ;;  %1567 = vmatmul.f32.vlgmr.msra.gmra.mxu1 %v7505_v14 }
 0x114   :  { %1649 = vmatpush.msra.mxu3 %v7377_v0  ;;  %1532 = vmatpush.msra.mxu0 %v7275_v2 }
 0x115   :  { %1616 = vmatmul.f32.vlgmr.msra.gmra.mxu2 %v1000_v42  ;;  %1706 = vmatpush.msrb.mxu1 %v7270_v1  ;;  %v8779_v42 = vld [vmem:[#allocation21_spill] sm:$0xff] }
 0x116   :  { %1655 = vmatpush.msra.mxu3 %v7383_v13  ;;  %1733 = vmatpush.msrb.mxu2 %v7308_v35 }
 0x117   :  { %1536 = vmatpush.msra.mxu0 %v7292_v30  ;;  %1657 = vmatmul.f32.vlgmr.msra.gmra.mxu3 %v7505_v14 }
 0x118   :  { %1708 = vmatpush.msrb.mxu1 %v7285_v12  ;;  %1737 = vmatpush.msrb.mxu2 %v7325_v50 }
 0x119   :  { %1764 = vmatpush.msrb.mxu3 %v7258_v61  ;;  %1540 = vmatpush.msra.mxu0 %v7311_v38 }
 0x11a   :  { %1710 = vmatpush.msrb.mxu1 %v7299_v32  ;;  %1741 = vmatpush.msrb.mxu2 %v7342_v6 }
 0x11b   :  { %1766 = vmatpush.msrb.mxu3 %v7270_v1  ;;  %1542 = vmatmul.f32.vlgmr.msra.gmra.mxu0 %v7505_v14 }
 0x11c   :  { %1675 = vmatpush.msrb.mxu0 %v7283_v8  ;;  %1714 = vmatmul.f32.vlgmr.msrb.gmra.mxu1 %v7514_v29  ;;  %v8777_v29 = vld [vmem:[#allocation20_spill] sm:$0xff] }
 0x11d   :  { %1745 = vmatpush.msrb.mxu2 %v7353_v40  ;;  %1768 = vmatpush.msrb.mxu3 %v7285_v12 }
 0x11e   :  { %1678 = vmatpush.msrb.mxu0 %v7297_v31  ;;  %1747 = vmatmul.f32.vlgmr.msrb.gmra.mxu2 %v7505_v14 }
 0x11f   :  { %1770 = vmatpush.msrb.mxu3 %v7299_v32  ;;  %1844 = vmatpush.msra.mxu1 %v8761_v5 }
 0x120   :  { %1681 = vmatpush.msrb.mxu0 %v8762_v27  ;;  %1772 = vmatmul.f32.vlgmr.msrb.gmra.mxu3 %v7505_v14  ;;  %v8775_v14 = vld [vmem:[#allocation28_spill] sm:$0xff]  ;;  %v8784_v27 = vld [vmem:[#allocation47_spill] sm:$0xff] }
 0x121   :  { %1850 = vmatpush.msra.mxu1 %v8763_v25  ;;  %1882 = vmatpush.msra.mxu2 %v8764_v22 }
 0x122   :  { %1684 = vmatpush.msrb.mxu0 %v8765_v44  ;;  %1911 = vmatpush.msra.mxu3 %v8766_v45 }
 0x123   :  { %1687 = vmatmul.f32.vlgmr.msrb.gmra.mxu0 %v7509_v37  ;;  %1856 = vmatpush.msra.mxu1 %v8767_v23  ;;  %v8776_v37 = vld [vmem:[#allocation30_spill] sm:$0xff] }
 0x124   :  { %1885 = vmatpush.msra.mxu2 %v8768_v18  ;;  %1913 = vmatpush.msra.mxu3 %v8769_v41 }
 0x125   :  { %1862 = vmatpush.msra.mxu1 %v8770_v58  ;;  %1811 = vmatpush.msra.mxu0 %v8766_v45 }
 0x126   :  { %1888 = vmatpush.msra.mxu2 %v8771_v4  ;;  %1915 = vmatpush.msra.mxu3 %v8772_v24 }
 0x127   :  { %1971 = vmatpush.msrb.mxu1 %v8766_v45  ;;  %1813 = vmatpush.msra.mxu0 %v8769_v41  ;;  %v8783_v45 = vld [vmem:[#allocation46_spill] sm:$0xff] }
 0x128   :  { %1891 = vmatpush.msra.mxu2 %v8773_v52  ;;  %1917 = vmatpush.msra.mxu3 %v8774_v3  ;;  %v8781_v52 = vld [vmem:[#allocation22_spill] sm:$0xff] }
 0x129   :  { %1973 = vmatpush.msrb.mxu1 %v8769_v41  ;;  %1815 = vmatpush.msra.mxu0 %v8772_v24 }
 0x12a   :  { %2016 = vmatpush.msrb.mxu2 %v7112_v10  ;;  %2049 = vmatpush.msrb.mxu3 %v8775_v14  ;;  %v8780_v14 = vld [vmem:[#allocation33_spill] sm:$0xff] }
 0x12b   :  { %1975 = vmatpush.msrb.mxu1 %v8772_v24  ;;  %1817 = vmatpush.msra.mxu0 %v8774_v3  ;;  %v8782_v24 = vld [vmem:[#allocation24_spill] sm:$0xff] }
 0x12c   :  { %2018 = vmatpush.msrb.mxu2 %v7114_v11  ;;  %2055 = vmatpush.msrb.mxu3 %v8776_v37 }
 0x12d   :  { %1977 = vmatpush.msrb.mxu1 %v8774_v3  ;;  %1940 = vmatpush.msrb.mxu0 %v8777_v29 }
 0x12e   :  { %2020 = vmatpush.msrb.mxu2 %v7127_v17  ;;  %2061 = vmatpush.msrb.mxu3 %v8778_v15 }
 0x12f   :  { %1944 = vmatpush.msrb.mxu0 %v8779_v42 }
 0x130   :  { %2022 = vmatpush.msrb.mxu2 %v7138_v21  ;;  %2067 = vmatpush.msrb.mxu3 %v8780_v14 }
 0x131   :  { %1948 = vmatpush.msrb.mxu0 %v8781_v52 }
 0x133   :  { %1952 = vmatpush.msrb.mxu0 %v8782_v24 }
 0x148   :  { %v963_v41 = vpop.permute.xlu0 %962 }
 0x149   :  { %v965_v15 = vmul.f32 %v8783_v45, %v963_v41 }
 0x14b   :  { %v966_v14 = vadd.f32 %v8784_v27, %v965_v15 }
 0x170   :  { %v1043_v4 = vpop.f32.mrf.mxu1 }
 0x178   :  { %v1002_v37 = vpop.f32.mrf.mxu0  ;;  %v1073_v58 = vpop.f32.mrf.mxu2 }
 0x179   :  { %v1044_v3 = vadd.f32 %v1043_v4, %v1002_v37  ;;  %v1158_v18 = vpop.f32.mrf.mxu1  ;;  %v8785_v37 = vld [vmem:[#allocation48_spill] sm:$0xff] }
 0x17a   :  { %v1100_v23 = vpop.f32.mrf.mxu3  ;;  %v967_v38 = vmul.f32 %v8785_v37, %v963_v41 }
 0x17b   :  { %v1074_v29 = vadd.f32 %v1073_v58, %v1044_v3 }
 0x17d   :  { %v1101_v44 = vadd.f32 %v1100_v23, %v1074_v29  ;;  %v8786_v29 = vld [vmem:[#allocation49_spill] sm:$0xff] }
 0x17e   :  { %v968_v50 = vadd.f32 %v8786_v29, %v967_v38 }
 0x180   :  { %v1133_v22 = vpop.f32.mrf.mxu0  ;;  %v1207_v25 = vpop.f32.mrf.mxu2 }
 0x181   :  { %v1134_v42 = vadd.f32 %v1133_v22, %v1101_v44  ;;  %v1305_v31 = vpop.f32.mrf.mxu1 }
 0x182   :  { %v1248_v5 = vpop.f32.mrf.mxu3 }
 0x183   :  { %v1159_v52 = vadd.f32 %v1158_v18, %v1134_v42  ;;  %v1249_v8 = vadd.f32 %v1248_v5, %v1207_v25 }
 0x185   :  { %v1161_v24 = vadd.f32 %v1159_v52, %v966_v14 }
 0x187   :  { %v6740_v40 = vmul.f32 -1.442695, %v1161_v24 }
 0x188   :  { %v1278_v6 = vpop.f32.mrf.mxu0  ;;  %v1338_v4 = vpop.f32.mrf.mxu2 }
 0x189   :  { %6813 = vpow2.f32 %v6740_v40  ;;  %v1279_v58 = vadd.f32 %v1278_v6, %v1249_v8  ;;  %v1453_v22 = vpop.f32.mrf.mxu1  ;;  %v8787_v40 = vld [vmem:[#allocation50_spill] sm:$0xff] }
 0x18a   :  { %v1363_v3 = vpop.f32.mrf.mxu3  ;;  %v971_v8 = vmul.f32 %v8787_v40, %v963_v41 }
 0x18b   :  { %v1306_v45 = vadd.f32 %v1305_v31, %v1279_v58 }
 0x18d   :  { %v1339_v23 = vadd.f32 %v1338_v4, %v1306_v45 }
 0x18f   :  { %v6814_v44 = vpop.eup %6813  ;;  %v1364_v27 = vadd.f32 %v1363_v3, %v1339_v23  ;;  %v8788_v3 = vld [vmem:[#allocation51_spill] sm:$0xff] }
 0x190   :  { %v7635_v15 = vadd.f32 1.0, %v6814_v44  ;;  %v1412_v18 = vpop.f32.mrf.mxu0  ;;  %v1483_v52 = vpop.f32.mrf.mxu2  ;;  %v972_v23 = vadd.f32 %v8788_v3, %v971_v8  ;;  %v8789_v3 = vld [vmem:[#allocation52_spill] sm:$0xff] }
 0x191   :  { %v1366_v24 = vadd.f32 %v1364_v27, %v968_v50  ;;  %v1454_v5 = vadd.f32 %v1453_v22, %v1412_v18  ;;  %v1568_v6 = vpop.f32.mrf.mxu1 }
 0x192   :  { %v1510_v25 = vpop.f32.mrf.mxu3  ;;  %6815 = vrcp.f32 %v7635_v15  ;;  %vm1171_vm1 = vweird.f32 %v7635_v15 }
 0x193   :  { %v6741_v14 = vmul.f32 -1.442695, %v1366_v24  ;;  %v1484_v42 = vadd.f32 %v1483_v52, %v1454_v5 }
 0x195   :  { %6817 = vpow2.f32 %v6741_v14  ;;  %v1511_v31 = vadd.f32 %v1510_v25, %v1484_v42  ;;  %v969_v42 = vmul.f32 %v7490_v34, %v963_v41 }
 0x197   :  { %v970_v30 = vadd.f32 %v8789_v3, %v969_v42 }
 0x198   :  { %v1543_v38 = vpop.f32.mrf.mxu0  ;;  %v6816_v4 = vpop.eup %6815 }
 0x199   :  { %v1544_v45 = vadd.f32 %v1543_v38, %v1511_v31  ;;  %v1617_v37 = vpop.f32.mrf.mxu2  ;;  %v1167_v27 = vmul.f32 %v6816_v4, %v7635_v15  ;;  %v1715_v25 = vpop.f32.mrf.mxu1  ;;  %vm1172_vm14 = vweird.f32 %v6816_v4 }
 0x19a   :  { %v1658_v22 = vpop.f32.mrf.mxu3  ;;  %vm1173_vm2 = vmor %vm1171_vm1, %vm1172_vm14 }
 0x19b   :  { %v6818_v58 = vpop.eup %6817  ;;  %v1569_v29 = vadd.f32 %v1568_v6, %v1544_v45  ;;  %v1659_v52 = vadd.f32 %v1658_v22, %v1617_v37  ;;  %v1168_v14 = vsub.f32 1.0, %v1167_v27 }
 0x19c   :  { %v1370_v50 = vadd.f32 1.0, %v6818_v58 }
 0x19d   :  { %v1571_v44 = vadd.f32 %v1569_v29, %v972_v23  ;;  %v1169_v45 = vmul.f32 %v6816_v4, %v1168_v14 }
 0x19e   :  { %6819 = vrcp.f32 %v1370_v50  ;;  %v1380_v41 = vand.u32 2147483647, %v1370_v50  ;;  %vm1376_vm15 = vweird.f32 %v1370_v50 }
 0x19f   :  { %v6742_v18 = vmul.f32 -1.442695, %v1571_v44  ;;  %v1170_v27 = vadd.f32 %v6816_v4, %v1169_v45 }
 0x1a0   :  { %v1688_v24 = vpop.f32.mrf.mxu0  ;;  %vm1381_vm3 = vcmp.eq.f32.partialorder %v1380_v41, 8.507059e+37 }
 0x1a1   :  { %6821 = vpow2.f32 %v6742_v18  ;;  %v1689_v5 = vadd.f32 %v1688_v24, %v1659_v52  ;;  %v1748_v40 = vpop.f32.mrf.mxu2  ;;  %v1382_v18 = vand.u32 2147483648, %v1370_v50  ;;  %v1177_v24 = vand.u32 2147483648, %v7635_v15 }
 0x1a2   :  { %v1174_v42 = vsel %vm1173_vm2, %v6816_v4, %v1170_v27  ;;  %v7056_v27 = vmov 2  }
 0x1a3   :  { %v1716_v31 = vadd.f32 %v1715_v25, %v1689_v5  ;;  %v1773_v58 = vpop.f32.mrf.mxu3  ;;  %v1175_v5 = vand.u32 2147483647, %v7635_v15  ;;  %v1383_v25 = vor.u32 1.1754944e-38, %v1382_v18  ;;  %6780 = vset.pattern.permute.xlu1 %v7056_v27  ;;  %v8806_v27 = vld [vmem:[#allocation31_spill] sm:$0xff] }
 0x1a4   :  { %v6820_v38 = vpop.eup %6819  ;;  %1784 = vperm.xlu1 %6780, %v7331_v57  }
 0x1a5   :  { %v1372_v8 = vmul.f32 %v6820_v38, %v1370_v50  ;;  %v1749_v6 = vadd.f32 %v1748_v40, %v1716_v31  ;;  %vm1377_vm13 = vweird.f32 %v6820_v38  ;;  %vm1176_vm4 = vcmp.eq.f32.partialorder %v1175_v5, 8.507059e+37 }
 0x1a6   :  { %vm1378_vm0 = vmor %vm1376_vm15, %vm1377_vm13 }
 0x1a7   :  { %v6822_v23 = vpop.eup %6821  ;;  %v1373_v29 = vsub.f32 1.0, %v1372_v8  ;;  %v1774_v44 = vadd.f32 %v1773_v58, %v1749_v6 }
 0x1a8   :  { %v1575_v37 = vadd.f32 1.0, %v6822_v23 }
 0x1a9   :  { %v1374_v22 = vmul.f32 %v6820_v38, %v1373_v29  ;;  %v1776_v52 = vadd.f32 %v1774_v44, %v970_v30  ;;  %v1178_v30 = vor.u32 1.1754944e-38, %v1177_v24 }
 0x1aa   :  { %6823 = vrcp.f32 %v1575_v37  ;;  %v1587_v15 = vand.u32 2147483648, %v1575_v37  ;;  %vm1581_vm6 = vweird.f32 %v1575_v37 }
 0x1ab   :  { %v1375_v40 = vadd.f32 %v6820_v38, %v1374_v22  ;;  %6825 = vtanh.f32 %v1776_v52  ;;  %v1179_v45 = vsel %vm1176_vm4, %v1178_v30, %v1174_v42  ;;  %v8790_v42 = vld [vmem:[#allocation38_spill] sm:$0xff] }
 0x1ac   :  { %v1588_v52 = vor.u32 1.1754944e-38, %v1587_v15  ;;  %v8791_v30 = vld [vmem:[#allocation42_spill] sm:$0xff]  ;;  %v8801_v15 = vld [vmem:[#allocation43_spill] sm:$0xff] }
 0x1ad   :  { %v1379_v14 = vsel %vm1378_vm0, %v6820_v38, %v1375_v40  ;;  %v1585_v38 = vand.u32 2147483647, %v1575_v37 }
 0x1ae   :  { %v1384_v31 = vsel %vm1381_vm3, %v1383_v25, %v1379_v14 }
 0x1af   :  { %v1778_v58 = vmul.f32 %v1384_v31, %v7500_v16  ;;  %vm1586_vm8 = vcmp.eq.f32.partialorder %v1585_v38, 8.507059e+37  ;;  %v8792_v31 = vld [vmem:[#allocation40_spill] sm:$0xff]  ;;  %v8803_v38 = vld [vmem:[#allocation29_spill] sm:$0xff] }
 0x1b0   :  { %v6824_v8 = vpop.eup %6823 }
 0x1b1   :  { %v6826_v6 = vpop.eup %6825  ;;  %v1577_v50 = vmul.f32 %v6824_v8, %v1575_v37  ;;  %vm1582_vm5 = vweird.f32 %v6824_v8 }
 0x1b2   :  { %v1779_v23 = vmul.f32 %v6826_v6, %v1179_v45  ;;  %vm1583_vm7 = vmor %vm1581_vm6, %vm1582_vm5  ;;  %v8794_v6 = vld [vmem:[#allocation37_spill] sm:$0xff]  ;;  %v8796_v45 = vld [vmem:[#allocation39_spill] sm:$0xff] }
 0x1b3   :  { %v1578_v29 = vsub.f32 1.0, %v1577_v50  ;;  %v8795_v50 = vld [vmem:[#allocation45_spill] sm:$0xff] }
 0x1b4   :  { %v7647_v44 = vadd.f32 %v1779_v23, %v1778_v58  ;;  %v8797_v58 = vld [vmem:[#allocation26_spill] sm:$0xff]  ;;  %v8798_v23 = vld [vmem:[#allocation41_spill] sm:$0xff] }
 0x1b5   :  { %v1579_v22 = vmul.f32 %v6824_v8, %v1578_v29  ;;  %v8799_v29 = vld [vmem:[#allocation27_spill] sm:$0xff] }
 0x1b6   :  { %6827 = vtanh.f32 %v7647_v44 }
 0x1b7   :  { %v1580_v4 = vadd.f32 %v6824_v8, %v1579_v22  ;;  %v8800_v22 = vld [vmem:[#allocation16_spill] sm:$0xff] }
 0x1b9   :  { %v1584_v18 = vsel %vm1583_vm7, %v6824_v8, %v1580_v4  ;;  %v8793_v8 = vld [vmem:[#allocation44_spill] sm:$0xff] }
 0x1ba   :  { %v1589_v16 = vsel %vm1586_vm8, %v1588_v52, %v1584_v18  ;;  %v8802_v4 = vld [vmem:[#allocation12_spill] sm:$0xff]  ;;  %v8804_v18 = vld [vmem:[#allocation17_spill] sm:$0xff] }
 0x1bb   :  { %v8805_v52 = vld [vmem:[#allocation13_spill] sm:$0xff] }
 0x1bc   :  { %v6828_v41 = vpop.eup %6827 }
 0x1bd   :  { %v1782_v24 = vmul.f32 %v6828_v41, %v1589_v16  ;;  %v8807_v41 = vld [vmem:[#allocation18_spill] sm:$0xff] }
 0x1be   :  { %v8808_v16 = vld [vmem:[#allocation14_spill] sm:$0xff] }
 0x1bf   :  { %v1796_v40 = vsel %vm150_vm12, %v1782_v24, 0  ;;  %v8809_v24 = vld [vmem:[#allocation19_spill] sm:$0xff] }
 0x1c0   :  { %v7652_v5 = vand.u32 4294901760, %v1796_v40 }
 0x1c2   :  { %1864 = vmatmul.f32.vlgmr.msra.gmra.mxu1 %v7652_v5  ;;  %v7656_v25 = vsub.f32 %v1796_v40, %v7652_v5  ;;  %v8810_v40 = vld [vmem:[#allocation15_spill] sm:$0xff] }
 0x1c3   :  { %2116 = vmatpush.msra.mxu1 %v7112_v10 }
 0x1c4   :  { %1894 = vmatmul.f32.vlgmr.msra.gmra.mxu2 %v7656_v25  ;;  %v7661_v37 = vand.u32 4294901760, %v7656_v25 }
 0x1c5   :  { %2118 = vmatpush.msra.mxu1 %v7114_v11  ;;  %2145 = vmatpush.msra.mxu2 %v7156_v26 }
 0x1c6   :  { %1921 = vmatmul.f32.vlgmr.msra.gmra.mxu3 %v7661_v37  ;;  %v1821_v57 = vsub.f32 %v7656_v25, %v7661_v37 }
 0x1c7   :  { %2120 = vmatpush.msra.mxu1 %v7127_v17  ;;  %2149 = vmatpush.msra.mxu2 %v7162_v28 }
 0x1c8   :  { %v1822_v14 = vand.u32 4294901760, %v1821_v57  ;;  %2176 = vmatpush.msra.mxu3 %v7112_v10  ;;  %v8814_v57 = vld [vmem:[#allocation32_spill] sm:$0xff] }
 0x1c9   :  { %2122 = vmatpush.msra.mxu1 %v7138_v21  ;;  %2153 = vmatpush.msra.mxu2 %v7176_v33 }
 0x1ca   :  { %1823 = vmatmul.f32.vlgmr.msra.gmra.mxu0 %v1822_v14  ;;  %1979 = vmatmul.f32.vlgmr.msrb.gmra.mxu1 %v7652_v5 }
 0x1cb   :  { %2178 = vmatpush.msra.mxu3 %v7114_v11  ;;  %2087 = vmatpush.msra.mxu0 %v7133_v19 }
 0x1cc   :  { %2028 = vmatmul.f32.vlgmr.msrb.gmra.mxu2 %v1822_v14  ;;  %2254 = vmatpush.msrb.mxu1 %v7318_v46 }
 0x1cd   :  { %2157 = vmatpush.msra.mxu2 %v7192_v39  ;;  %2180 = vmatpush.msra.mxu3 %v7127_v17 }
 0x1ce   :  { %2069 = vmatmul.f32.vlgmr.msrb.gmra.mxu3 %v7652_v5  ;;  %2090 = vmatpush.msra.mxu0 %v7136_v20 }
 0x1cf   :  { %2182 = vmatpush.msra.mxu3 %v7138_v21  ;;  %2260 = vmatpush.msrb.mxu1 %v7333_v59 }
 0x1d0   :  { %2292 = vmatpush.msrb.mxu2 %v7243_v54  ;;  %2093 = vmatpush.msra.mxu0 %v8756_v49 }
 0x1d1   :  { %2266 = vmatpush.msrb.mxu1 %v7346_v56  ;;  %2321 = vmatpush.msrb.mxu3 %v7230_v51 }
 0x1d2   :  { %1954 = vmatmul.f32.vlgmr.msrb.gmra.mxu0 %v7652_v5  ;;  %2126 = vmatmul.f32.vlgmr.msra.gmra.mxu1 %v7661_v37 }
 0x1d3   :  { %2295 = vmatpush.msrb.mxu2 %v8757_v47  ;;  %2096 = vmatpush.msra.mxu0 %v8758_v36 }
 0x1d4   :  { %2159 = vmatmul.f32.vlgmr.msra.gmra.mxu2 %v7652_v5  ;;  %2272 = vmatpush.msrb.mxu1 %v7361_v63 }
 0x1d5   :  { %2298 = vmatpush.msrb.mxu2 %v8759_v9  ;;  %2323 = vmatpush.msrb.mxu3 %v7236_v53 }
 0x1d6   :  { %2184 = vmatmul.f32.vlgmr.msra.gmra.mxu3 %v7652_v5  ;;  %2221 = vmatpush.msrb.mxu0 %v7230_v51 }
 0x1d7   :  { %2301 = vmatpush.msrb.mxu2 %v8760_v43  ;;  %2325 = vmatpush.msrb.mxu3 %v7245_v55 }
 0x1d8   :  { %2381 = vmatpush.msra.mxu1 %v7230_v51  ;;  %2223 = vmatpush.msrb.mxu0 %v7236_v53 }
 0x1d9   :  { %2327 = vmatpush.msrb.mxu3 %v7256_v60  ;;  %2426 = vmatpush.msra.mxu2 %v7258_v61 }
 0x1da   :  { %2099 = vmatmul.f32.vlgmr.msra.gmra.mxu0 %v7656_v25  ;;  %2274 = vmatmul.f32.vlgmr.msrb.gmra.mxu1 %v7652_v5 }
 0x1db   :  { %2383 = vmatpush.msra.mxu1 %v7236_v53  ;;  %2225 = vmatpush.msrb.mxu0 %v7245_v55 }
 0x1dc   :  { %2304 = vmatmul.f32.vlgmr.msrb.gmra.mxu2 %v7656_v25  ;;  %2459 = vmatpush.msra.mxu3 %v7359_v48 }
 0x1dd   :  { %2385 = vmatpush.msra.mxu1 %v7245_v55  ;;  %2428 = vmatpush.msra.mxu2 %v7270_v1 }
 0x1de   :  { %2331 = vmatmul.f32.vlgmr.msrb.gmra.mxu3 %v7661_v37  ;;  %2227 = vmatpush.msrb.mxu0 %v7256_v60 }
 0x1df   :  { %2387 = vmatpush.msra.mxu1 %v7256_v60  ;;  %2430 = vmatpush.msra.mxu2 %v7285_v12 }
 0x1e0   :  { %2465 = vmatpush.msra.mxu3 %v7369_v7  ;;  %2350 = vmatpush.msra.mxu0 %v7263_v62 }
 0x1e1   :  { %2432 = vmatpush.msra.mxu2 %v7299_v32  ;;  %2526 = vmatpush.msrb.mxu1 %v7258_v61 }
 0x1e2   :  { %2233 = vmatmul.f32.vlgmr.msrb.gmra.mxu0 %v1822_v14  ;;  %2389 = vmatmul.f32.vlgmr.msra.gmra.mxu1 %v7652_v5 }
 0x1e3   :  { %2471 = vmatpush.msra.mxu3 %v7377_v0  ;;  %2354 = vmatpush.msra.mxu0 %v7275_v2 }
 0x1e4   :  { %2438 = vmatmul.f32.vlgmr.msra.gmra.mxu2 %v1822_v14  ;;  %2528 = vmatpush.msrb.mxu1 %v7270_v1  ;;  %v8815_v14 = vld [vmem:[#allocation21_spill] sm:$0xff] }
 0x1e5   :  { %2477 = vmatpush.msra.mxu3 %v7383_v13  ;;  %2555 = vmatpush.msrb.mxu2 %v7308_v35 }
 0x1e6   :  { %2358 = vmatpush.msra.mxu0 %v8790_v42  ;;  %2479 = vmatmul.f32.vlgmr.msra.gmra.mxu3 %v7652_v5 }
 0x1e7   :  { %2530 = vmatpush.msrb.mxu1 %v7285_v12  ;;  %2559 = vmatpush.msrb.mxu2 %v8791_v30 }
 0x1e8   :  { %2586 = vmatpush.msrb.mxu3 %v7258_v61  ;;  %2362 = vmatpush.msra.mxu0 %v8792_v31 }
 0x1e9   :  { %2532 = vmatpush.msrb.mxu1 %v7299_v32  ;;  %2563 = vmatpush.msrb.mxu2 %v8793_v8 }
 0x1ea   :  { %2588 = vmatpush.msrb.mxu3 %v7270_v1  ;;  %2364 = vmatmul.f32.vlgmr.msra.gmra.mxu0 %v7652_v5 }
 0x1eb   :  { %2497 = vmatpush.msrb.mxu0 %v8794_v6  ;;  %2536 = vmatmul.f32.vlgmr.msrb.gmra.mxu1 %v7661_v37  ;;  %v8813_v37 = vld [vmem:[#allocation20_spill] sm:$0xff] }
 0x1ec   :  { %2567 = vmatpush.msrb.mxu2 %v8795_v50  ;;  %2590 = vmatpush.msrb.mxu3 %v7285_v12 }
 0x1ed   :  { %2500 = vmatpush.msrb.mxu0 %v8796_v45  ;;  %2569 = vmatmul.f32.vlgmr.msrb.gmra.mxu2 %v7652_v5 }
 0x1ee   :  { %2592 = vmatpush.msrb.mxu3 %v7299_v32  ;;  %2666 = vmatpush.msra.mxu1 %v8797_v58 }
 0x1ef   :  { %2503 = vmatpush.msrb.mxu0 %v8798_v23  ;;  %2594 = vmatmul.f32.vlgmr.msrb.gmra.mxu3 %v7652_v5  ;;  %v8811_v5 = vld [vmem:[#allocation28_spill] sm:$0xff] }
 0x1f0   :  { %2672 = vmatpush.msra.mxu1 %v8799_v29  ;;  %2704 = vmatpush.msra.mxu2 %v8800_v22 }
 0x1f1   :  { %2506 = vmatpush.msrb.mxu0 %v8801_v15  ;;  %2733 = vmatpush.msra.mxu3 %v8802_v4 }
 0x1f2   :  { %2509 = vmatmul.f32.vlgmr.msrb.gmra.mxu0 %v7656_v25  ;;  %2678 = vmatpush.msra.mxu1 %v8803_v38  ;;  %v8812_v25 = vld [vmem:[#allocation30_spill] sm:$0xff] }
 0x1f3   :  { %2707 = vmatpush.msra.mxu2 %v8804_v18  ;;  %2735 = vmatpush.msra.mxu3 %v8805_v52 }
 0x1f4   :  { %2684 = vmatpush.msra.mxu1 %v8806_v27  ;;  %2633 = vmatpush.msra.mxu0 %v8802_v4 }
 0x1f5   :  { %2710 = vmatpush.msra.mxu2 %v8807_v41  ;;  %2737 = vmatpush.msra.mxu3 %v8808_v16 }
 0x1f6   :  { %2793 = vmatpush.msrb.mxu1 %v8802_v4  ;;  %2635 = vmatpush.msra.mxu0 %v8805_v52 }
 0x1f7   :  { %2713 = vmatpush.msra.mxu2 %v8809_v24  ;;  %2739 = vmatpush.msra.mxu3 %v8810_v40  ;;  %v8817_v24 = vld [vmem:[#allocation22_spill] sm:$0xff] }
 0x1f8   :  { %2795 = vmatpush.msrb.mxu1 %v8805_v52  ;;  %2637 = vmatpush.msra.mxu0 %v8808_v16 }
 0x1f9   :  { %2838 = vmatpush.msrb.mxu2 %v7112_v10  ;;  %2871 = vmatpush.msrb.mxu3 %v8811_v5  ;;  %v8816_v5 = vld [vmem:[#allocation33_spill] sm:$0xff] }
 0x1fa   :  { %2797 = vmatpush.msrb.mxu1 %v8808_v16  ;;  %2639 = vmatpush.msra.mxu0 %v8810_v40  ;;  %v8818_v16 = vld [vmem:[#allocation24_spill] sm:$0xff] }
 0x1fb   :  { %2840 = vmatpush.msrb.mxu2 %v7114_v11  ;;  %2877 = vmatpush.msrb.mxu3 %v8812_v25 }
 0x1fc   :  { %2799 = vmatpush.msrb.mxu1 %v8810_v40  ;;  %2762 = vmatpush.msrb.mxu0 %v8813_v37 }
 0x1fd   :  { %2842 = vmatpush.msrb.mxu2 %v7127_v17  ;;  %2883 = vmatpush.msrb.mxu3 %v8814_v57  ;;  %v8819_v57 = vld [vmem:[#allocation46_spill] sm:$0xff] }
 0x1fe   :  { %2766 = vmatpush.msrb.mxu0 %v8815_v14 }
 0x1ff   :  { %2844 = vmatpush.msrb.mxu2 %v7138_v21  ;;  %2889 = vmatpush.msrb.mxu3 %v8816_v5  ;;  %v7782_v5 = vld [vmem:[#allocation4] ss:$0 sm:$0xff] }
 0x200   :  { %2770 = vmatpush.msrb.mxu0 %v8817_v24  ;;  %8820 = vst [vmem:[#allocation23_spill] sm:$0xff] %v7782_v5 }
 0x202   :  { %2774 = vmatpush.msrb.mxu0 %v8818_v16 }
 0x216   :  { %v7778_v52 = vpop.permute.xlu1 %1784 }
 0x217   :  { %v1787_v4 = vmul.f32 %v8819_v57, %v7778_v52 }
 0x219   :  { %v1788_v24 = vadd.f32 %v7782_v5, %v1787_v4 }
 0x23f   :  { %v1865_v41 = vpop.f32.mrf.mxu1 }
 0x247   :  { %v1824_v25 = vpop.f32.mrf.mxu0  ;;  %v1895_v27 = vpop.f32.mrf.mxu2 }
 0x248   :  { %v1866_v40 = vadd.f32 %v1865_v41, %v1824_v25  ;;  %v1980_v18 = vpop.f32.mrf.mxu1 }
 0x249   :  { %v1922_v37 = vpop.f32.mrf.mxu3 }
 0x24a   :  { %v1896_v38 = vadd.f32 %v1895_v27, %v1866_v40  ;;  %v7788_v27 = vld [vmem:[%s8579_s1 + $0x1] ss:$0 sm:$0xff] }
 0x24b   :  { %8821 = vst [vmem:[#allocation34_spill] sm:$0xff] %v7788_v27 }
 0x24c   :  { %v1923_v15 = vadd.f32 %v1922_v37, %v1896_v38  ;;  %v1789_v38 = vmul.f32 %v7788_v27, %v7778_v52 }
 0x24f   :  { %v1955_v14 = vpop.f32.mrf.mxu0  ;;  %v2029_v22 = vpop.f32.mrf.mxu2 }
 0x250   :  { %v1956_v16 = vadd.f32 %v1955_v14, %v1923_v15  ;;  %v2127_v58 = vpop.f32.mrf.mxu1 }
 0x251   :  { %v2070_v29 = vpop.f32.mrf.mxu3 }
 0x252   :  { %v1981_v23 = vadd.f32 %v1980_v18, %v1956_v16  ;;  %v2071_v45 = vadd.f32 %v2070_v29, %v2029_v22  ;;  %v7792_v18 = vld [vmem:[#allocation4 + $0x1] ss:$0 sm:$0xff] }
 0x253   :  { %8822 = vst [vmem:[#allocation25_spill] sm:$0xff] %v7792_v18 }
 0x254   :  { %v1983_v41 = vadd.f32 %v1981_v23, %v1788_v24  ;;  %v1790_v23 = vadd.f32 %v7792_v18, %v1789_v38 }
 0x256   :  { %v6743_v25 = vmul.f32 -1.442695, %v1983_v41 }
 0x257   :  { %v2100_v50 = vpop.f32.mrf.mxu0  ;;  %v2160_v6 = vpop.f32.mrf.mxu2 }
 0x258   :  { %6829 = vpow2.f32 %v6743_v25  ;;  %v2101_v40 = vadd.f32 %v2100_v50, %v2071_v45  ;;  %v2275_v29 = vpop.f32.mrf.mxu1 }
 0x259   :  { %v2185_v4 = vpop.f32.mrf.mxu3 }
 0x25a   :  { %v2128_v15 = vadd.f32 %v2127_v58, %v2101_v40 }
 0x25c   :  { %v2161_v37 = vadd.f32 %v2160_v6, %v2128_v15  ;;  %v8823_v6 = vld [vmem:[#allocation50_spill] sm:$0xff] }
 0x25d   :  { %v1793_v50 = vmul.f32 %v8823_v6, %v7778_v52 }
 0x25e   :  { %v6830_v22 = vpop.eup %6829  ;;  %v2186_v16 = vadd.f32 %v2185_v4, %v2161_v37 }
 0x25f   :  { %v7795_v24 = vadd.f32 1.0, %v6830_v22  ;;  %v2234_v57 = vpop.f32.mrf.mxu0  ;;  %v2305_v14 = vpop.f32.mrf.mxu2  ;;  %v8824_v22 = vld [vmem:[#allocation51_spill] sm:$0xff] }
 0x260   :  { %v2188_v41 = vadd.f32 %v2186_v16, %v1790_v23  ;;  %v2276_v5 = vadd.f32 %v2275_v29, %v2234_v57  ;;  %v2390_v58 = vpop.f32.mrf.mxu1  ;;  %v1794_v18 = vadd.f32 %v8824_v22, %v1793_v50 }
 0x261   :  { %v2332_v8 = vpop.f32.mrf.mxu3  ;;  %6831 = vrcp.f32 %v7795_v24  ;;  %vm1993_vm14 = vweird.f32 %v7795_v24 }
 0x262   :  { %v6744_v27 = vmul.f32 -1.442695, %v2188_v41  ;;  %v2306_v25 = vadd.f32 %v2305_v14, %v2276_v5 }
 0x264   :  { %6833 = vpow2.f32 %v6744_v27  ;;  %v2333_v45 = vadd.f32 %v2332_v8, %v2306_v25 }
 0x267   :  { %v2365_v38 = vpop.f32.mrf.mxu0  ;;  %v6832_v4 = vpop.eup %6831 }
 0x268   :  { %v2366_v40 = vadd.f32 %v2365_v38, %v2333_v45  ;;  %v2439_v15 = vpop.f32.mrf.mxu2  ;;  %v1989_v5 = vmul.f32 %v6832_v4, %v7795_v24  ;;  %v2537_v6 = vpop.f32.mrf.mxu1  ;;  %v1791_v45 = vmul.f32 %v7490_v34, %v7778_v52  ;;  %vm1994_vm10 = vweird.f32 %v6832_v4 }
 0x269   :  { %v2480_v16 = vpop.f32.mrf.mxu3  ;;  %v1999_v52 = vand.u32 2147483648, %v7795_v24  ;;  %vm1995_vm15 = vmor %vm1993_vm14, %vm1994_vm10 }
 0x26a   :  { %v6834_v37 = vpop.eup %6833  ;;  %v2391_v23 = vadd.f32 %v2390_v58, %v2366_v40  ;;  %v2481_v14 = vadd.f32 %v2480_v16, %v2439_v15  ;;  %v1990_v25 = vsub.f32 1.0, %v1989_v5 }
 0x26b   :  { %v2192_v29 = vadd.f32 1.0, %v6834_v37 }
 0x26c   :  { %v2393_v57 = vadd.f32 %v2391_v23, %v1794_v18  ;;  %v1991_v37 = vmul.f32 %v6832_v4, %v1990_v25 }
 0x26d   :  { %6835 = vrcp.f32 %v2192_v29  ;;  %v2204_v5 = vand.u32 2147483648, %v2192_v29  ;;  %v2202_v34 = vand.u32 2147483647, %v2192_v29  ;;  %vm2198_vm11 = vweird.f32 %v2192_v29 }
 0x26e   :  { %v6745_v27 = vmul.f32 -1.442695, %v2393_v57  ;;  %v1792_v57 = vadd.f32 %v8789_v3, %v1791_v45  ;;  %v1997_v3 = vand.u32 2147483647, %v7795_v24 }
 0x26f   :  { %v2510_v41 = vpop.f32.mrf.mxu0  ;;  %v2205_v25 = vor.u32 1.1754944e-38, %v2204_v5  ;;  %vm2203_vm0 = vcmp.eq.f32.partialorder %v2202_v34, 8.507059e+37  ;;  %v7812_v34 = vld [vmem:[#allocation2] sm:$0x3] }
 0x270   :  { %6837 = vpow2.f32 %v6745_v27  ;;  %v2511_v8 = vadd.f32 %v2510_v41, %v2481_v14  ;;  %v2570_v50 = vpop.f32.mrf.mxu2  ;;  %v1992_v41 = vadd.f32 %v6832_v4, %v1991_v37  ;;  %vm1998_vm1 = vcmp.eq.f32.partialorder %v1997_v3, 8.507059e+37  ;;  %8825 = vst [vmem:[#allocation35_spill] sm:$0xff] %v7812_v34 }
 0x272   :  { %v2538_v38 = vadd.f32 %v2537_v6, %v2511_v8  ;;  %v2595_v18 = vpop.f32.mrf.mxu3  ;;  %v1996_v45 = vsel %vm1995_vm15, %v6832_v4, %v1992_v41 }
 0x273   :  { %v6836_v31 = vpop.eup %6835 }
 0x274   :  { %v2194_v58 = vmul.f32 %v6836_v31, %v2192_v29  ;;  %v2571_v40 = vadd.f32 %v2570_v50, %v2538_v38  ;;  %vm2199_vm9 = vweird.f32 %v6836_v31  ;;  %v2000_v38 = vor.u32 1.1754944e-38, %v1999_v52 }
 0x275   :  { %vm2200_vm13 = vmor %vm2198_vm11, %vm2199_vm9 }
 0x276   :  { %v6838_v22 = vpop.eup %6837  ;;  %v2195_v23 = vsub.f32 1.0, %v2194_v58  ;;  %v2596_v15 = vadd.f32 %v2595_v18, %v2571_v40  ;;  %v2001_v37 = vsel %vm1998_vm1, %v2000_v38, %v1996_v45  ;;  %v8826_v38 = vld [vmem:[#allocation40_spill] sm:$0xff] }
 0x277   :  { %v2397_v16 = vadd.f32 1.0, %v6838_v22 }
 0x278   :  { %v2196_v27 = vmul.f32 %v6836_v31, %v2195_v23  ;;  %v2598_v14 = vadd.f32 %v2596_v15, %v1792_v57 }
 0x279   :  { %6839 = vrcp.f32 %v2397_v16  ;;  %v2409_v24 = vand.u32 2147483648, %v2397_v16  ;;  %vm2403_vm3 = vweird.f32 %v2397_v16  ;;  %v2407_v4 = vand.u32 2147483647, %v2397_v16 }
 0x27a   :  { %v2197_v8 = vadd.f32 %v6836_v31, %v2196_v27  ;;  %6841 = vtanh.f32 %v2598_v14  ;;  %v7057_v14 = vmov 3  }
 0x27b   :  { %v2410_v5 = vor.u32 1.1754944e-38, %v2409_v24  ;;  %vm2408_vm5 = vcmp.eq.f32.partialorder %v2407_v4, 8.507059e+37  ;;  %6781 = vset.pattern.permute.xlu1 %v7057_v14  ;;  %v8836_v24 = vld [vmem:[#allocation12_spill] sm:$0xff]  ;;  %v8838_v4 = vld [vmem:[#allocation17_spill] sm:$0xff]  ;;  %v8841_v14 = vld [vmem:[#allocation18_spill] sm:$0xff] }
 0x27c   :  { %v2201_v6 = vsel %vm2200_vm13, %v6836_v31, %v2197_v8  ;;  %2606 = vperm.xlu1 %6781, %v7812_v34  }
 0x27d   :  { %v2206_v50 = vsel %vm2203_vm0, %v2205_v25, %v2201_v6 }
 0x27e   :  { %v2600_v18 = vmul.f32 %v2206_v50, %v7647_v44  ;;  %v8827_v50 = vld [vmem:[#allocation44_spill] sm:$0xff] }
 0x27f   :  { %v6840_v58 = vpop.eup %6839 }
 0x280   :  { %v6842_v40 = vpop.eup %6841  ;;  %v2399_v29 = vmul.f32 %v6840_v58, %v2397_v16  ;;  %vm2404_vm2 = vweird.f32 %v6840_v58 }
 0x281   :  { %v2601_v22 = vmul.f32 %v6842_v40, %v2001_v37  ;;  %vm2405_vm4 = vmor %vm2403_vm3, %vm2404_vm2  ;;  %v8829_v40 = vld [vmem:[#allocation45_spill] sm:$0xff]  ;;  %v8831_v37 = vld [vmem:[#allocation26_spill] sm:$0xff] }
 0x282   :  { %v2400_v23 = vsub.f32 1.0, %v2399_v29  ;;  %v8830_v29 = vld [vmem:[#allocation39_spill] sm:$0xff] }
 0x283   :  { %v7809_v57 = vadd.f32 %v2601_v22, %v2600_v18  ;;  %v8832_v18 = vld [vmem:[#allocation41_spill] sm:$0xff]  ;;  %v8833_v22 = vld [vmem:[#allocation27_spill] sm:$0xff] }
 0x284   :  { %v2401_v15 = vmul.f32 %v6840_v58, %v2400_v23  ;;  %v8834_v23 = vld [vmem:[#allocation16_spill] sm:$0xff] }
 0x285   :  { %6843 = vtanh.f32 %v7809_v57 }
 0x286   :  { %v2402_v31 = vadd.f32 %v6840_v58, %v2401_v15  ;;  %v8835_v15 = vld [vmem:[#allocation43_spill] sm:$0xff] }
 0x288   :  { %v2406_v27 = vsel %vm2405_vm4, %v6840_v58, %v2402_v31  ;;  %v8828_v58 = vld [vmem:[#allocation37_spill] sm:$0xff] }
 0x289   :  { %v2411_v44 = vsel %vm2408_vm5, %v2410_v5, %v2406_v27  ;;  %v8837_v31 = vld [vmem:[#allocation29_spill] sm:$0xff]  ;;  %v8840_v5 = vld [vmem:[#allocation31_spill] sm:$0xff] }
 0x28a   :  { %v8839_v27 = vld [vmem:[#allocation13_spill] sm:$0xff] }
 0x28b   :  { %v6844_v41 = vpop.eup %6843 }
 0x28c   :  { %v2604_v52 = vmul.f32 %v6844_v41, %v2411_v44  ;;  %v8842_v41 = vld [vmem:[#allocation14_spill] sm:$0xff]  ;;  %v8843_v44 = vld [vmem:[#allocation19_spill] sm:$0xff] }
 0x28e   :  { %v2618_v8 = vsel %vm150_vm12, %v2604_v52, 0  ;;  %v8844_v52 = vld [vmem:[#allocation15_spill] sm:$0xff] }
 0x28f   :  { %v7816_v3 = vand.u32 4294901760, %v2618_v8 }
 0x291   :  { %2686 = vmatmul.f32.vlgmr.msra.gmra.mxu1 %v7816_v3  ;;  %v7820_v16 = vsub.f32 %v2618_v8, %v7816_v3  ;;  %v8845_v8 = vld [vmem:[#allocation28_spill] sm:$0xff] }
 0x292   :  { %2938 = vmatpush.msra.mxu1 %v7112_v10 }
 0x293   :  { %2716 = vmatmul.f32.vlgmr.msra.gmra.mxu2 %v7820_v16  ;;  %v7825_v25 = vand.u32 4294901760, %v7820_v16 }
 0x294   :  { %2940 = vmatpush.msra.mxu1 %v7114_v11  ;;  %2967 = vmatpush.msra.mxu2 %v7156_v26 }
 0x295   :  { %2743 = vmatmul.f32.vlgmr.msra.gmra.mxu3 %v7825_v25  ;;  %v2643_v6 = vsub.f32 %v7820_v16, %v7825_v25 }
 0x296   :  { %2942 = vmatpush.msra.mxu1 %v7127_v17  ;;  %2971 = vmatpush.msra.mxu2 %v7162_v28 }
 0x297   :  { %v2644_v45 = vand.u32 4294901760, %v2643_v6  ;;  %2998 = vmatpush.msra.mxu3 %v7112_v10  ;;  %v8849_v6 = vld [vmem:[#allocation21_spill] sm:$0xff] }
 0x298   :  { %2944 = vmatpush.msra.mxu1 %v7138_v21  ;;  %2975 = vmatpush.msra.mxu2 %v7176_v33 }
 0x299   :  { %2645 = vmatmul.f32.vlgmr.msra.gmra.mxu0 %v2644_v45  ;;  %2801 = vmatmul.f32.vlgmr.msrb.gmra.mxu1 %v7816_v3 }
 0x29a   :  { %3000 = vmatpush.msra.mxu3 %v7114_v11  ;;  %2909 = vmatpush.msra.mxu0 %v7133_v19 }
 0x29b   :  { %2850 = vmatmul.f32.vlgmr.msrb.gmra.mxu2 %v2644_v45  ;;  %3076 = vmatpush.msrb.mxu1 %v7318_v46 }
 0x29c   :  { %2979 = vmatpush.msra.mxu2 %v7192_v39  ;;  %3002 = vmatpush.msra.mxu3 %v7127_v17 }
 0x29d   :  { %2891 = vmatmul.f32.vlgmr.msrb.gmra.mxu3 %v7816_v3  ;;  %2912 = vmatpush.msra.mxu0 %v7136_v20 }
 0x29e   :  { %3004 = vmatpush.msra.mxu3 %v7138_v21  ;;  %3082 = vmatpush.msrb.mxu1 %v7333_v59 }
 0x29f   :  { %3114 = vmatpush.msrb.mxu2 %v7243_v54  ;;  %2915 = vmatpush.msra.mxu0 %v8756_v49 }
 0x2a0   :  { %3088 = vmatpush.msrb.mxu1 %v7346_v56  ;;  %3143 = vmatpush.msrb.mxu3 %v7230_v51 }
 0x2a1   :  { %2776 = vmatmul.f32.vlgmr.msrb.gmra.mxu0 %v7816_v3  ;;  %2948 = vmatmul.f32.vlgmr.msra.gmra.mxu1 %v7825_v25 }
 0x2a2   :  { %3117 = vmatpush.msrb.mxu2 %v8757_v47  ;;  %2918 = vmatpush.msra.mxu0 %v8758_v36 }
 0x2a3   :  { %2981 = vmatmul.f32.vlgmr.msra.gmra.mxu2 %v7816_v3  ;;  %3094 = vmatpush.msrb.mxu1 %v7361_v63 }
 0x2a4   :  { %3120 = vmatpush.msrb.mxu2 %v8759_v9  ;;  %3145 = vmatpush.msrb.mxu3 %v7236_v53 }
 0x2a5   :  { %3006 = vmatmul.f32.vlgmr.msra.gmra.mxu3 %v7816_v3  ;;  %3043 = vmatpush.msrb.mxu0 %v7230_v51 }
 0x2a6   :  { %3123 = vmatpush.msrb.mxu2 %v8760_v43  ;;  %3147 = vmatpush.msrb.mxu3 %v7245_v55 }
 0x2a7   :  { %3203 = vmatpush.msra.mxu1 %v7230_v51  ;;  %3045 = vmatpush.msrb.mxu0 %v7236_v53 }
 0x2a8   :  { %3149 = vmatpush.msrb.mxu3 %v7256_v60  ;;  %3248 = vmatpush.msra.mxu2 %v7258_v61 }
 0x2a9   :  { %2921 = vmatmul.f32.vlgmr.msra.gmra.mxu0 %v7820_v16  ;;  %3096 = vmatmul.f32.vlgmr.msrb.gmra.mxu1 %v7816_v3 }
 0x2aa   :  { %3205 = vmatpush.msra.mxu1 %v7236_v53  ;;  %3047 = vmatpush.msrb.mxu0 %v7245_v55 }
 0x2ab   :  { %3126 = vmatmul.f32.vlgmr.msrb.gmra.mxu2 %v7820_v16  ;;  %3281 = vmatpush.msra.mxu3 %v7359_v48 }
 0x2ac   :  { %3207 = vmatpush.msra.mxu1 %v7245_v55  ;;  %3250 = vmatpush.msra.mxu2 %v7270_v1 }
 0x2ad   :  { %3153 = vmatmul.f32.vlgmr.msrb.gmra.mxu3 %v7825_v25  ;;  %3049 = vmatpush.msrb.mxu0 %v7256_v60 }
 0x2ae   :  { %3209 = vmatpush.msra.mxu1 %v7256_v60  ;;  %3252 = vmatpush.msra.mxu2 %v7285_v12 }
 0x2af   :  { %3287 = vmatpush.msra.mxu3 %v7369_v7  ;;  %3172 = vmatpush.msra.mxu0 %v7263_v62 }
 0x2b0   :  { %3254 = vmatpush.msra.mxu2 %v7299_v32  ;;  %3348 = vmatpush.msrb.mxu1 %v7258_v61 }
 0x2b1   :  { %3055 = vmatmul.f32.vlgmr.msrb.gmra.mxu0 %v2644_v45  ;;  %3211 = vmatmul.f32.vlgmr.msra.gmra.mxu1 %v7816_v3 }
 0x2b2   :  { %3293 = vmatpush.msra.mxu3 %v7377_v0  ;;  %3176 = vmatpush.msra.mxu0 %v7275_v2 }
 0x2b3   :  { %3260 = vmatmul.f32.vlgmr.msra.gmra.mxu2 %v2644_v45  ;;  %3350 = vmatpush.msrb.mxu1 %v7270_v1  ;;  %v8850_v45 = vld [vmem:[#allocation33_spill] sm:$0xff] }
 0x2b4   :  { %3299 = vmatpush.msra.mxu3 %v7383_v13  ;;  %3377 = vmatpush.msrb.mxu2 %v7308_v35 }
 0x2b5   :  { %3180 = vmatpush.msra.mxu0 %v8790_v42  ;;  %3301 = vmatmul.f32.vlgmr.msra.gmra.mxu3 %v7816_v3 }
 0x2b6   :  { %3352 = vmatpush.msrb.mxu1 %v7285_v12  ;;  %3381 = vmatpush.msrb.mxu2 %v8791_v30 }
 0x2b7   :  { %3408 = vmatpush.msrb.mxu3 %v7258_v61  ;;  %3184 = vmatpush.msra.mxu0 %v8826_v38 }
 0x2b8   :  { %3354 = vmatpush.msrb.mxu1 %v7299_v32  ;;  %3385 = vmatpush.msrb.mxu2 %v8827_v50 }
 0x2b9   :  { %3410 = vmatpush.msrb.mxu3 %v7270_v1  ;;  %3186 = vmatmul.f32.vlgmr.msra.gmra.mxu0 %v7816_v3 }
 0x2ba   :  { %3319 = vmatpush.msrb.mxu0 %v8828_v58  ;;  %3358 = vmatmul.f32.vlgmr.msrb.gmra.mxu1 %v7825_v25  ;;  %v8848_v25 = vld [vmem:[#allocation32_spill] sm:$0xff]  ;;  %v8856_v58 = vld [vmem:[#allocation25_spill] sm:$0xff] }
 0x2bb   :  { %3389 = vmatpush.msrb.mxu2 %v8829_v40  ;;  %3412 = vmatpush.msrb.mxu3 %v7285_v12 }
 0x2bc   :  { %3322 = vmatpush.msrb.mxu0 %v8830_v29  ;;  %3391 = vmatmul.f32.vlgmr.msrb.gmra.mxu2 %v7816_v3 }
 0x2bd   :  { %3414 = vmatpush.msrb.mxu3 %v7299_v32  ;;  %3488 = vmatpush.msra.mxu1 %v8831_v37 }
 0x2be   :  { %3325 = vmatpush.msrb.mxu0 %v8832_v18  ;;  %3416 = vmatmul.f32.vlgmr.msrb.gmra.mxu3 %v7816_v3  ;;  %v8846_v3 = vld [vmem:[#allocation30_spill] sm:$0xff] }
 0x2bf   :  { %3494 = vmatpush.msra.mxu1 %v8833_v22  ;;  %3526 = vmatpush.msra.mxu2 %v8834_v23  ;;  %v8855_v18 = vld [vmem:[#allocation34_spill] sm:$0xff] }
 0x2c0   :  { %3328 = vmatpush.msrb.mxu0 %v8835_v15  ;;  %3555 = vmatpush.msra.mxu3 %v8836_v24 }
 0x2c1   :  { %3331 = vmatmul.f32.vlgmr.msrb.gmra.mxu0 %v7820_v16  ;;  %3500 = vmatpush.msra.mxu1 %v8837_v31  ;;  %v8847_v16 = vld [vmem:[#allocation20_spill] sm:$0xff] }
 0x2c2   :  { %3529 = vmatpush.msra.mxu2 %v8838_v4  ;;  %3557 = vmatpush.msra.mxu3 %v8839_v27 }
 0x2c3   :  { %3506 = vmatpush.msra.mxu1 %v8840_v5  ;;  %3455 = vmatpush.msra.mxu0 %v8836_v24 }
 0x2c4   :  { %3532 = vmatpush.msra.mxu2 %v8841_v14  ;;  %3559 = vmatpush.msra.mxu3 %v8842_v41 }
 0x2c5   :  { %3615 = vmatpush.msrb.mxu1 %v8836_v24  ;;  %3457 = vmatpush.msra.mxu0 %v8839_v27  ;;  %v8854_v24 = vld [vmem:[#allocation23_spill] sm:$0xff] }
 0x2c6   :  { %3535 = vmatpush.msra.mxu2 %v8843_v44  ;;  %3561 = vmatpush.msra.mxu3 %v8844_v52 }
 0x2c7   :  { %3617 = vmatpush.msrb.mxu1 %v8839_v27  ;;  %3459 = vmatpush.msra.mxu0 %v8842_v41 }
 0x2c8   :  { %3660 = vmatpush.msrb.mxu2 %v7112_v10  ;;  %3693 = vmatpush.msrb.mxu3 %v8845_v8  ;;  %v8851_v8 = vld [vmem:[#allocation22_spill] sm:$0xff] }
 0x2c9   :  { %3619 = vmatpush.msrb.mxu1 %v8842_v41  ;;  %3461 = vmatpush.msra.mxu0 %v8844_v52  ;;  %v8852_v41 = vld [vmem:[#allocation24_spill] sm:$0xff] }
 0x2ca   :  { %3662 = vmatpush.msrb.mxu2 %v7114_v11  ;;  %3699 = vmatpush.msrb.mxu3 %v8846_v3 }
 0x2cb   :  { %3621 = vmatpush.msrb.mxu1 %v8844_v52  ;;  %3584 = vmatpush.msrb.mxu0 %v8847_v16 }
 0x2cc   :  { %3664 = vmatpush.msrb.mxu2 %v7127_v17  ;;  %3705 = vmatpush.msrb.mxu3 %v8848_v25  ;;  %v7947_v25 = vld [vmem:[%s8579_s1] ss:$0 sm:$0xff] }
 0x2cd   :  { %3588 = vmatpush.msrb.mxu0 %v8849_v6  ;;  %8853 = vst [vmem:[#allocation36_spill] sm:$0xff] %v7947_v25 }
 0x2ce   :  { %3666 = vmatpush.msrb.mxu2 %v7138_v21  ;;  %3711 = vmatpush.msrb.mxu3 %v8850_v45 }
 0x2cf   :  { %3592 = vmatpush.msrb.mxu0 %v8851_v8 }
 0x2d1   :  { %3596 = vmatpush.msrb.mxu0 %v8852_v41 }
 0x2ee   :  { %v7942_v27 = vpop.permute.xlu1 %2606 }
 0x2ef   :  { %v2609_v45 = vmul.f32 %v7947_v25, %v7942_v27  ;;  %v2611_v29 = vmul.f32 %v8855_v18, %v7942_v27 }
 0x2f1   :  { %v2610_v4 = vadd.f32 %v8854_v24, %v2609_v45  ;;  %v2612_v50 = vadd.f32 %v8856_v58, %v2611_v29 }
 0x30e   :  { %v2687_v44 = vpop.f32.mrf.mxu1 }
 0x316   :  { %v2646_v3 = vpop.f32.mrf.mxu0  ;;  %v2717_v5 = vpop.f32.mrf.mxu2 }
 0x317   :  { %v2688_v52 = vadd.f32 %v2687_v44, %v2646_v3  ;;  %v2802_v14 = vpop.f32.mrf.mxu1 }
 0x318   :  { %v2744_v16 = vpop.f32.mrf.mxu3 }
 0x319   :  { %v2718_v31 = vadd.f32 %v2717_v5, %v2688_v52 }
 0x31b   :  { %v2745_v8 = vadd.f32 %v2744_v16, %v2718_v31 }
 0x31e   :  { %v2777_v6 = vpop.f32.mrf.mxu0  ;;  %v2851_v41 = vpop.f32.mrf.mxu2 }
 0x31f   :  { %v2778_v22 = vadd.f32 %v2777_v6, %v2745_v8  ;;  %v2949_v23 = vpop.f32.mrf.mxu1 }
 0x320   :  { %v2892_v44 = vpop.f32.mrf.mxu3 }
 0x321   :  { %v2803_v3 = vadd.f32 %v2802_v14, %v2778_v22  ;;  %v2893_v5 = vadd.f32 %v2892_v44, %v2851_v41 }
 0x323   :  { %v2805_v15 = vadd.f32 %v2803_v3, %v2610_v4 }
 0x325   :  { %v6746_v37 = vmul.f32 -1.442695, %v2805_v15 }
 0x326   :  { %v2922_v52 = vpop.f32.mrf.mxu0  ;;  %v2982_v34 = vpop.f32.mrf.mxu2 }
 0x327   :  { %6845 = vpow2.f32 %v6746_v37  ;;  %v2923_v40 = vadd.f32 %v2922_v52, %v2893_v5  ;;  %v3097_v45 = vpop.f32.mrf.mxu1 }
 0x328   :  { %v3007_v25 = vpop.f32.mrf.mxu3 }
 0x329   :  { %v2950_v31 = vadd.f32 %v2949_v23, %v2923_v40 }
 0x32b   :  { %v2983_v16 = vadd.f32 %v2982_v34, %v2950_v31  ;;  %v7961_v34 = vld [vmem:[%s8579_s1 + $0x3] ss:$0 sm:$0xff]  ;;  %v7965_v31 = vld [vmem:[#allocation4 + $0x3] ss:$0 sm:$0xff] }
 0x32c   :  { %8857 = vst [vmem:[#allocation47_spill] sm:$0xff] %v7961_v34  ;;  %v2615_v40 = vmul.f32 %v7961_v34, %v7942_v27 }
 0x32d   :  { %v6846_v8 = vpop.eup %6845  ;;  %v3008_v6 = vadd.f32 %v3007_v25, %v2983_v16  ;;  %8858 = vst [vmem:[#allocation48_spill] sm:$0xff] %v7965_v31 }
 0x32e   :  { %v7955_v22 = vadd.f32 1.0, %v6846_v8  ;;  %v3056_v4 = vpop.f32.mrf.mxu0  ;;  %v3127_v15 = vpop.f32.mrf.mxu2  ;;  %v2616_v16 = vadd.f32 %v7965_v31, %v2615_v40 }
 0x32f   :  { %v3010_v14 = vadd.f32 %v3008_v6, %v2612_v50  ;;  %v3098_v41 = vadd.f32 %v3097_v45, %v3056_v4  ;;  %v3212_v37 = vpop.f32.mrf.mxu1 }
 0x330   :  { %v3154_v44 = vpop.f32.mrf.mxu3  ;;  %6847 = vrcp.f32 %v7955_v22  ;;  %vm2815_vm10 = vweird.f32 %v7955_v22 }
 0x331   :  { %v6747_v3 = vmul.f32 -1.442695, %v3010_v14  ;;  %v3128_v24 = vadd.f32 %v3127_v15, %v3098_v41 }
 0x333   :  { %6849 = vpow2.f32 %v6747_v3  ;;  %v3155_v29 = vadd.f32 %v3154_v44, %v3128_v24 }
 0x336   :  { %v3187_v23 = vpop.f32.mrf.mxu0  ;;  %v6848_v50 = vpop.eup %6847 }
 0x337   :  { %v3188_v25 = vadd.f32 %v3187_v23, %v3155_v29  ;;  %v3261_v5 = vpop.f32.mrf.mxu2  ;;  %v2811_v15 = vmul.f32 %v6848_v50, %v7955_v22  ;;  %v3359_v29 = vpop.f32.mrf.mxu1  ;;  %v7972_v23 = vld [vmem:[%s8579_s1 + $0x2] ss:$0 sm:$0xff]  ;;  %vm2816_vm7 = vweird.f32 %v6848_v50 }
 0x338   :  { %v3302_v6 = vpop.f32.mrf.mxu3  ;;  %v2613_v40 = vmul.f32 %v7972_v23, %v7942_v27  ;;  %vm2817_vm11 = vmor %vm2815_vm10, %vm2816_vm7 }
 0x339   :  { %v6850_v52 = vpop.eup %6849  ;;  %v3213_v45 = vadd.f32 %v3212_v37, %v3188_v25  ;;  %v3303_v41 = vadd.f32 %v3302_v6, %v3261_v5  ;;  %v2812_v3 = vsub.f32 1.0, %v2811_v15 }
 0x33a   :  { %v3014_v8 = vadd.f32 1.0, %v6850_v52 }
 0x33b   :  { %v3215_v4 = vadd.f32 %v3213_v45, %v2616_v16 }
 0x33c   :  { %6851 = vrcp.f32 %v3014_v8  ;;  %v3026_v58 = vand.u32 2147483648, %v3014_v8  ;;  %vm3020_vm8 = vweird.f32 %v3014_v8 }
 0x33d   :  { %v6748_v14 = vmul.f32 -1.442695, %v3215_v4  ;;  %v2813_v4 = vmul.f32 %v6848_v50, %v2812_v3  ;;  %v2821_v3 = vand.u32 2147483648, %v7955_v22 }
 0x33e   :  { %v3332_v24 = vpop.f32.mrf.mxu0 }
 0x33f   :  { %6853 = vpow2.f32 %v6748_v14  ;;  %v3333_v44 = vadd.f32 %v3332_v24, %v3303_v41  ;;  %v3392_v52 = vpop.f32.mrf.mxu2  ;;  %v7976_v41 = vld [vmem:[#allocation4 + $0x2] ss:$0 sm:$0xff]  ;;  %v2814_v27 = vadd.f32 %v6848_v50, %v2813_v4 }
 0x340   :  { %8859 = vst [vmem:[#allocation49_spill] sm:$0xff] %v7976_v41  ;;  %v2614_v15 = vadd.f32 %v7976_v41, %v2613_v40  ;;  %v2819_v40 = vand.u32 2147483647, %v7955_v22 }
 0x341   :  { %v3360_v37 = vadd.f32 %v3359_v29, %v3333_v44  ;;  %v3417_v5 = vpop.f32.mrf.mxu3  ;;  %v3024_v44 = vand.u32 2147483647, %v3014_v8 }
 0x342   :  { %v6852_v25 = vpop.eup %6851  ;;  %vm2820_vm14 = vcmp.eq.f32.partialorder %v2819_v40, 8.507059e+37 }
 0x343   :  { %v3016_v16 = vmul.f32 %v6852_v25, %v3014_v8  ;;  %v3393_v45 = vadd.f32 %v3392_v52, %v3360_v37  ;;  %vm3021_vm6 = vweird.f32 %v6852_v25  ;;  %v3027_v37 = vor.u32 1.1754944e-38, %v3026_v58 }
 0x344   :  { %vm3022_vm9 = vmor %vm3020_vm8, %vm3021_vm6  ;;  %vm3025_vm13 = vcmp.eq.f32.partialorder %v3024_v44, 8.507059e+37 }
 0x345   :  { %v6854_v6 = vpop.eup %6853  ;;  %v3017_v14 = vsub.f32 1.0, %v3016_v16  ;;  %v3418_v24 = vadd.f32 %v3417_v5, %v3393_v45  ;;  %v2818_v16 = vsel %vm2817_vm11, %v6848_v50, %v2814_v27  ;;  %v2822_v45 = vor.u32 1.1754944e-38, %v2821_v3 }
 0x346   :  { %v3219_v31 = vadd.f32 1.0, %v6854_v6 }
 0x347   :  { %v3018_v34 = vmul.f32 %v6852_v25, %v3017_v14  ;;  %v3420_v18 = vadd.f32 %v3418_v24, %v2614_v15  ;;  %v2823_v14 = vsel %vm2820_vm14, %v2822_v45, %v2818_v16  ;;  %v8860_v16 = vld [vmem:[#allocation44_spill] sm:$0xff]  ;;  %v8861_v45 = vld [vmem:[#allocation37_spill] sm:$0xff] }
 0x348   :  { %6855 = vrcp.f32 %v3219_v31  ;;  %v3231_v58 = vand.u32 2147483648, %v3219_v31  ;;  %vm3225_vm0 = vweird.f32 %v3219_v31  ;;  %v3229_v50 = vand.u32 2147483647, %v3219_v31 }
 0x349   :  { %v3019_v29 = vadd.f32 %v6852_v25, %v3018_v34  ;;  %6857 = vtanh.f32 %v3420_v18 }
 0x34a   :  { %v3232_v27 = vor.u32 1.1754944e-38, %v3231_v58  ;;  %vm3230_vm2 = vcmp.eq.f32.partialorder %v3229_v50, 8.507059e+37  ;;  %v8869_v58 = vld [vmem:[#allocation27_spill] sm:$0xff]  ;;  %v8871_v50 = vld [vmem:[#allocation12_spill] sm:$0xff] }
 0x34b   :  { %v3023_v52 = vsel %vm3022_vm9, %v6852_v25, %v3019_v29 }
 0x34c   :  { %v3028_v5 = vsel %vm3025_vm13, %v3027_v37, %v3023_v52 }
 0x34d   :  { %v3422_v34 = vmul.f32 %v3028_v5, %v7809_v57  ;;  %v8862_v5 = vld [vmem:[#allocation45_spill] sm:$0xff] }
 0x34e   :  { %v6856_v4 = vpop.eup %6855 }
 0x34f   :  { %v6858_v6 = vpop.eup %6857  ;;  %v3221_v8 = vmul.f32 %v6856_v4, %v3219_v31  ;;  %vm3226_vm15 = vweird.f32 %v6856_v4 }
 0x350   :  { %v3423_v18 = vmul.f32 %v6858_v6, %v2823_v14  ;;  %vm3227_vm1 = vmor %vm3225_vm0, %vm3226_vm15  ;;  %v7058_v6 = vmov 4   ;;  %v8865_v14 = vld [vmem:[#allocation35_spill] sm:$0xff] }
 0x351   :  { %v3222_v15 = vsub.f32 1.0, %v3221_v8  ;;  %6782 = vset.pattern.permute.xlu2 %v7058_v6  ;;  %v8864_v8 = vld [vmem:[#allocation41_spill] sm:$0xff] }
 0x352   :  { %v7983_v24 = vadd.f32 %v3423_v18, %v3422_v34  ;;  %3428 = vperm.xlu2 %6782, %v8865_v14   ;;  %v8866_v34 = vld [vmem:[#allocation26_spill] sm:$0xff]  ;;  %v8867_v18 = vld [vmem:[#allocation43_spill] sm:$0xff]  ;;  %v8883_v6 = vld [vmem:[#allocation21_spill] sm:$0xff] }
 0x353   :  { %v3223_v41 = vmul.f32 %v6856_v4, %v3222_v15  ;;  %v8868_v15 = vld [vmem:[#allocation16_spill] sm:$0xff]  ;;  %v8884_v14 = vld [vmem:[#allocation33_spill] sm:$0xff] }
 0x354   :  { %6859 = vtanh.f32 %v7983_v24 }
 0x355   :  { %v3224_v22 = vadd.f32 %v6856_v4, %v3223_v41 }
 0x357   :  { %v3228_v25 = vsel %vm3227_vm1, %v6856_v4, %v3224_v22  ;;  %v8863_v4 = vld [vmem:[#allocation39_spill] sm:$0xff]  ;;  %v8870_v22 = vld [vmem:[#allocation17_spill] sm:$0xff] }
 0x358   :  { %v3233_v3 = vsel %vm3230_vm2, %v3232_v27, %v3228_v25  ;;  %v8872_v25 = vld [vmem:[#allocation29_spill] sm:$0xff]  ;;  %v8873_v27 = vld [vmem:[#allocation18_spill] sm:$0xff] }
 0x35a   :  { %v6860_v44 = vpop.eup %6859 }
 0x35b   :  { %v3426_v29 = vmul.f32 %v6860_v44, %v3233_v3  ;;  %v8874_v44 = vld [vmem:[#allocation13_spill] sm:$0xff]  ;;  %v8875_v3 = vld [vmem:[#allocation31_spill] sm:$0xff] }
 0x35d   :  { %v3440_v57 = vsel %vm150_vm12, %v3426_v29, 0  ;;  %v8876_v29 = vld [vmem:[#allocation19_spill] sm:$0xff] }
 0x35e   :  { %v7987_v40 = vand.u32 4294901760, %v3440_v57 }
 0x360   :  { %3508 = vmatmul.f32.vlgmr.msra.gmra.mxu1 %v7987_v40  ;;  %v7991_v37 = vsub.f32 %v3440_v57, %v7987_v40  ;;  %v8877_v57 = vld [vmem:[#allocation14_spill] sm:$0xff] }
 0x361   :  { %3760 = vmatpush.msra.mxu1 %v7112_v10 }
 0x362   :  { %3538 = vmatmul.f32.vlgmr.msra.gmra.mxu2 %v7991_v37  ;;  %v7996_v31 = vand.u32 4294901760, %v7991_v37 }
 0x363   :  { %3762 = vmatpush.msra.mxu1 %v7114_v11  ;;  %3789 = vmatpush.msra.mxu2 %v7156_v26 }
 0x364   :  { %3565 = vmatmul.f32.vlgmr.msra.gmra.mxu3 %v7996_v31  ;;  %v3465_v41 = vsub.f32 %v7991_v37, %v7996_v31 }
 0x365   :  { %3764 = vmatpush.msra.mxu1 %v7127_v17  ;;  %3793 = vmatpush.msra.mxu2 %v7162_v28 }
 0x366   :  { %v3466_v52 = vand.u32 4294901760, %v3465_v41  ;;  %3820 = vmatpush.msra.mxu3 %v7112_v10  ;;  %v8881_v41 = vld [vmem:[#allocation20_spill] sm:$0xff] }
 0x367   :  { %3766 = vmatpush.msra.mxu1 %v7138_v21  ;;  %3797 = vmatpush.msra.mxu2 %v7176_v33 }
 0x368   :  { %3467 = vmatmul.f32.vlgmr.msra.gmra.mxu0 %v3466_v52  ;;  %3623 = vmatmul.f32.vlgmr.msrb.gmra.mxu1 %v7987_v40 }
 0x369   :  { %3822 = vmatpush.msra.mxu3 %v7114_v11  ;;  %3731 = vmatpush.msra.mxu0 %v7133_v19 }
 0x36a   :  { %3672 = vmatmul.f32.vlgmr.msrb.gmra.mxu2 %v3466_v52  ;;  %3898 = vmatpush.msrb.mxu1 %v7318_v46 }
 0x36b   :  { %3801 = vmatpush.msra.mxu2 %v7192_v39  ;;  %3824 = vmatpush.msra.mxu3 %v7127_v17 }
 0x36c   :  { %3713 = vmatmul.f32.vlgmr.msrb.gmra.mxu3 %v7987_v40  ;;  %3734 = vmatpush.msra.mxu0 %v7136_v20 }
 0x36d   :  { %3826 = vmatpush.msra.mxu3 %v7138_v21  ;;  %3904 = vmatpush.msrb.mxu1 %v7333_v59 }
 0x36e   :  { %3936 = vmatpush.msrb.mxu2 %v7243_v54  ;;  %3737 = vmatpush.msra.mxu0 %v8756_v49 }
 0x36f   :  { %3910 = vmatpush.msrb.mxu1 %v7346_v56  ;;  %3965 = vmatpush.msrb.mxu3 %v7230_v51 }
 0x370   :  { %3598 = vmatmul.f32.vlgmr.msrb.gmra.mxu0 %v7987_v40  ;;  %3770 = vmatmul.f32.vlgmr.msra.gmra.mxu1 %v7996_v31 }
 0x371   :  { %3939 = vmatpush.msrb.mxu2 %v8757_v47  ;;  %3740 = vmatpush.msra.mxu0 %v8758_v36 }
 0x372   :  { %3803 = vmatmul.f32.vlgmr.msra.gmra.mxu2 %v7987_v40  ;;  %3916 = vmatpush.msrb.mxu1 %v7361_v63 }
 0x373   :  { %3942 = vmatpush.msrb.mxu2 %v8759_v9  ;;  %3967 = vmatpush.msrb.mxu3 %v7236_v53 }
 0x374   :  { %3828 = vmatmul.f32.vlgmr.msra.gmra.mxu3 %v7987_v40  ;;  %3865 = vmatpush.msrb.mxu0 %v7230_v51 }
 0x375   :  { %3945 = vmatpush.msrb.mxu2 %v8760_v43  ;;  %3969 = vmatpush.msrb.mxu3 %v7245_v55 }
 0x376   :  { %4025 = vmatpush.msra.mxu1 %v7230_v51  ;;  %3867 = vmatpush.msrb.mxu0 %v7236_v53 }
 0x377   :  { %3971 = vmatpush.msrb.mxu3 %v7256_v60  ;;  %4070 = vmatpush.msra.mxu2 %v7258_v61 }
 0x378   :  { %3743 = vmatmul.f32.vlgmr.msra.gmra.mxu0 %v7991_v37  ;;  %3918 = vmatmul.f32.vlgmr.msrb.gmra.mxu1 %v7987_v40 }
 0x379   :  { %4027 = vmatpush.msra.mxu1 %v7236_v53  ;;  %3869 = vmatpush.msrb.mxu0 %v7245_v55 }
 0x37a   :  { %3948 = vmatmul.f32.vlgmr.msrb.gmra.mxu2 %v7991_v37  ;;  %4103 = vmatpush.msra.mxu3 %v7359_v48 }
 0x37b   :  { %4029 = vmatpush.msra.mxu1 %v7245_v55  ;;  %4072 = vmatpush.msra.mxu2 %v7270_v1 }
 0x37c   :  { %3975 = vmatmul.f32.vlgmr.msrb.gmra.mxu3 %v7996_v31  ;;  %3871 = vmatpush.msrb.mxu0 %v7256_v60 }
 0x37d   :  { %4031 = vmatpush.msra.mxu1 %v7256_v60  ;;  %4074 = vmatpush.msra.mxu2 %v7285_v12 }
 0x37e   :  { %4109 = vmatpush.msra.mxu3 %v7369_v7  ;;  %3994 = vmatpush.msra.mxu0 %v7263_v62 }
 0x37f   :  { %4076 = vmatpush.msra.mxu2 %v7299_v32  ;;  %4170 = vmatpush.msrb.mxu1 %v7258_v61 }
 0x380   :  { %3877 = vmatmul.f32.vlgmr.msrb.gmra.mxu0 %v3466_v52  ;;  %4033 = vmatmul.f32.vlgmr.msra.gmra.mxu1 %v7987_v40 }
 0x381   :  { %4115 = vmatpush.msra.mxu3 %v7377_v0  ;;  %3998 = vmatpush.msra.mxu0 %v7275_v2 }
 0x382   :  { %4082 = vmatmul.f32.vlgmr.msra.gmra.mxu2 %v3466_v52  ;;  %4172 = vmatpush.msrb.mxu1 %v7270_v1  ;;  %v8882_v52 = vld [vmem:[#allocation32_spill] sm:$0xff] }
 0x383   :  { %4121 = vmatpush.msra.mxu3 %v7383_v13  ;;  %4199 = vmatpush.msrb.mxu2 %v7308_v35 }
 0x384   :  { %4002 = vmatpush.msra.mxu0 %v8790_v42  ;;  %4123 = vmatmul.f32.vlgmr.msra.gmra.mxu3 %v7987_v40 }
 0x385   :  { %4174 = vmatpush.msrb.mxu1 %v7285_v12  ;;  %4203 = vmatpush.msrb.mxu2 %v8791_v30 }
 0x386   :  { %4230 = vmatpush.msrb.mxu3 %v7258_v61  ;;  %4006 = vmatpush.msra.mxu0 %v8826_v38 }
 0x387   :  { %4176 = vmatpush.msrb.mxu1 %v7299_v32  ;;  %4207 = vmatpush.msrb.mxu2 %v8860_v16 }
 0x388   :  { %4232 = vmatpush.msrb.mxu3 %v7270_v1  ;;  %4008 = vmatmul.f32.vlgmr.msra.gmra.mxu0 %v7987_v40 }
 0x389   :  { %4141 = vmatpush.msrb.mxu0 %v8861_v45  ;;  %4180 = vmatmul.f32.vlgmr.msrb.gmra.mxu1 %v7996_v31  ;;  %v8880_v31 = vld [vmem:[#allocation30_spill] sm:$0xff] }
 0x38a   :  { %4211 = vmatpush.msrb.mxu2 %v8862_v5  ;;  %4234 = vmatpush.msrb.mxu3 %v7285_v12 }
 0x38b   :  { %4144 = vmatpush.msrb.mxu0 %v8863_v4  ;;  %4213 = vmatmul.f32.vlgmr.msrb.gmra.mxu2 %v7987_v40 }
 0x38c   :  { %4236 = vmatpush.msrb.mxu3 %v7299_v32  ;;  %4310 = vmatpush.msra.mxu1 %v8866_v34 }
 0x38d   :  { %4147 = vmatpush.msrb.mxu0 %v8864_v8  ;;  %4238 = vmatmul.f32.vlgmr.msrb.gmra.mxu3 %v7987_v40  ;;  %v8878_v40 = vld [vmem:[#allocation15_spill] sm:$0xff] }
 0x38e   :  { %4348 = vmatpush.msra.mxu2 %v8868_v15  ;;  %4316 = vmatpush.msra.mxu1 %v8869_v58 }
 0x38f   :  { %4150 = vmatpush.msrb.mxu0 %v8867_v18  ;;  %4377 = vmatpush.msra.mxu3 %v8871_v50 }
 0x390   :  { %4153 = vmatmul.f32.vlgmr.msrb.gmra.mxu0 %v7991_v37  ;;  %4351 = vmatpush.msra.mxu2 %v8870_v22  ;;  %v8879_v37 = vld [vmem:[#allocation28_spill] sm:$0xff] }
 0x391   :  { %4322 = vmatpush.msra.mxu1 %v8872_v25  ;;  %4277 = vmatpush.msra.mxu0 %v8871_v50 }
 0x392   :  { %4354 = vmatpush.msra.mxu2 %v8873_v27  ;;  %4379 = vmatpush.msra.mxu3 %v8874_v44 }
 0x393   :  { %4328 = vmatpush.msra.mxu1 %v8875_v3  ;;  %4279 = vmatpush.msra.mxu0 %v8874_v44 }
 0x394   :  { %4357 = vmatpush.msra.mxu2 %v8876_v29  ;;  %4381 = vmatpush.msra.mxu3 %v8877_v57  ;;  %v8886_v29 = vld [vmem:[#allocation24_spill] sm:$0xff] }
 0x395   :  { %4437 = vmatpush.msrb.mxu1 %v8871_v50  ;;  %4281 = vmatpush.msra.mxu0 %v8877_v57  ;;  %v8887_v50 = vld [vmem:[#allocation36_spill] sm:$0xff] }
 0x396   :  { %4482 = vmatpush.msrb.mxu2 %v7112_v10  ;;  %4383 = vmatpush.msra.mxu3 %v8878_v40 }
 0x397   :  { %4439 = vmatpush.msrb.mxu1 %v8874_v44  ;;  %4283 = vmatpush.msra.mxu0 %v8878_v40 }
 0x398   :  { %4484 = vmatpush.msrb.mxu2 %v7114_v11  ;;  %4515 = vmatpush.msrb.mxu3 %v8879_v37  ;;  %v8885_v37 = vld [vmem:[#allocation22_spill] sm:$0xff] }
 0x399   :  { %4441 = vmatpush.msrb.mxu1 %v8877_v57  ;;  %4406 = vmatpush.msrb.mxu0 %v8881_v41 }
 0x39a   :  { %4486 = vmatpush.msrb.mxu2 %v7127_v17  ;;  %4521 = vmatpush.msrb.mxu3 %v8880_v31 }
 0x39b   :  { %4443 = vmatpush.msrb.mxu1 %v8878_v40  ;;  %4410 = vmatpush.msrb.mxu0 %v8883_v6  ;;  %v8888_v6 = vld [vmem:[#allocation23_spill] sm:$0xff] }
 0x39c   :  { %4488 = vmatpush.msrb.mxu2 %v7138_v21  ;;  %4527 = vmatpush.msrb.mxu3 %v8882_v52 }
 0x39d   :  { %4414 = vmatpush.msrb.mxu0 %v8885_v37 }
 0x39e   :  { %4533 = vmatpush.msrb.mxu3 %v8884_v14 }
 0x39f   :  { %4418 = vmatpush.msrb.mxu0 %v8886_v29 }
 0x3ac   :  { %v3429_v40 = vpop.permute.xlu2 %3428 }
 0x3ad   :  { %v3431_v22 = vmul.f32 %v8887_v50, %v3429_v40 }
 0x3af   :  { %v3432_v18 = vadd.f32 %v8888_v6, %v3431_v22 }
 0x3dd   :  { %v3509_v57 = vpop.f32.mrf.mxu1 }
 0x3e5   :  { %v3468_v3 = vpop.f32.mrf.mxu0  ;;  %v3539_v44 = vpop.f32.mrf.mxu2 }
 0x3e6   :  { %v3510_v31 = vadd.f32 %v3509_v57, %v3468_v3  ;;  %v3624_v27 = vpop.f32.mrf.mxu1  ;;  %v8889_v57 = vld [vmem:[#allocation34_spill] sm:$0xff] }
 0x3e7   :  { %v3566_v41 = vpop.f32.mrf.mxu3  ;;  %v3433_v16 = vmul.f32 %v8889_v57, %v3429_v40 }
 0x3e8   :  { %v3540_v25 = vadd.f32 %v3539_v44, %v3510_v31 }
 0x3ea   :  { %v3567_v58 = vadd.f32 %v3566_v41, %v3540_v25  ;;  %v8890_v41 = vld [vmem:[#allocation25_spill] sm:$0xff] }
 0x3eb   :  { %v3434_v38 = vadd.f32 %v8890_v41, %v3433_v16 }
 0x3ed   :  { %v3599_v52 = vpop.f32.mrf.mxu0  ;;  %v3673_v15 = vpop.f32.mrf.mxu2 }
 0x3ee   :  { %v3600_v14 = vadd.f32 %v3599_v52, %v3567_v58  ;;  %v3771_v8 = vpop.f32.mrf.mxu1 }
 0x3ef   :  { %v3714_v34 = vpop.f32.mrf.mxu3 }
 0x3f0   :  { %v3625_v37 = vadd.f32 %v3624_v27, %v3600_v14  ;;  %v3715_v5 = vadd.f32 %v3714_v34, %v3673_v15 }
 0x3f2   :  { %v3627_v29 = vadd.f32 %v3625_v37, %v3432_v18 }
 0x3f4   :  { %v6749_v4 = vmul.f32 -1.442695, %v3627_v29 }
 0x3f5   :  { %v3744_v45 = vpop.f32.mrf.mxu0  ;;  %v3804_v3 = vpop.f32.mrf.mxu2 }
 0x3f6   :  { %6861 = vpow2.f32 %v6749_v4  ;;  %v3745_v44 = vadd.f32 %v3744_v45, %v3715_v5  ;;  %v3919_v30 = vpop.f32.mrf.mxu1  ;;  %v8891_v45 = vld [vmem:[#allocation47_spill] sm:$0xff] }
 0x3f7   :  { %v3829_v31 = vpop.f32.mrf.mxu3  ;;  %v3437_v5 = vmul.f32 %v8891_v45, %v3429_v40 }
 0x3f8   :  { %v3772_v50 = vadd.f32 %v3771_v8, %v3745_v44  ;;  %v8892_v44 = vld [vmem:[#allocation48_spill] sm:$0xff] }
 0x3fa   :  { %v3805_v25 = vadd.f32 %v3804_v3, %v3772_v50 }
 0x3fc   :  { %v6862_v22 = vpop.eup %6861  ;;  %v3830_v58 = vadd.f32 %v3829_v31, %v3805_v25  ;;  %v3438_v31 = vadd.f32 %v8892_v44, %v3437_v5  ;;  %v8893_v44 = vld [vmem:[#allocation49_spill] sm:$0xff] }
 0x3fd   :  { %v8118_v52 = vadd.f32 1.0, %v6862_v22  ;;  %v3878_v27 = vpop.f32.mrf.mxu0  ;;  %v3949_v18 = vpop.f32.mrf.mxu2 }
 0x3fe   :  { %v3832_v29 = vadd.f32 %v3830_v58, %v3434_v38  ;;  %v3920_v34 = vadd.f32 %v3919_v30, %v3878_v27  ;;  %v4034_v8 = vpop.f32.mrf.mxu1 }
 0x3ff   :  { %v3976_v15 = vpop.f32.mrf.mxu3  ;;  %6863 = vrcp.f32 %v8118_v52  ;;  %vm3637_vm7 = vweird.f32 %v8118_v52 }
 0x400   :  { %v6750_v37 = vmul.f32 -1.442695, %v3832_v29  ;;  %v3950_v6 = vadd.f32 %v3949_v18, %v3920_v34 }
 0x402   :  { %6865 = vpow2.f32 %v6750_v37  ;;  %v3977_v4 = vadd.f32 %v3976_v15, %v3950_v6  ;;  %v3435_v37 = vmul.f32 %v7972_v23, %v3429_v40 }
 0x404   :  { %v3436_v45 = vadd.f32 %v8893_v44, %v3435_v37 }
 0x405   :  { %v4009_v16 = vpop.f32.mrf.mxu0  ;;  %v6864_v14 = vpop.eup %6863 }
 0x406   :  { %v4010_v50 = vadd.f32 %v4009_v16, %v3977_v4  ;;  %v4083_v3 = vpop.f32.mrf.mxu2  ;;  %v3633_v22 = vmul.f32 %v6864_v14, %v8118_v52  ;;  %v4181_v15 = vpop.f32.mrf.mxu1  ;;  %vm3638_vm4 = vweird.f32 %v6864_v14 }
 0x407   :  { %v4124_v30 = vpop.f32.mrf.mxu3  ;;  %vm3639_vm8 = vmor %vm3637_vm7, %vm3638_vm4 }
 0x408   :  { %v6866_v57 = vpop.eup %6865  ;;  %v4035_v25 = vadd.f32 %v4034_v8, %v4010_v50  ;;  %v4125_v27 = vadd.f32 %v4124_v30, %v4083_v3  ;;  %v3634_v34 = vsub.f32 1.0, %v3633_v22 }
 0x409   :  { %v3836_v38 = vadd.f32 1.0, %v6866_v57 }
 0x40a   :  { %v4037_v41 = vadd.f32 %v4035_v25, %v3438_v31  ;;  %v3635_v50 = vmul.f32 %v6864_v14, %v3634_v34  ;;  %v3641_v34 = vand.u32 2147483647, %v8118_v52 }
 0x40b   :  { %6867 = vrcp.f32 %v3836_v38  ;;  %v3846_v40 = vand.u32 2147483647, %v3836_v38  ;;  %vm3842_vm5 = vweird.f32 %v3836_v38 }
 0x40c   :  { %v6751_v58 = vmul.f32 -1.442695, %v4037_v41  ;;  %vm3642_vm10 = vcmp.eq.f32.partialorder %v3641_v34, 8.507059e+37 }
 0x40d   :  { %v4154_v18 = vpop.f32.mrf.mxu0  ;;  %vm3847_vm9 = vcmp.eq.f32.partialorder %v3846_v40, 8.507059e+37 }
 0x40e   :  { %6869 = vpow2.f32 %v6751_v58  ;;  %v4155_v29 = vadd.f32 %v4154_v18, %v4125_v27  ;;  %v4214_v16 = vpop.f32.mrf.mxu2  ;;  %v3848_v58 = vand.u32 2147483648, %v3836_v38  ;;  %v3636_v27 = vadd.f32 %v6864_v14, %v3635_v50 }
 0x40f   :  { %v3643_v18 = vand.u32 2147483648, %v8118_v52 }
 0x410   :  { %v4182_v6 = vadd.f32 %v4181_v15, %v4155_v29  ;;  %v4239_v57 = vpop.f32.mrf.mxu3  ;;  %v3849_v15 = vor.u32 1.1754944e-38, %v3848_v58 }
 0x411   :  { %v6868_v4 = vpop.eup %6867 }
 0x412   :  { %v3838_v5 = vmul.f32 %v6868_v4, %v3836_v38  ;;  %v4215_v8 = vadd.f32 %v4214_v16, %v4182_v6  ;;  %vm3843_vm3 = vweird.f32 %v6868_v4  ;;  %v3640_v6 = vsel %vm3639_vm8, %v6864_v14, %v3636_v27 }
 0x413   :  { %vm3844_vm6 = vmor %vm3842_vm5, %vm3843_vm3 }
 0x414   :  { %v6870_v31 = vpop.eup %6869  ;;  %v3839_v25 = vsub.f32 1.0, %v3838_v5  ;;  %v4240_v41 = vadd.f32 %v4239_v57, %v4215_v8 }
 0x415   :  { %v4041_v3 = vadd.f32 1.0, %v6870_v31 }
 0x416   :  { %v3840_v30 = vmul.f32 %v6868_v4, %v3839_v25  ;;  %v4242_v22 = vadd.f32 %v4240_v41, %v3436_v45  ;;  %v3644_v45 = vor.u32 1.1754944e-38, %v3643_v18 }
 0x417   :  { %6871 = vrcp.f32 %v4041_v3  ;;  %v4053_v52 = vand.u32 2147483648, %v4041_v3  ;;  %vm4047_vm13 = vweird.f32 %v4041_v3 }
 0x418   :  { %v3841_v29 = vadd.f32 %v6868_v4, %v3840_v30  ;;  %6873 = vtanh.f32 %v4242_v22  ;;  %v3645_v50 = vsel %vm3642_vm10, %v3644_v45, %v3640_v6  ;;  %v8894_v6 = vld [vmem:[#allocation42_spill] sm:$0xff]  ;;  %v8895_v45 = vld [vmem:[#allocation40_spill] sm:$0xff] }
 0x419   :  { %v4054_v22 = vor.u32 1.1754944e-38, %v4053_v52  ;;  %v8904_v52 = vld [vmem:[#allocation16_spill] sm:$0xff] }
 0x41a   :  { %v3845_v37 = vsel %vm3844_vm6, %v6868_v4, %v3841_v29  ;;  %v4051_v4 = vand.u32 2147483647, %v4041_v3 }
 0x41b   :  { %v3850_v16 = vsel %vm3847_vm9, %v3849_v15, %v3845_v37 }
 0x41c   :  { %v4244_v57 = vmul.f32 %v3850_v16, %v7983_v24  ;;  %vm4052_vm15 = vcmp.eq.f32.partialorder %v4051_v4, 8.507059e+37  ;;  %v8896_v16 = vld [vmem:[#allocation44_spill] sm:$0xff]  ;;  %v8906_v4 = vld [vmem:[#allocation17_spill] sm:$0xff] }
 0x41d   :  { %v6872_v5 = vpop.eup %6871 }
 0x41e   :  { %v6874_v8 = vpop.eup %6873  ;;  %v4043_v38 = vmul.f32 %v6872_v5, %v4041_v3  ;;  %vm4048_vm11 = vweird.f32 %v6872_v5 }
 0x41f   :  { %v4245_v31 = vmul.f32 %v6874_v8, %v3645_v50  ;;  %vm4049_vm14 = vmor %vm4047_vm13, %vm4048_vm11  ;;  %v8898_v8 = vld [vmem:[#allocation45_spill] sm:$0xff]  ;;  %v7059_v50 = vmov 5  }
 0x420   :  { %v4044_v25 = vsub.f32 1.0, %v4043_v38  ;;  %v8899_v38 = vld [vmem:[#allocation39_spill] sm:$0xff]  ;;  %6783 = vset.pattern.permute.xlu2 %v7059_v50  ;;  %v8918_v50 = vld [vmem:[#allocation32_spill] sm:$0xff] }
 0x421   :  { %v8130_v41 = vadd.f32 %v4245_v31, %v4244_v57  ;;  %v8900_v57 = vld [vmem:[#allocation41_spill] sm:$0xff]  ;;  %v8226_v31 = vld [vmem:[#allocation2] sm:$0x3] }
 0x422   :  { %v4045_v30 = vmul.f32 %v6872_v5, %v4044_v25  ;;  %8901 = vst [vmem:[#allocation52_spill] sm:$0xff] %v8226_v31  ;;  %4250 = vperm.xlu2 %6783, %v8226_v31   ;;  %v8902_v25 = vld [vmem:[#allocation26_spill] sm:$0xff] }
 0x423   :  { %6875 = vtanh.f32 %v8130_v41 }
 0x424   :  { %v4046_v14 = vadd.f32 %v6872_v5, %v4045_v30  ;;  %v8903_v30 = vld [vmem:[#allocation43_spill] sm:$0xff] }
 0x426   :  { %v4050_v58 = vsel %vm4049_vm14, %v6872_v5, %v4046_v14  ;;  %v8897_v5 = vld [vmem:[#allocation37_spill] sm:$0xff]  ;;  %v8905_v14 = vld [vmem:[#allocation27_spill] sm:$0xff] }
 0x427   :  { %v4055_v40 = vsel %vm4052_vm15, %v4054_v22, %v4050_v58  ;;  %v8907_v58 = vld [vmem:[#allocation12_spill] sm:$0xff]  ;;  %v8908_v22 = vld [vmem:[#allocation29_spill] sm:$0xff] }
 0x429   :  { %v6876_v27 = vpop.eup %6875 }
 0x42a   :  { %v4248_v18 = vmul.f32 %v6876_v27, %v4055_v40  ;;  %v8909_v27 = vld [vmem:[#allocation18_spill] sm:$0xff]  ;;  %v8910_v40 = vld [vmem:[#allocation13_spill] sm:$0xff] }
 0x42c   :  { %v4262_v24 = vsel %vm150_vm12, %v4248_v18, 0  ;;  %v8911_v18 = vld [vmem:[#allocation31_spill] sm:$0xff] }
 0x42d   :  { %v8134_v29 = vand.u32 4294901760, %v4262_v24 }
 0x42f   :  { %4330 = vmatmul.f32.vlgmr.msra.gmra.mxu1 %v8134_v29  ;;  %v8138_v34 = vsub.f32 %v4262_v24, %v8134_v29  ;;  %v8912_v24 = vld [vmem:[#allocation19_spill] sm:$0xff] }
 0x430   :  { %4582 = vmatpush.msra.mxu1 %v7112_v10 }
 0x431   :  { %4360 = vmatmul.f32.vlgmr.msra.gmra.mxu2 %v8138_v34  ;;  %v8143_v3 = vand.u32 4294901760, %v8138_v34 }
 0x432   :  { %4584 = vmatpush.msra.mxu1 %v7114_v11  ;;  %4611 = vmatpush.msra.mxu2 %v7156_v26 }
 0x433   :  { %4387 = vmatmul.f32.vlgmr.msra.gmra.mxu3 %v8143_v3  ;;  %v4287_v15 = vsub.f32 %v8138_v34, %v8143_v3 }
 0x434   :  { %4586 = vmatpush.msra.mxu1 %v7127_v17  ;;  %4615 = vmatpush.msra.mxu2 %v7162_v28 }
 0x435   :  { %v4288_v37 = vand.u32 4294901760, %v4287_v15  ;;  %4642 = vmatpush.msra.mxu3 %v7112_v10  ;;  %v8916_v15 = vld [vmem:[#allocation30_spill] sm:$0xff] }
 0x436   :  { %4588 = vmatpush.msra.mxu1 %v7138_v21  ;;  %4619 = vmatpush.msra.mxu2 %v7176_v33 }
 0x437   :  { %4289 = vmatmul.f32.vlgmr.msra.gmra.mxu0 %v4288_v37  ;;  %4445 = vmatmul.f32.vlgmr.msrb.gmra.mxu1 %v8134_v29 }
 0x438   :  { %4644 = vmatpush.msra.mxu3 %v7114_v11  ;;  %4553 = vmatpush.msra.mxu0 %v7133_v19 }
 0x439   :  { %4494 = vmatmul.f32.vlgmr.msrb.gmra.mxu2 %v4288_v37  ;;  %4720 = vmatpush.msrb.mxu1 %v7318_v46 }
 0x43a   :  { %4623 = vmatpush.msra.mxu2 %v7192_v39  ;;  %4646 = vmatpush.msra.mxu3 %v7127_v17 }
 0x43b   :  { %4535 = vmatmul.f32.vlgmr.msrb.gmra.mxu3 %v8134_v29  ;;  %4556 = vmatpush.msra.mxu0 %v7136_v20 }
 0x43c   :  { %4648 = vmatpush.msra.mxu3 %v7138_v21  ;;  %4726 = vmatpush.msrb.mxu1 %v7333_v59 }
 0x43d   :  { %4758 = vmatpush.msrb.mxu2 %v7243_v54  ;;  %4559 = vmatpush.msra.mxu0 %v8756_v49 }
 0x43e   :  { %4732 = vmatpush.msrb.mxu1 %v7346_v56  ;;  %4787 = vmatpush.msrb.mxu3 %v7230_v51 }
 0x43f   :  { %4420 = vmatmul.f32.vlgmr.msrb.gmra.mxu0 %v8134_v29  ;;  %4592 = vmatmul.f32.vlgmr.msra.gmra.mxu1 %v8143_v3 }
 0x440   :  { %4761 = vmatpush.msrb.mxu2 %v8757_v47  ;;  %4562 = vmatpush.msra.mxu0 %v8758_v36 }
 0x441   :  { %4625 = vmatmul.f32.vlgmr.msra.gmra.mxu2 %v8134_v29  ;;  %4738 = vmatpush.msrb.mxu1 %v7361_v63 }
 0x442   :  { %4764 = vmatpush.msrb.mxu2 %v8759_v9  ;;  %4789 = vmatpush.msrb.mxu3 %v7236_v53 }
 0x443   :  { %4650 = vmatmul.f32.vlgmr.msra.gmra.mxu3 %v8134_v29  ;;  %4687 = vmatpush.msrb.mxu0 %v7230_v51 }
 0x444   :  { %4767 = vmatpush.msrb.mxu2 %v8760_v43  ;;  %4791 = vmatpush.msrb.mxu3 %v7245_v55 }
 0x445   :  { %4847 = vmatpush.msra.mxu1 %v7230_v51  ;;  %4689 = vmatpush.msrb.mxu0 %v7236_v53 }
 0x446   :  { %4793 = vmatpush.msrb.mxu3 %v7256_v60  ;;  %4892 = vmatpush.msra.mxu2 %v7258_v61 }
 0x447   :  { %4565 = vmatmul.f32.vlgmr.msra.gmra.mxu0 %v8138_v34  ;;  %4740 = vmatmul.f32.vlgmr.msrb.gmra.mxu1 %v8134_v29 }
 0x448   :  { %4849 = vmatpush.msra.mxu1 %v7236_v53  ;;  %4691 = vmatpush.msrb.mxu0 %v7245_v55 }
 0x449   :  { %4770 = vmatmul.f32.vlgmr.msrb.gmra.mxu2 %v8138_v34  ;;  %4925 = vmatpush.msra.mxu3 %v7359_v48 }
 0x44a   :  { %4851 = vmatpush.msra.mxu1 %v7245_v55  ;;  %4894 = vmatpush.msra.mxu2 %v7270_v1 }
 0x44b   :  { %4797 = vmatmul.f32.vlgmr.msrb.gmra.mxu3 %v8143_v3  ;;  %4693 = vmatpush.msrb.mxu0 %v7256_v60 }
 0x44c   :  { %4853 = vmatpush.msra.mxu1 %v7256_v60  ;;  %4896 = vmatpush.msra.mxu2 %v7285_v12 }
 0x44d   :  { %4931 = vmatpush.msra.mxu3 %v7369_v7  ;;  %4816 = vmatpush.msra.mxu0 %v7263_v62 }
 0x44e   :  { %4898 = vmatpush.msra.mxu2 %v7299_v32  ;;  %4992 = vmatpush.msrb.mxu1 %v7258_v61 }
 0x44f   :  { %4699 = vmatmul.f32.vlgmr.msrb.gmra.mxu0 %v4288_v37  ;;  %4855 = vmatmul.f32.vlgmr.msra.gmra.mxu1 %v8134_v29 }
 0x450   :  { %4937 = vmatpush.msra.mxu3 %v7377_v0  ;;  %4820 = vmatpush.msra.mxu0 %v7275_v2 }
 0x451   :  { %4904 = vmatmul.f32.vlgmr.msra.gmra.mxu2 %v4288_v37  ;;  %4994 = vmatpush.msrb.mxu1 %v7270_v1  ;;  %v8917_v37 = vld [vmem:[#allocation20_spill] sm:$0xff] }
 0x452   :  { %4943 = vmatpush.msra.mxu3 %v7383_v13  ;;  %5021 = vmatpush.msrb.mxu2 %v7308_v35 }
 0x453   :  { %4824 = vmatpush.msra.mxu0 %v8790_v42  ;;  %4945 = vmatmul.f32.vlgmr.msra.gmra.mxu3 %v8134_v29 }
 0x454   :  { %4996 = vmatpush.msrb.mxu1 %v7285_v12  ;;  %5025 = vmatpush.msrb.mxu2 %v8894_v6 }
 0x455   :  { %5052 = vmatpush.msrb.mxu3 %v7258_v61  ;;  %4828 = vmatpush.msra.mxu0 %v8895_v45 }
 0x456   :  { %4998 = vmatpush.msrb.mxu1 %v7299_v32  ;;  %5029 = vmatpush.msrb.mxu2 %v8896_v16 }
 0x457   :  { %5054 = vmatpush.msrb.mxu3 %v7270_v1  ;;  %4830 = vmatmul.f32.vlgmr.msra.gmra.mxu0 %v8134_v29 }
 0x458   :  { %4963 = vmatpush.msrb.mxu0 %v8897_v5  ;;  %5002 = vmatmul.f32.vlgmr.msrb.gmra.mxu1 %v8143_v3  ;;  %v8915_v3 = vld [vmem:[#allocation28_spill] sm:$0xff] }
 0x459   :  { %5033 = vmatpush.msrb.mxu2 %v8898_v8  ;;  %5056 = vmatpush.msrb.mxu3 %v7285_v12 }
 0x45a   :  { %4966 = vmatpush.msrb.mxu0 %v8899_v38  ;;  %5035 = vmatmul.f32.vlgmr.msrb.gmra.mxu2 %v8134_v29 }
 0x45b   :  { %5058 = vmatpush.msrb.mxu3 %v7299_v32  ;;  %5132 = vmatpush.msra.mxu1 %v8902_v25 }
 0x45c   :  { %4969 = vmatpush.msrb.mxu0 %v8900_v57  ;;  %5060 = vmatmul.f32.vlgmr.msrb.gmra.mxu3 %v8134_v29  ;;  %v8913_v29 = vld [vmem:[#allocation14_spill] sm:$0xff] }
 0x45d   :  { %5170 = vmatpush.msra.mxu2 %v8904_v52  ;;  %5138 = vmatpush.msra.mxu1 %v8905_v14 }
 0x45e   :  { %4972 = vmatpush.msrb.mxu0 %v8903_v30  ;;  %5199 = vmatpush.msra.mxu3 %v8907_v58  ;;  %v8923_v30 = vld [vmem:[#allocation36_spill] sm:$0xff] }
 0x45f   :  { %4975 = vmatmul.f32.vlgmr.msrb.gmra.mxu0 %v8138_v34  ;;  %5173 = vmatpush.msra.mxu2 %v8906_v4  ;;  %v8914_v34 = vld [vmem:[#allocation15_spill] sm:$0xff] }
 0x460   :  { %5144 = vmatpush.msra.mxu1 %v8908_v22  ;;  %5099 = vmatpush.msra.mxu0 %v8907_v58 }
 0x461   :  { %5176 = vmatpush.msra.mxu2 %v8909_v27  ;;  %5201 = vmatpush.msra.mxu3 %v8910_v40  ;;  %v8920_v27 = vld [vmem:[#allocation33_spill] sm:$0xff] }
 0x462   :  { %5150 = vmatpush.msra.mxu1 %v8911_v18  ;;  %5101 = vmatpush.msra.mxu0 %v8910_v40  ;;  %v8922_v18 = vld [vmem:[#allocation24_spill] sm:$0xff] }
 0x463   :  { %5179 = vmatpush.msra.mxu2 %v8912_v24  ;;  %5203 = vmatpush.msra.mxu3 %v8913_v29  ;;  %v8919_v24 = vld [vmem:[#allocation21_spill] sm:$0xff] }
 0x464   :  { %5259 = vmatpush.msrb.mxu1 %v8907_v58  ;;  %5103 = vmatpush.msra.mxu0 %v8913_v29 }
 0x465   :  { %5304 = vmatpush.msrb.mxu2 %v7112_v10  ;;  %5205 = vmatpush.msra.mxu3 %v8914_v34 }
 0x466   :  { %5261 = vmatpush.msrb.mxu1 %v8910_v40  ;;  %5105 = vmatpush.msra.mxu0 %v8914_v34 }
 0x467   :  { %5306 = vmatpush.msrb.mxu2 %v7114_v11  ;;  %5337 = vmatpush.msrb.mxu3 %v8915_v3  ;;  %v8921_v3 = vld [vmem:[#allocation22_spill] sm:$0xff] }
 0x468   :  { %5263 = vmatpush.msrb.mxu1 %v8913_v29  ;;  %5228 = vmatpush.msrb.mxu0 %v8917_v37 }
 0x469   :  { %5308 = vmatpush.msrb.mxu2 %v7127_v17  ;;  %5343 = vmatpush.msrb.mxu3 %v8916_v15 }
 0x46a   :  { %5265 = vmatpush.msrb.mxu1 %v8914_v34  ;;  %5232 = vmatpush.msrb.mxu0 %v8919_v24  ;;  %v8264_v24 = vld [vmem:[#allocation4] ss:$0 sm:$0xff] }
 0x46b   :  { %5310 = vmatpush.msrb.mxu2 %v7138_v21  ;;  %5349 = vmatpush.msrb.mxu3 %v8918_v50  ;;  %8924 = vst [vmem:[#allocation46_spill] sm:$0xff] %v8264_v24 }
 0x46c   :  { %5236 = vmatpush.msrb.mxu0 %v8921_v3 }
 0x46d   :  { %5355 = vmatpush.msrb.mxu3 %v8920_v27 }
 0x46e   :  { %5240 = vmatpush.msrb.mxu0 %v8922_v18 }
 0x47c   :  { %v4251_v34 = vpop.permute.xlu2 %4250 }
 0x47d   :  { %v4253_v52 = vmul.f32 %v8923_v30, %v4251_v34  ;;  %v8270_v30 = vld [vmem:[%s8579_s1 + $0x1] ss:$0 sm:$0xff] }
 0x47e   :  { %8925 = vst [vmem:[#allocation50_spill] sm:$0xff] %v8270_v30 }
 0x47f   :  { %v4254_v27 = vadd.f32 %v8264_v24, %v4253_v52 }
 0x4ac   :  { %v4331_v29 = vpop.f32.mrf.mxu1 }
 0x4b4   :  { %v4290_v40 = vpop.f32.mrf.mxu0  ;;  %v4361_v4 = vpop.f32.mrf.mxu2 }
 0x4b5   :  { %v4332_v15 = vadd.f32 %v4331_v29, %v4290_v40  ;;  %v4446_v22 = vpop.f32.mrf.mxu1 }
 0x4b6   :  { %v4388_v37 = vpop.f32.mrf.mxu3 }
 0x4b7   :  { %v4362_v58 = vadd.f32 %v4361_v4, %v4332_v15  ;;  %v4255_v4 = vmul.f32 %v8270_v30, %v4251_v34 }
 0x4b9   :  { %v4389_v14 = vadd.f32 %v4388_v37, %v4362_v58  ;;  %v8273_v37 = vld [vmem:[#allocation4 + $0x1] ss:$0 sm:$0xff] }
 0x4ba   :  { %8926 = vst [vmem:[#allocation51_spill] sm:$0xff] %v8273_v37 }
 0x4bc   :  { %v4421_v50 = vpop.f32.mrf.mxu0  ;;  %v4495_v57 = vpop.f32.mrf.mxu2 }
 0x4bd   :  { %v4422_v3 = vadd.f32 %v4421_v50, %v4389_v14  ;;  %v4593_v38 = vpop.f32.mrf.mxu1 }
 0x4be   :  { %v4536_v25 = vpop.f32.mrf.mxu3 }
 0x4bf   :  { %v4447_v18 = vadd.f32 %v4446_v22, %v4422_v3  ;;  %v4537_v40 = vadd.f32 %v4536_v25, %v4495_v57  ;;  %v4256_v22 = vadd.f32 %v8273_v37, %v4255_v4 }
 0x4c1   :  { %v4449_v8 = vadd.f32 %v4447_v18, %v4254_v27 }
 0x4c3   :  { %v6752_v5 = vmul.f32 -1.442695, %v4449_v8 }
 0x4c4   :  { %v4566_v29 = vpop.f32.mrf.mxu0  ;;  %v4626_v16 = vpop.f32.mrf.mxu2 }
 0x4c5   :  { %6877 = vpow2.f32 %v6752_v5  ;;  %v4567_v58 = vadd.f32 %v4566_v29, %v4537_v40  ;;  %v4741_v8 = vpop.f32.mrf.mxu1 }
 0x4c6   :  { %v4651_v15 = vpop.f32.mrf.mxu3 }
 0x4c7   :  { %v4594_v52 = vadd.f32 %v4593_v38, %v4567_v58 }
 0x4c9   :  { %v4627_v14 = vadd.f32 %v4626_v16, %v4594_v52  ;;  %v8927_v16 = vld [vmem:[#allocation47_spill] sm:$0xff] }
 0x4ca   :  { %v4259_v38 = vmul.f32 %v8927_v16, %v4251_v34  ;;  %v4257_v16 = vmul.f32 %v7972_v23, %v4251_v34 }
 0x4cb   :  { %v6878_v57 = vpop.eup %6877  ;;  %v4652_v25 = vadd.f32 %v4651_v15, %v4627_v14 }
 0x4cc   :  { %v8276_v27 = vadd.f32 1.0, %v6878_v57  ;;  %v4700_v18 = vpop.f32.mrf.mxu0  ;;  %v4771_v3 = vpop.f32.mrf.mxu2  ;;  %v8928_v57 = vld [vmem:[#allocation48_spill] sm:$0xff] }
 0x4cd   :  { %v4654_v50 = vadd.f32 %v4652_v25, %v4256_v22  ;;  %v4742_v24 = vadd.f32 %v4741_v8, %v4700_v18  ;;  %v4856_v29 = vpop.f32.mrf.mxu1  ;;  %v4260_v37 = vadd.f32 %v8928_v57, %v4259_v38  ;;  %v4258_v57 = vadd.f32 %v8893_v44, %v4257_v16 }
 0x4ce   :  { %v4798_v45 = vpop.f32.mrf.mxu3  ;;  %6879 = vrcp.f32 %v8276_v27  ;;  %v4465_v34 = vand.u32 2147483648, %v8276_v27  ;;  %vm4459_vm4 = vweird.f32 %v8276_v27  ;;  %v4463_v44 = vand.u32 2147483647, %v8276_v27 }
 0x4cf   :  { %v6753_v30 = vmul.f32 -1.442695, %v4654_v50  ;;  %v4772_v5 = vadd.f32 %v4771_v3, %v4742_v24 }
 0x4d0   :  { %vm4464_vm7 = vcmp.eq.f32.partialorder %v4463_v44, 8.507059e+37 }
 0x4d1   :  { %6881 = vpow2.f32 %v6753_v30  ;;  %v4799_v40 = vadd.f32 %v4798_v45, %v4772_v5 }
 0x4d4   :  { %v4831_v4 = vpop.f32.mrf.mxu0  ;;  %v6880_v52 = vpop.eup %6879 }
 0x4d5   :  { %v4832_v58 = vadd.f32 %v4831_v4, %v4799_v40  ;;  %v4905_v15 = vpop.f32.mrf.mxu2  ;;  %v4455_v24 = vmul.f32 %v6880_v52, %v8276_v27  ;;  %v5003_v5 = vpop.f32.mrf.mxu1  ;;  %vm4460_vm1 = vweird.f32 %v6880_v52 }
 0x4d6   :  { %v4946_v8 = vpop.f32.mrf.mxu3  ;;  %vm4461_vm5 = vmor %vm4459_vm4, %vm4460_vm1 }
 0x4d7   :  { %v6882_v14 = vpop.eup %6881  ;;  %v4857_v6 = vadd.f32 %v4856_v29, %v4832_v58  ;;  %v4947_v30 = vadd.f32 %v4946_v8, %v4905_v15  ;;  %v4456_v50 = vsub.f32 1.0, %v4455_v24 }
 0x4d8   :  { %v4658_v22 = vadd.f32 1.0, %v6882_v14 }
 0x4d9   :  { %v4859_v25 = vadd.f32 %v4857_v6, %v4260_v37  ;;  %v4457_v58 = vmul.f32 %v6880_v52, %v4456_v50 }
 0x4da   :  { %6883 = vrcp.f32 %v4658_v22  ;;  %v4668_v23 = vand.u32 2147483647, %v4658_v22  ;;  %vm4664_vm2 = vweird.f32 %v4658_v22 }
 0x4db   :  { %v6754_v18 = vmul.f32 -1.442695, %v4859_v25 }
 0x4dc   :  { %v4976_v3 = vpop.f32.mrf.mxu0  ;;  %vm4669_vm6 = vcmp.eq.f32.partialorder %v4668_v23, 8.507059e+37 }
 0x4dd   :  { %6885 = vpow2.f32 %v6754_v18  ;;  %v4977_v45 = vadd.f32 %v4976_v3, %v4947_v30  ;;  %v5036_v42 = vpop.f32.mrf.mxu2  ;;  %v4670_v18 = vand.u32 2147483648, %v4658_v22  ;;  %v4458_v30 = vadd.f32 %v6880_v52, %v4457_v58 }
 0x4df   :  { %v5004_v40 = vadd.f32 %v5003_v5, %v4977_v45  ;;  %v5061_v14 = vpop.f32.mrf.mxu3  ;;  %v4671_v3 = vor.u32 1.1754944e-38, %v4670_v18  ;;  %v4462_v50 = vsel %vm4461_vm5, %v6880_v52, %v4458_v30  ;;  %v4466_v5 = vor.u32 1.1754944e-38, %v4465_v34 }
 0x4e0   :  { %v6884_v4 = vpop.eup %6883  ;;  %v7060_v18 = vmov 6  }
 0x4e1   :  { %v4660_v38 = vmul.f32 %v6884_v4, %v4658_v22  ;;  %v5037_v29 = vadd.f32 %v5036_v42, %v5004_v40  ;;  %vm4665_vm0 = vweird.f32 %v6884_v4  ;;  %6784 = vset.pattern.permute.xlu1 %v7060_v18  ;;  %v8946_v18 = vld [vmem:[#allocation18_spill] sm:$0xff] }
 0x4e2   :  { %vm4666_vm3 = vmor %vm4664_vm2, %vm4665_vm0  ;;  %5072 = vperm.xlu1 %6784, %v8226_v31  }
 0x4e3   :  { %v6886_v6 = vpop.eup %6885  ;;  %v4661_v37 = vsub.f32 1.0, %v4660_v38  ;;  %v5062_v25 = vadd.f32 %v5061_v14, %v5037_v29  ;;  %v4467_v29 = vsel %vm4464_vm7, %v4466_v5, %v4462_v50  ;;  %v8930_v50 = vld [vmem:[#allocation42_spill] sm:$0xff]  ;;  %v8931_v5 = vld [vmem:[#allocation40_spill] sm:$0xff] }
 0x4e4   :  { %v4863_v15 = vadd.f32 1.0, %v6886_v6 }
 0x4e5   :  { %v4662_v8 = vmul.f32 %v6884_v4, %v4661_v37  ;;  %v5064_v24 = vadd.f32 %v5062_v25, %v4258_v57 }
 0x4e6   :  { %6887 = vrcp.f32 %v4863_v15  ;;  %v4875_v27 = vand.u32 2147483648, %v4863_v15  ;;  %vm4869_vm9 = vweird.f32 %v4863_v15 }
 0x4e7   :  { %v4663_v42 = vadd.f32 %v6884_v4, %v4662_v8  ;;  %6889 = vtanh.f32 %v5064_v24 }
 0x4e8   :  { %v4876_v8 = vor.u32 1.1754944e-38, %v4875_v27  ;;  %v8941_v27 = vld [vmem:[#allocation12_spill] sm:$0xff] }
 0x4e9   :  { %v4667_v45 = vsel %vm4666_vm3, %v6884_v4, %v4663_v42  ;;  %v4873_v4 = vand.u32 2147483647, %v4863_v15 }
 0x4ea   :  { %v4672_v16 = vsel %vm4669_vm6, %v4671_v3, %v4667_v45  ;;  %v8929_v45 = vld [vmem:[#allocation38_spill] sm:$0xff] }
 0x4eb   :  { %v5066_v58 = vmul.f32 %v4672_v16, %v8130_v41  ;;  %vm4874_vm11 = vcmp.eq.f32.partialorder %v4873_v4, 8.507059e+37  ;;  %v8932_v16 = vld [vmem:[#allocation44_spill] sm:$0xff]  ;;  %v8943_v4 = vld [vmem:[#allocation17_spill] sm:$0xff] }
 0x4ec   :  { %v6888_v40 = vpop.eup %6887 }
 0x4ed   :  { %v6890_v38 = vpop.eup %6889  ;;  %v4865_v22 = vmul.f32 %v6888_v40, %v4863_v15  ;;  %vm4870_vm8 = vweird.f32 %v6888_v40 }
 0x4ee   :  { %v5067_v14 = vmul.f32 %v6890_v38, %v4467_v29  ;;  %vm4871_vm10 = vmor %vm4869_vm9, %vm4870_vm8  ;;  %v8934_v38 = vld [vmem:[#allocation45_spill] sm:$0xff]  ;;  %v8936_v29 = vld [vmem:[#allocation26_spill] sm:$0xff] }
 0x4ef   :  { %v4866_v6 = vsub.f32 1.0, %v4865_v22  ;;  %v8935_v22 = vld [vmem:[#allocation39_spill] sm:$0xff] }
 0x4f0   :  { %v8288_v37 = vadd.f32 %v5067_v14, %v5066_v58  ;;  %v8937_v58 = vld [vmem:[#allocation41_spill] sm:$0xff]  ;;  %v8938_v14 = vld [vmem:[#allocation27_spill] sm:$0xff] }
 0x4f1   :  { %v4867_v57 = vmul.f32 %v6888_v40, %v4866_v6  ;;  %v8939_v6 = vld [vmem:[#allocation16_spill] sm:$0xff] }
 0x4f2   :  { %6891 = vtanh.f32 %v8288_v37 }
 0x4f3   :  { %v4868_v52 = vadd.f32 %v6888_v40, %v4867_v57  ;;  %v8940_v57 = vld [vmem:[#allocation43_spill] sm:$0xff] }
 0x4f5   :  { %v4872_v25 = vsel %vm4871_vm10, %v6888_v40, %v4868_v52  ;;  %v8933_v40 = vld [vmem:[#allocation37_spill] sm:$0xff] }
 0x4f6   :  { %v4877_v41 = vsel %vm4874_vm11, %v4876_v8, %v4872_v25  ;;  %v8942_v52 = vld [vmem:[#allocation29_spill] sm:$0xff]  ;;  %v8945_v8 = vld [vmem:[#allocation31_spill] sm:$0xff] }
 0x4f7   :  { %v8944_v25 = vld [vmem:[#allocation13_spill] sm:$0xff] }
 0x4f8   :  { %v6892_v24 = vpop.eup %6891 }
 0x4f9   :  { %v5070_v30 = vmul.f32 %v6892_v24, %v4877_v41  ;;  %v8947_v24 = vld [vmem:[#allocation14_spill] sm:$0xff]  ;;  %v8948_v41 = vld [vmem:[#allocation19_spill] sm:$0xff] }
 0x4fb   :  { %v5084_v23 = vsel %vm150_vm12, %v5070_v30, 0  ;;  %v8949_v30 = vld [vmem:[#allocation15_spill] sm:$0xff] }
 0x4fc   :  { %v8293_v34 = vand.u32 4294901760, %v5084_v23 }
 0x4fe   :  { %5152 = vmatmul.f32.vlgmr.msra.gmra.mxu1 %v8293_v34  ;;  %v8297_v42 = vsub.f32 %v5084_v23, %v8293_v34  ;;  %v8950_v23 = vld [vmem:[#allocation28_spill] sm:$0xff] }
 0x4ff   :  { %5404 = vmatpush.msra.mxu1 %v7112_v10 }
 0x500   :  { %5182 = vmatmul.f32.vlgmr.msra.gmra.mxu2 %v8297_v42  ;;  %v8302_v15 = vand.u32 4294901760, %v8297_v42 }
 0x501   :  { %5406 = vmatpush.msra.mxu1 %v7114_v11  ;;  %5433 = vmatpush.msra.mxu2 %v7156_v26 }
 0x502   :  { %5209 = vmatmul.f32.vlgmr.msra.gmra.mxu3 %v8302_v15  ;;  %v5109_v44 = vsub.f32 %v8297_v42, %v8302_v15 }
 0x503   :  { %5408 = vmatpush.msra.mxu1 %v7127_v17  ;;  %5437 = vmatpush.msra.mxu2 %v7162_v28 }
 0x504   :  { %v5110_v3 = vand.u32 4294901760, %v5109_v44  ;;  %5464 = vmatpush.msra.mxu3 %v7112_v10  ;;  %v8954_v44 = vld [vmem:[#allocation21_spill] sm:$0xff] }
 0x505   :  { %5410 = vmatpush.msra.mxu1 %v7138_v21  ;;  %5441 = vmatpush.msra.mxu2 %v7176_v33 }
 0x506   :  { %5111 = vmatmul.f32.vlgmr.msra.gmra.mxu0 %v5110_v3  ;;  %5267 = vmatmul.f32.vlgmr.msrb.gmra.mxu1 %v8293_v34 }
 0x507   :  { %5466 = vmatpush.msra.mxu3 %v7114_v11  ;;  %5375 = vmatpush.msra.mxu0 %v7133_v19 }
 0x508   :  { %5316 = vmatmul.f32.vlgmr.msrb.gmra.mxu2 %v5110_v3  ;;  %5542 = vmatpush.msrb.mxu1 %v7318_v46 }
 0x509   :  { %5445 = vmatpush.msra.mxu2 %v7192_v39  ;;  %5468 = vmatpush.msra.mxu3 %v7127_v17 }
 0x50a   :  { %5357 = vmatmul.f32.vlgmr.msrb.gmra.mxu3 %v8293_v34  ;;  %5378 = vmatpush.msra.mxu0 %v7136_v20 }
 0x50b   :  { %5470 = vmatpush.msra.mxu3 %v7138_v21  ;;  %5548 = vmatpush.msrb.mxu1 %v7333_v59 }
 0x50c   :  { %5580 = vmatpush.msrb.mxu2 %v7243_v54  ;;  %5381 = vmatpush.msra.mxu0 %v8756_v49 }
 0x50d   :  { %5554 = vmatpush.msrb.mxu1 %v7346_v56  ;;  %5609 = vmatpush.msrb.mxu3 %v7230_v51 }
 0x50e   :  { %5242 = vmatmul.f32.vlgmr.msrb.gmra.mxu0 %v8293_v34  ;;  %5414 = vmatmul.f32.vlgmr.msra.gmra.mxu1 %v8302_v15 }
 0x50f   :  { %5583 = vmatpush.msrb.mxu2 %v8757_v47  ;;  %5384 = vmatpush.msra.mxu0 %v8758_v36 }
 0x510   :  { %5447 = vmatmul.f32.vlgmr.msra.gmra.mxu2 %v8293_v34  ;;  %5560 = vmatpush.msrb.mxu1 %v7361_v63 }
 0x511   :  { %5586 = vmatpush.msrb.mxu2 %v8759_v9  ;;  %5611 = vmatpush.msrb.mxu3 %v7236_v53 }
 0x512   :  { %5472 = vmatmul.f32.vlgmr.msra.gmra.mxu3 %v8293_v34  ;;  %5509 = vmatpush.msrb.mxu0 %v7230_v51 }
 0x513   :  { %5589 = vmatpush.msrb.mxu2 %v8760_v43  ;;  %5613 = vmatpush.msrb.mxu3 %v7245_v55 }
 0x514   :  { %5669 = vmatpush.msra.mxu1 %v7230_v51  ;;  %5511 = vmatpush.msrb.mxu0 %v7236_v53 }
 0x515   :  { %5615 = vmatpush.msrb.mxu3 %v7256_v60  ;;  %5714 = vmatpush.msra.mxu2 %v7258_v61 }
 0x516   :  { %5387 = vmatmul.f32.vlgmr.msra.gmra.mxu0 %v8297_v42  ;;  %5562 = vmatmul.f32.vlgmr.msrb.gmra.mxu1 %v8293_v34 }
 0x517   :  { %5671 = vmatpush.msra.mxu1 %v7236_v53  ;;  %5513 = vmatpush.msrb.mxu0 %v7245_v55 }
 0x518   :  { %5592 = vmatmul.f32.vlgmr.msrb.gmra.mxu2 %v8297_v42  ;;  %5747 = vmatpush.msra.mxu3 %v7359_v48 }
 0x519   :  { %5673 = vmatpush.msra.mxu1 %v7245_v55  ;;  %5716 = vmatpush.msra.mxu2 %v7270_v1 }
 0x51a   :  { %5619 = vmatmul.f32.vlgmr.msrb.gmra.mxu3 %v8302_v15  ;;  %5515 = vmatpush.msrb.mxu0 %v7256_v60 }
 0x51b   :  { %5675 = vmatpush.msra.mxu1 %v7256_v60  ;;  %5718 = vmatpush.msra.mxu2 %v7285_v12 }
 0x51c   :  { %5753 = vmatpush.msra.mxu3 %v7369_v7  ;;  %5638 = vmatpush.msra.mxu0 %v7263_v62 }
 0x51d   :  { %5720 = vmatpush.msra.mxu2 %v7299_v32  ;;  %5814 = vmatpush.msrb.mxu1 %v7258_v61 }
 0x51e   :  { %5521 = vmatmul.f32.vlgmr.msrb.gmra.mxu0 %v5110_v3  ;;  %5677 = vmatmul.f32.vlgmr.msra.gmra.mxu1 %v8293_v34 }
 0x51f   :  { %5759 = vmatpush.msra.mxu3 %v7377_v0  ;;  %5642 = vmatpush.msra.mxu0 %v7275_v2 }
 0x520   :  { %5726 = vmatmul.f32.vlgmr.msra.gmra.mxu2 %v5110_v3  ;;  %5816 = vmatpush.msrb.mxu1 %v7270_v1  ;;  %v8955_v3 = vld [vmem:[#allocation33_spill] sm:$0xff] }
 0x521   :  { %5765 = vmatpush.msra.mxu3 %v7383_v13  ;;  %5843 = vmatpush.msrb.mxu2 %v7308_v35 }
 0x522   :  { %5646 = vmatpush.msra.mxu0 %v8929_v45  ;;  %5767 = vmatmul.f32.vlgmr.msra.gmra.mxu3 %v8293_v34 }
 0x523   :  { %5818 = vmatpush.msrb.mxu1 %v7285_v12  ;;  %5847 = vmatpush.msrb.mxu2 %v8930_v50 }
 0x524   :  { %5874 = vmatpush.msrb.mxu3 %v7258_v61  ;;  %5650 = vmatpush.msra.mxu0 %v8931_v5 }
 0x525   :  { %5820 = vmatpush.msrb.mxu1 %v7299_v32  ;;  %5851 = vmatpush.msrb.mxu2 %v8932_v16 }
 0x526   :  { %5876 = vmatpush.msrb.mxu3 %v7270_v1  ;;  %5652 = vmatmul.f32.vlgmr.msra.gmra.mxu0 %v8293_v34 }
 0x527   :  { %5785 = vmatpush.msrb.mxu0 %v8933_v40  ;;  %5824 = vmatmul.f32.vlgmr.msrb.gmra.mxu1 %v8302_v15  ;;  %v8953_v15 = vld [vmem:[#allocation32_spill] sm:$0xff]  ;;  %v8961_v40 = vld [vmem:[#allocation51_spill] sm:$0xff] }
 0x528   :  { %5855 = vmatpush.msrb.mxu2 %v8934_v38  ;;  %5878 = vmatpush.msrb.mxu3 %v7285_v12 }
 0x529   :  { %5788 = vmatpush.msrb.mxu0 %v8935_v22  ;;  %5857 = vmatmul.f32.vlgmr.msrb.gmra.mxu2 %v8293_v34 }
 0x52a   :  { %5880 = vmatpush.msrb.mxu3 %v7299_v32  ;;  %5954 = vmatpush.msra.mxu1 %v8936_v29  ;;  %v8956_v29 = vld [vmem:[#allocation22_spill] sm:$0xff] }
 0x52b   :  { %5791 = vmatpush.msrb.mxu0 %v8937_v58  ;;  %5882 = vmatmul.f32.vlgmr.msrb.gmra.mxu3 %v8293_v34  ;;  %v8951_v34 = vld [vmem:[#allocation30_spill] sm:$0xff] }
 0x52c   :  { %5960 = vmatpush.msra.mxu1 %v8938_v14  ;;  %5992 = vmatpush.msra.mxu2 %v8939_v6  ;;  %v8957_v14 = vld [vmem:[#allocation24_spill] sm:$0xff]  ;;  %v8960_v58 = vld [vmem:[#allocation50_spill] sm:$0xff] }
 0x52d   :  { %5794 = vmatpush.msrb.mxu0 %v8940_v57  ;;  %6021 = vmatpush.msra.mxu3 %v8941_v27 }
 0x52e   :  { %5797 = vmatmul.f32.vlgmr.msrb.gmra.mxu0 %v8297_v42  ;;  %5966 = vmatpush.msra.mxu1 %v8942_v52  ;;  %v8952_v42 = vld [vmem:[#allocation20_spill] sm:$0xff] }
 0x52f   :  { %5995 = vmatpush.msra.mxu2 %v8943_v4  ;;  %6023 = vmatpush.msra.mxu3 %v8944_v25 }
 0x530   :  { %5972 = vmatpush.msra.mxu1 %v8945_v8  ;;  %5921 = vmatpush.msra.mxu0 %v8941_v27 }
 0x531   :  { %5998 = vmatpush.msra.mxu2 %v8946_v18  ;;  %6025 = vmatpush.msra.mxu3 %v8947_v24 }
 0x532   :  { %6081 = vmatpush.msrb.mxu1 %v8941_v27  ;;  %5923 = vmatpush.msra.mxu0 %v8944_v25 }
 0x533   :  { %6001 = vmatpush.msra.mxu2 %v8948_v41  ;;  %6027 = vmatpush.msra.mxu3 %v8949_v30  ;;  %v8424_v41 = vld [vmem:[%s8579_s1] ss:$0 sm:$0xff] }
 0x534   :  { %6083 = vmatpush.msrb.mxu1 %v8944_v25  ;;  %5925 = vmatpush.msra.mxu0 %v8947_v24  ;;  %8958 = vst [vmem:[#allocation35_spill] sm:$0xff] %v8424_v41 }
 0x535   :  { %6126 = vmatpush.msrb.mxu2 %v7112_v10  ;;  %6159 = vmatpush.msrb.mxu3 %v8950_v23 }
 0x536   :  { %6085 = vmatpush.msrb.mxu1 %v8947_v24  ;;  %5927 = vmatpush.msra.mxu0 %v8949_v30 }
 0x537   :  { %6128 = vmatpush.msrb.mxu2 %v7114_v11  ;;  %6165 = vmatpush.msrb.mxu3 %v8951_v34 }
 0x538   :  { %6087 = vmatpush.msrb.mxu1 %v8949_v30  ;;  %6050 = vmatpush.msrb.mxu0 %v8952_v42 }
 0x539   :  { %6130 = vmatpush.msrb.mxu2 %v7127_v17  ;;  %6171 = vmatpush.msrb.mxu3 %v8953_v15  ;;  %v8959_v15 = vld [vmem:[#allocation46_spill] sm:$0xff] }
 0x53a   :  { %6054 = vmatpush.msrb.mxu0 %v8954_v44 }
 0x53b   :  { %6132 = vmatpush.msrb.mxu2 %v7138_v21  ;;  %6177 = vmatpush.msrb.mxu3 %v8955_v3 }
 0x53c   :  { %6058 = vmatpush.msrb.mxu0 %v8956_v29 }
 0x53e   :  { %6062 = vmatpush.msrb.mxu0 %v8957_v14 }
 0x554   :  { %v8419_v25 = vpop.permute.xlu1 %5072 }
 0x555   :  { %v5075_v30 = vmul.f32 %v8424_v41, %v8419_v25  ;;  %v5077_v22 = vmul.f32 %v8960_v58, %v8419_v25 }
 0x557   :  { %v5076_v44 = vadd.f32 %v8959_v15, %v5075_v30  ;;  %v5078_v16 = vadd.f32 %v8961_v40, %v5077_v22 }
 0x57b   :  { %v5153_v6 = vpop.f32.mrf.mxu1 }
 0x583   :  { %v5112_v27 = vpop.f32.mrf.mxu0  ;;  %v5183_v52 = vpop.f32.mrf.mxu2 }
 0x584   :  { %v5154_v4 = vadd.f32 %v5153_v6, %v5112_v27  ;;  %v5268_v8 = vpop.f32.mrf.mxu1 }
 0x585   :  { %v5210_v18 = vpop.f32.mrf.mxu3 }
 0x586   :  { %v5184_v24 = vadd.f32 %v5183_v52, %v5154_v4 }
 0x588   :  { %v5211_v23 = vadd.f32 %v5210_v18, %v5184_v24 }
 0x58b   :  { %v5243_v34 = vpop.f32.mrf.mxu0  ;;  %v5317_v42 = vpop.f32.mrf.mxu2 }
 0x58c   :  { %v5244_v3 = vadd.f32 %v5243_v34, %v5211_v23  ;;  %v5415_v6 = vpop.f32.mrf.mxu1 }
 0x58d   :  { %v5358_v29 = vpop.f32.mrf.mxu3 }
 0x58e   :  { %v5269_v14 = vadd.f32 %v5268_v8, %v5244_v3  ;;  %v5359_v52 = vadd.f32 %v5358_v29, %v5317_v42 }
 0x590   :  { %v5271_v27 = vadd.f32 %v5269_v14, %v5076_v44 }
 0x592   :  { %v6755_v57 = vmul.f32 -1.442695, %v5271_v27 }
 0x593   :  { %v5388_v4 = vpop.f32.mrf.mxu0  ;;  %v5448_v31 = vpop.f32.mrf.mxu2 }
 0x594   :  { %6893 = vpow2.f32 %v6755_v57  ;;  %v5389_v38 = vadd.f32 %v5388_v4, %v5359_v52  ;;  %v5563_v30 = vpop.f32.mrf.mxu1 }
 0x595   :  { %v5473_v41 = vpop.f32.mrf.mxu3 }
 0x596   :  { %v5416_v18 = vadd.f32 %v5415_v6, %v5389_v38 }
 0x598   :  { %v5449_v24 = vadd.f32 %v5448_v31, %v5416_v18  ;;  %v8438_v31 = vld [vmem:[%s8579_s1 + $0x3] ss:$0 sm:$0xff]  ;;  %v8442_v18 = vld [vmem:[#allocation4 + $0x3] ss:$0 sm:$0xff] }
 0x599   :  { %8962 = vst [vmem:[#allocation23_spill] sm:$0xff] %v8438_v31  ;;  %v5081_v38 = vmul.f32 %v8438_v31, %v8419_v25 }
 0x59a   :  { %v6894_v23 = vpop.eup %6893  ;;  %v5474_v34 = vadd.f32 %v5473_v41, %v5449_v24  ;;  %8963 = vst [vmem:[#allocation34_spill] sm:$0xff] %v8442_v18 }
 0x59b   :  { %v8432_v8 = vadd.f32 1.0, %v6894_v23  ;;  %v5522_v44 = vpop.f32.mrf.mxu0  ;;  %v5593_v3 = vpop.f32.mrf.mxu2  ;;  %v5082_v24 = vadd.f32 %v8442_v18, %v5081_v38 }
 0x59c   :  { %v5476_v42 = vadd.f32 %v5474_v34, %v5078_v16  ;;  %v5564_v29 = vadd.f32 %v5563_v30, %v5522_v44  ;;  %v5678_v57 = vpop.f32.mrf.mxu1 }
 0x59d   :  { %v5620_v14 = vpop.f32.mrf.mxu3  ;;  %6895 = vrcp.f32 %v8432_v8  ;;  %vm5281_vm1 = vweird.f32 %v8432_v8 }
 0x59e   :  { %v6756_v27 = vmul.f32 -1.442695, %v5476_v42  ;;  %v5594_v15 = vadd.f32 %v5593_v3, %v5564_v29 }
 0x5a0   :  { %6897 = vpow2.f32 %v6756_v27  ;;  %v5621_v22 = vadd.f32 %v5620_v14, %v5594_v15 }
 0x5a3   :  { %v5653_v41 = vpop.f32.mrf.mxu0  ;;  %v6896_v16 = vpop.eup %6895 }
 0x5a4   :  { %v5654_v6 = vadd.f32 %v5653_v41, %v5621_v22  ;;  %v5727_v52 = vpop.f32.mrf.mxu2  ;;  %v5277_v3 = vmul.f32 %v6896_v16, %v8432_v8  ;;  %v5825_v22 = vpop.f32.mrf.mxu1  ;;  %v8449_v41 = vld [vmem:[%s8579_s1 + $0x2] ss:$0 sm:$0xff]  ;;  %vm5282_vm14 = vweird.f32 %v6896_v16 }
 0x5a5   :  { %v5768_v34 = vpop.f32.mrf.mxu3  ;;  %v5079_v38 = vmul.f32 %v8449_v41, %v8419_v25  ;;  %vm5283_vm2 = vmor %vm5281_vm1, %vm5282_vm14 }
 0x5a6   :  { %v6898_v4 = vpop.eup %6897  ;;  %v5679_v30 = vadd.f32 %v5678_v57, %v5654_v6  ;;  %v5769_v29 = vadd.f32 %v5768_v34, %v5727_v52  ;;  %v5278_v27 = vsub.f32 1.0, %v5277_v3 }
 0x5a7   :  { %v5480_v23 = vadd.f32 1.0, %v6898_v4 }
 0x5a8   :  { %v5681_v44 = vadd.f32 %v5679_v30, %v5082_v24 }
 0x5a9   :  { %6899 = vrcp.f32 %v5480_v23  ;;  %v5492_v40 = vand.u32 2147483648, %v5480_v23  ;;  %vm5486_vm15 = vweird.f32 %v5480_v23 }
 0x5aa   :  { %v6757_v42 = vmul.f32 -1.442695, %v5681_v44  ;;  %v5279_v44 = vmul.f32 %v6896_v16, %v5278_v27  ;;  %v5287_v27 = vand.u32 2147483648, %v8432_v8 }
 0x5ab   :  { %v5798_v15 = vpop.f32.mrf.mxu0 }
 0x5ac   :  { %6901 = vpow2.f32 %v6757_v42  ;;  %v5799_v14 = vadd.f32 %v5798_v15, %v5769_v29  ;;  %v5858_v4 = vpop.f32.mrf.mxu2  ;;  %v8453_v29 = vld [vmem:[#allocation4 + $0x2] ss:$0 sm:$0xff]  ;;  %v5280_v25 = vadd.f32 %v6896_v16, %v5279_v44 }
 0x5ad   :  { %8964 = vst [vmem:[#allocation25_spill] sm:$0xff] %v8453_v29  ;;  %v5080_v3 = vadd.f32 %v8453_v29, %v5079_v38  ;;  %v5285_v38 = vand.u32 2147483647, %v8432_v8 }
 0x5ae   :  { %v5826_v57 = vadd.f32 %v5825_v22, %v5799_v14  ;;  %v5883_v52 = vpop.f32.mrf.mxu3  ;;  %v5490_v14 = vand.u32 2147483647, %v5480_v23 }
 0x5af   :  { %v6900_v6 = vpop.eup %6899  ;;  %vm5286_vm4 = vcmp.eq.f32.partialorder %v5285_v38, 8.507059e+37 }
 0x5b0   :  { %v5482_v24 = vmul.f32 %v6900_v6, %v5480_v23  ;;  %v5859_v30 = vadd.f32 %v5858_v4, %v5826_v57  ;;  %vm5487_vm13 = vweird.f32 %v6900_v6  ;;  %v5493_v57 = vor.u32 1.1754944e-38, %v5492_v40 }
 0x5b1   :  { %vm5488_vm0 = vmor %vm5486_vm15, %vm5487_vm13  ;;  %vm5491_vm3 = vcmp.eq.f32.partialorder %v5490_v14, 8.507059e+37 }
 0x5b2   :  { %v6902_v34 = vpop.eup %6901  ;;  %v5483_v42 = vsub.f32 1.0, %v5482_v24  ;;  %v5884_v15 = vadd.f32 %v5883_v52, %v5859_v30  ;;  %v5284_v24 = vsel %vm5283_vm2, %v6896_v16, %v5280_v25  ;;  %v5288_v30 = vor.u32 1.1754944e-38, %v5287_v27 }
 0x5b3   :  { %v5685_v18 = vadd.f32 1.0, %v6902_v34 }
 0x5b4   :  { %v5484_v31 = vmul.f32 %v6900_v6, %v5483_v42  ;;  %v5886_v58 = vadd.f32 %v5884_v15, %v5080_v3  ;;  %v5289_v42 = vsel %vm5286_vm4, %v5288_v30, %v5284_v24  ;;  %v8975_v24 = vld [vmem:[#allocation51_spill] sm:$0xff] }
 0x5b5   :  { %6903 = vrcp.f32 %v5685_v18  ;;  %v5697_v40 = vand.u32 2147483648, %v5685_v18  ;;  %vm5691_vm6 = vweird.f32 %v5685_v18  ;;  %v5695_v16 = vand.u32 2147483647, %v5685_v18 }
 0x5b6   :  { %v5485_v22 = vadd.f32 %v6900_v6, %v5484_v31  ;;  %6905 = vtanh.f32 %v5886_v58 }
 0x5b7   :  { %v5698_v25 = vor.u32 1.1754944e-38, %v5697_v40  ;;  %vm5696_vm8 = vcmp.eq.f32.partialorder %v5695_v16, 8.507059e+37 }
 0x5b8   :  { %v5489_v4 = vsel %vm5488_vm0, %v6900_v6, %v5485_v22 }
 0x5b9   :  { %v5494_v52 = vsel %vm5491_vm3, %v5493_v57, %v5489_v4 }
 0x5ba   :  { %v5888_v31 = vmul.f32 %v5494_v52, %v8288_v37 }
 0x5bb   :  { %v6904_v44 = vpop.eup %6903 }
 0x5bc   :  { %v6906_v34 = vpop.eup %6905  ;;  %v5687_v23 = vmul.f32 %v6904_v44, %v5685_v18  ;;  %vm5692_vm5 = vweird.f32 %v6904_v44 }
 0x5bd   :  { %v5889_v58 = vmul.f32 %v6906_v34, %v5289_v42  ;;  %vm5693_vm7 = vmor %vm5691_vm6, %vm5692_vm5  ;;  %vm6719_vm5 = vcmask 254976   ;;  %vm6725_vm6 = vcmask 1024  }
 0x5be   :  { %v5688_v3 = vsub.f32 1.0, %v5687_v23 }
 0x5bf   :  { %v8460_v15 = vadd.f32 %v5889_v58, %v5888_v31 }
 0x5c0   :  { %v5689_v29 = vmul.f32 %v6904_v44, %v5688_v3 }
 0x5c1   :  { %6907 = vtanh.f32 %v8460_v15 }
 0x5c2   :  { %v5690_v8 = vadd.f32 %v6904_v44, %v5689_v29 }
 0x5c4   :  { %v5694_v6 = vsel %vm5693_vm7, %v6904_v44, %v5690_v8 }
 0x5c5   :  { %v5699_v27 = vsel %vm5696_vm8, %v5698_v25, %v5694_v6  ;;  %v8976_v6 = vld [vmem:[#allocation23_spill] sm:$0xff] }
 0x5c7   :  { %v6908_v14 = vpop.eup %6907 }
 0x5c8   :  { %v5892_v22 = vmul.f32 %v6908_v14, %v5699_v27 }
 0x5ca   :  { %v5906_v37 = vsel %vm150_vm12, %v5892_v22, 0 }
 0x5cb   :  { %v8464_v38 = vand.u32 4294901760, %v5906_v37 }
 0x5cd   :  { %5974 = vmatmul.f32.vlgmr.msra.gmra.mxu1 %v8464_v38  ;;  %v8468_v57 = vsub.f32 %v5906_v37, %v8464_v38 }
 0x5ce   :  { %6226 = vmatpush.msra.mxu1 %v7112_v10 }
 0x5cf   :  { %6004 = vmatmul.f32.vlgmr.msra.gmra.mxu2 %v8468_v57  ;;  %v8473_v18 = vand.u32 4294901760, %v8468_v57 }
 0x5d0   :  { %6228 = vmatpush.msra.mxu1 %v7114_v11  ;;  %6255 = vmatpush.msra.mxu2 %v7156_v26  ;;  %v8970_v26 = vld [vmem:[#allocation52_spill] sm:$0xff] }
 0x5d1   :  { %6031 = vmatmul.f32.vlgmr.msra.gmra.mxu3 %v8473_v18  ;;  %v5931_v29 = vsub.f32 %v8468_v57, %v8473_v18 }
 0x5d2   :  { %6230 = vmatpush.msra.mxu1 %v7127_v17  ;;  %6259 = vmatpush.msra.mxu2 %v7162_v28  ;;  %v8971_v28 = vld [vmem:[#allocation43_spill] sm:$0xff] }
 0x5d3   :  { %v5932_v4 = vand.u32 4294901760, %v5931_v29  ;;  %6286 = vmatpush.msra.mxu3 %v7112_v10  ;;  %v8965_v10 = vld [vmem:[#allocation44_spill] sm:$0xff]  ;;  %v8977_v29 = vld [vmem:[#allocation34_spill] sm:$0xff] }
 0x5d4   :  { %6232 = vmatpush.msra.mxu1 %v7138_v21  ;;  %6263 = vmatpush.msra.mxu2 %v7176_v33 }
 0x5d5   :  { %5933 = vmatmul.f32.vlgmr.msra.gmra.mxu0 %v5932_v4  ;;  %6089 = vmatmul.f32.vlgmr.msrb.gmra.mxu1 %v8464_v38 }
 0x5d6   :  { %6288 = vmatpush.msra.mxu3 %v7114_v11  ;;  %6197 = vmatpush.msra.mxu0 %v7133_v19  ;;  %v8966_v11 = vld [vmem:[#allocation37_spill] sm:$0xff]  ;;  %v8968_v19 = vld [vmem:[#allocation39_spill] sm:$0xff] }
 0x5d7   :  { %6138 = vmatmul.f32.vlgmr.msrb.gmra.mxu2 %v5932_v4  ;;  %6364 = vmatpush.msrb.mxu1 %v7318_v46 }
 0x5d8   :  { %6267 = vmatpush.msra.mxu2 %v7192_v39  ;;  %6290 = vmatpush.msra.mxu3 %v7127_v17  ;;  %v8967_v17 = vld [vmem:[#allocation45_spill] sm:$0xff] }
 0x5d9   :  { %6179 = vmatmul.f32.vlgmr.msrb.gmra.mxu3 %v8464_v38  ;;  %6200 = vmatpush.msra.mxu0 %v7136_v20  ;;  %v7061_v20 = vmov 7  }
 0x5da   :  { %6292 = vmatpush.msra.mxu3 %v7138_v21  ;;  %6370 = vmatpush.msrb.mxu1 %v7333_v59  ;;  %v8969_v21 = vld [vmem:[#allocation41_spill] sm:$0xff] }
 0x5db   :  { %6402 = vmatpush.msrb.mxu2 %v7243_v54  ;;  %6203 = vmatpush.msra.mxu0 %v8756_v49 }
 0x5dc   :  { %6376 = vmatpush.msrb.mxu1 %v7346_v56  ;;  %6431 = vmatpush.msrb.mxu3 %v7230_v51 }
 0x5dd   :  { %6064 = vmatmul.f32.vlgmr.msrb.gmra.mxu0 %v8464_v38  ;;  %6236 = vmatmul.f32.vlgmr.msra.gmra.mxu1 %v8473_v18 }
 0x5de   :  { %6405 = vmatpush.msrb.mxu2 %v8757_v47  ;;  %6206 = vmatpush.msra.mxu0 %v8758_v36  ;;  %v8974_v36 = vld [vmem:[#allocation50_spill] sm:$0xff] }
 0x5df   :  { %6269 = vmatmul.f32.vlgmr.msra.gmra.mxu2 %v8464_v38  ;;  %6382 = vmatpush.msrb.mxu1 %v7361_v63 }
 0x5e0   :  { %6408 = vmatpush.msrb.mxu2 %v8759_v9  ;;  %6433 = vmatpush.msrb.mxu3 %v7236_v53 }
 0x5e1   :  { %6294 = vmatmul.f32.vlgmr.msra.gmra.mxu3 %v8464_v38  ;;  %6331 = vmatpush.msrb.mxu0 %v7230_v51 }
 0x5e2   :  { %6411 = vmatpush.msrb.mxu2 %v8760_v43  ;;  %6435 = vmatpush.msrb.mxu3 %v7245_v55 }
 0x5e3   :  { %6491 = vmatpush.msra.mxu1 %v7230_v51  ;;  %6333 = vmatpush.msrb.mxu0 %v7236_v53 }
 0x5e4   :  { %6437 = vmatpush.msrb.mxu3 %v7256_v60  ;;  %6536 = vmatpush.msra.mxu2 %v7258_v61 }
 0x5e5   :  { %6209 = vmatmul.f32.vlgmr.msra.gmra.mxu0 %v8468_v57  ;;  %6384 = vmatmul.f32.vlgmr.msrb.gmra.mxu1 %v8464_v38 }
 0x5e6   :  { %6493 = vmatpush.msra.mxu1 %v7236_v53  ;;  %6335 = vmatpush.msrb.mxu0 %v7245_v55 }
 0x5e7   :  { %6414 = vmatmul.f32.vlgmr.msrb.gmra.mxu2 %v8468_v57  ;;  %6569 = vmatpush.msra.mxu3 %v7359_v48 }
 0x5e8   :  { %6495 = vmatpush.msra.mxu1 %v7245_v55  ;;  %6538 = vmatpush.msra.mxu2 %v7270_v1 }
 0x5e9   :  { %6441 = vmatmul.f32.vlgmr.msrb.gmra.mxu3 %v8473_v18  ;;  %6337 = vmatpush.msrb.mxu0 %v7256_v60 }
 0x5ea   :  { %6497 = vmatpush.msra.mxu1 %v7256_v60  ;;  %6540 = vmatpush.msra.mxu2 %v7285_v12 }
 0x5eb   :  { %6575 = vmatpush.msra.mxu3 %v7369_v7  ;;  %6460 = vmatpush.msra.mxu0 %v7263_v62  ;;  %v8972_v62 = vld [vmem:[#allocation35_spill] sm:$0xff] }
 0x5ec   :  { %6542 = vmatpush.msra.mxu2 %v7299_v32  ;;  %6636 = vmatpush.msrb.mxu1 %v7258_v61 }
 0x5ed   :  { %6343 = vmatmul.f32.vlgmr.msrb.gmra.mxu0 %v5932_v4  ;;  %6499 = vmatmul.f32.vlgmr.msra.gmra.mxu1 %v8464_v38 }
 0x5ee   :  { %6581 = vmatpush.msra.mxu3 %v7377_v0  ;;  %6464 = vmatpush.msra.mxu0 %v7275_v2 }
 0x5ef   :  { %6548 = vmatmul.f32.vlgmr.msra.gmra.mxu2 %v5932_v4  ;;  %6638 = vmatpush.msrb.mxu1 %v7270_v1 }
 0x5f0   :  { %6587 = vmatpush.msra.mxu3 %v7383_v13  ;;  %6665 = vmatpush.msrb.mxu2 %v7308_v35 }
 0x5f1   :  { %6468 = vmatpush.msra.mxu0 %v8929_v45  ;;  %6589 = vmatmul.f32.vlgmr.msra.gmra.mxu3 %v8464_v38 }
 0x5f2   :  { %6640 = vmatpush.msrb.mxu1 %v7285_v12  ;;  %6669 = vmatpush.msrb.mxu2 %v8930_v50 }
 0x5f3   :  { %6696 = vmatpush.msrb.mxu3 %v7258_v61  ;;  %6472 = vmatpush.msra.mxu0 %v8931_v5 }
 0x5f4   :  { %6642 = vmatpush.msrb.mxu1 %v7299_v32  ;;  %6673 = vmatpush.msrb.mxu2 %v8965_v10 }
 0x5f5   :  { %6698 = vmatpush.msrb.mxu3 %v7270_v1  ;;  %6474 = vmatmul.f32.vlgmr.msra.gmra.mxu0 %v8464_v38 }
 0x5f6   :  { %6607 = vmatpush.msrb.mxu0 %v8966_v11  ;;  %6646 = vmatmul.f32.vlgmr.msrb.gmra.mxu1 %v8473_v18 }
 0x5f7   :  { %6677 = vmatpush.msrb.mxu2 %v8967_v17  ;;  %6700 = vmatpush.msrb.mxu3 %v7285_v12  ;;  %v8973_v12 = vld [vmem:[#allocation46_spill] sm:$0xff] }
 0x5f8   :  { %6610 = vmatpush.msrb.mxu0 %v8968_v19  ;;  %6679 = vmatmul.f32.vlgmr.msrb.gmra.mxu2 %v8464_v38 }
 0x5f9   :  { %6702 = vmatpush.msrb.mxu3 %v7299_v32  ;;  %6785 = vset.pattern.permute.xlu2 %v7061_v20 }
 0x5fa   :  { %6613 = vmatpush.msrb.mxu0 %v8969_v21  ;;  %6704 = vmatmul.f32.vlgmr.msrb.gmra.mxu3 %v8464_v38 }
 0x5fb   :  { %5894 = vperm.xlu2 %6785, %v8970_v26   ;;  %6786 = vset.pattern.permute.xlu0 %v7061_v20 }
 0x5fc   :  { %6616 = vmatpush.msrb.mxu0 %v8971_v28 }
 0x5fd   :  { %6619 = vmatmul.f32.vlgmr.msrb.gmra.mxu0 %v8468_v57 }
 0x64a   :  { %v5975_v33 = vpop.f32.mrf.mxu1 }
 0x652   :  { %v5934_v39 = vpop.f32.mrf.mxu0  ;;  %v6005_v51 = vpop.f32.mrf.mxu2 }
 0x653   :  { %v5976_v53 = vadd.f32 %v5975_v33, %v5934_v39  ;;  %v6090_v54 = vpop.f32.mrf.mxu1 }
 0x654   :  { %v6032_v55 = vpop.f32.mrf.mxu3 }
 0x655   :  { %v6006_v60 = vadd.f32 %v6005_v51, %v5976_v53  ;;  %v5895_v61 = vpop.permute.xlu2 %5894 }
 0x656   :  { %v5897_v63 = vmul.f32 %v8972_v62, %v5895_v61  ;;  %v5899_v9 = vmul.f32 %v8974_v36, %v5895_v61  ;;  %v5903_v25 = vmul.f32 %v8976_v6, %v5895_v61  ;;  %v5901_v53 = vmul.f32 %v8449_v41, %v5895_v61  ;;  %v6795_v6 = vld [vmem:[#allocation7] ss:$0 sm:$0xff] }
 0x657   :  { %v6033_v1 = vadd.f32 %v6032_v55, %v6006_v60 }
 0x658   :  { %v5898_v32 = vadd.f32 %v8973_v12, %v5897_v63  ;;  %v5900_v30 = vadd.f32 %v8975_v24, %v5899_v9  ;;  %v5904_v4 = vadd.f32 %v8977_v29, %v5903_v25 }
 0x65a   :  { %v6065_v2 = vpop.f32.mrf.mxu0  ;;  %v6139_v7 = vpop.f32.mrf.mxu2 }
 0x65b   :  { %v6066_v35 = vadd.f32 %v6065_v2, %v6033_v1  ;;  %v6237_v56 = vpop.f32.mrf.mxu1 }
 0x65c   :  { %v6180_v46 = vpop.f32.mrf.mxu3 }
 0x65d   :  { %v6091_v59 = vadd.f32 %v6090_v54, %v6066_v35  ;;  %v6181_v13 = vadd.f32 %v6180_v46, %v6139_v7 }
 0x65f   :  { %v6093_v48 = vadd.f32 %v6091_v59, %v5898_v32  ;;  %v8978_v32 = vld [vmem:[#allocation25_spill] sm:$0xff] }
 0x660   :  { %v5902_v35 = vadd.f32 %v8978_v32, %v5901_v53 }
 0x661   :  { %v6758_v0 = vmul.f32 -1.442695, %v6093_v48 }
 0x662   :  { %v6210_v49 = vpop.f32.mrf.mxu0  ;;  %v6270_v47 = vpop.f32.mrf.mxu2 }
 0x663   :  { %6909 = vpow2.f32 %v6758_v0  ;;  %v6211_v43 = vadd.f32 %v6210_v49, %v6181_v13  ;;  %v6385_v52 = vpop.f32.mrf.mxu1 }
 0x664   :  { %v6295_v45 = vpop.f32.mrf.mxu3 }
 0x665   :  { %v6238_v50 = vadd.f32 %v6237_v56, %v6211_v43 }
 0x667   :  { %v6271_v5 = vadd.f32 %v6270_v47, %v6238_v50 }
 0x669   :  { %v6910_v44 = vpop.eup %6909  ;;  %v6296_v34 = vadd.f32 %v6295_v45, %v6271_v5 }
 0x66a   :  { %v8563_v23 = vadd.f32 1.0, %v6910_v44  ;;  %v6344_v42 = vpop.f32.mrf.mxu0  ;;  %v6415_v31 = vpop.f32.mrf.mxu2 }
 0x66b   :  { %v6298_v58 = vadd.f32 %v6296_v34, %v5900_v30  ;;  %v6386_v3 = vadd.f32 %v6385_v52, %v6344_v42  ;;  %v6500_v27 = vpop.f32.mrf.mxu1 }
 0x66c   :  { %v6442_v40 = vpop.f32.mrf.mxu3  ;;  %6911 = vrcp.f32 %v8563_v23  ;;  %v6109_v61 = vand.u32 2147483648, %v8563_v23  ;;  %vm6103_vm13 = vweird.f32 %v8563_v23  ;;  %v6107_v47 = vand.u32 2147483647, %v8563_v23 }
 0x66d   :  { %v6759_v8 = vmul.f32 -1.442695, %v6298_v58  ;;  %v6416_v16 = vadd.f32 %v6415_v31, %v6386_v3 }
 0x66e   :  { %v6110_v45 = vor.u32 1.1754944e-38, %v6109_v61  ;;  %vm6108_vm0 = vcmp.eq.f32.partialorder %v6107_v47, 8.507059e+37 }
 0x66f   :  { %6913 = vpow2.f32 %v6759_v8  ;;  %v6443_v14 = vadd.f32 %v6442_v40, %v6416_v16 }
 0x672   :  { %v6475_v22 = vpop.f32.mrf.mxu0  ;;  %v6912_v38 = vpop.eup %6911 }
 0x673   :  { %v6476_v37 = vadd.f32 %v6475_v22, %v6443_v14  ;;  %v6549_v57 = vpop.f32.mrf.mxu2  ;;  %v6099_v20 = vmul.f32 %v6912_v38, %v8563_v23  ;;  %v6647_v51 = vpop.f32.mrf.mxu1  ;;  %vm6104_vm9 = vweird.f32 %v6912_v38 }
 0x674   :  { %v6590_v17 = vpop.f32.mrf.mxu3  ;;  %vm6105_vm14 = vmor %vm6103_vm13, %vm6104_vm9 }
 0x675   :  { %v6914_v18 = vpop.eup %6913  ;;  %v6501_v10 = vadd.f32 %v6500_v27, %v6476_v37  ;;  %v6591_v26 = vadd.f32 %v6590_v17, %v6549_v57  ;;  %v6100_v39 = vsub.f32 1.0, %v6099_v20  ;;  %v6796_v37 = vld [vmem:[#allocation7 + $0x1] ss:$0 sm:$0xff] }
 0x676   :  { %v6302_v11 = vadd.f32 1.0, %v6914_v18 }
 0x677   :  { %v6503_v19 = vadd.f32 %v6501_v10, %v5904_v4  ;;  %v6101_v1 = vmul.f32 %v6912_v38, %v6100_v39 }
 0x678   :  { %6915 = vrcp.f32 %v6302_v11  ;;  %v6314_v48 = vand.u32 2147483648, %v6302_v11  ;;  %v6312_v41 = vand.u32 2147483647, %v6302_v11  ;;  %vm6308_vm10 = vweird.f32 %v6302_v11 }
 0x679   :  { %v6760_v21 = vmul.f32 -1.442695, %v6503_v19  ;;  %v6102_v13 = vadd.f32 %v6912_v38, %v6101_v1 }
 0x67a   :  { %v6620_v28 = vpop.f32.mrf.mxu0  ;;  %v6315_v36 = vor.u32 1.1754944e-38, %v6314_v48  ;;  %vm6313_vm15 = vcmp.eq.f32.partialorder %v6312_v41, 8.507059e+37 }
 0x67b   :  { %6917 = vpow2.f32 %v6760_v21  ;;  %v6621_v33 = vadd.f32 %v6620_v28, %v6591_v26  ;;  %v6680_v60 = vpop.f32.mrf.mxu2  ;;  %v6106_v43 = vsel %vm6105_vm14, %v6912_v38, %v6102_v13 }
 0x67c   :  { %v6111_v30 = vsel %vm6108_vm0, %v6110_v45, %v6106_v43 }
 0x67d   :  { %v6648_v54 = vadd.f32 %v6647_v51, %v6621_v33  ;;  %v6705_v2 = vpop.f32.mrf.mxu3 }
 0x67e   :  { %v6916_v55 = vpop.eup %6915 }
 0x67f   :  { %v6304_v62 = vmul.f32 %v6916_v55, %v6302_v11  ;;  %v6681_v63 = vadd.f32 %v6680_v60, %v6648_v54  ;;  %vm6309_vm12 = vweird.f32 %v6916_v55 }
 0x680   :  { %vm6310_vm11 = vmor %vm6308_vm10, %vm6309_vm12 }
 0x681   :  { %v6918_v7 = vpop.eup %6917  ;;  %v6305_v12 = vsub.f32 1.0, %v6304_v62  ;;  %v6706_v46 = vadd.f32 %v6705_v2, %v6681_v63 }
 0x682   :  { %v6507_v59 = vadd.f32 1.0, %v6918_v7 }
 0x683   :  { %v6306_v56 = vmul.f32 %v6916_v55, %v6305_v12  ;;  %v6708_v0 = vadd.f32 %v6706_v46, %v5902_v35 }
 0x684   :  { %6919 = vrcp.f32 %v6507_v59  ;;  %v6519_v23 = vand.u32 2147483648, %v6507_v59  ;;  %vm6513_vm2 = vweird.f32 %v6507_v59  ;;  %v6517_v40 = vand.u32 2147483647, %v6507_v59 }
 0x685   :  { %6921 = vtanh.f32 %v6708_v0  ;;  %v6307_v49 = vadd.f32 %v6916_v55, %v6306_v56 }
 0x686   :  { %v6520_v16 = vor.u32 1.1754944e-38, %v6519_v23  ;;  %vm6518_vm4 = vcmp.eq.f32.partialorder %v6517_v40, 8.507059e+37 }
 0x687   :  { %v6311_v9 = vsel %vm6310_vm11, %v6916_v55, %v6307_v49 }
 0x688   :  { %v6316_v50 = vsel %vm6313_vm15, %v6315_v36, %v6311_v9 }
 0x689   :  { %v6710_v34 = vmul.f32 %v6316_v50, %v8460_v15 }
 0x68a   :  { %v6920_v5 = vpop.eup %6919 }
 0x68b   :  { %v6922_v24 = vpop.eup %6921  ;;  %v6509_v52 = vmul.f32 %v6920_v5, %v6507_v59  ;;  %vm6514_vm1 = vweird.f32 %v6920_v5 }
 0x68c   :  { %v6711_v44 = vmul.f32 %v6922_v24, %v6111_v30  ;;  %vm6515_vm3 = vmor %vm6513_vm2, %vm6514_vm1 }
 0x68d   :  { %v6510_v42 = vsub.f32 1.0, %v6509_v52 }
 0x68e   :  { %v6712_v31 = vadd.f32 %v6711_v44, %v6710_v34 }
 0x68f   :  { %v6511_v58 = vmul.f32 %v6920_v5, %v6510_v42 }
 0x690   :  { %6923 = vtanh.f32 %v6712_v31 }
 0x691   :  { %v6512_v3 = vadd.f32 %v6920_v5, %v6511_v58 }
 0x693   :  { %v6516_v8 = vsel %vm6515_vm3, %v6920_v5, %v6512_v3 }
 0x694   :  { %v6521_v14 = vsel %vm6518_vm4, %v6520_v16, %v6516_v8 }
 0x696   :  { %v6924_v25 = vpop.eup %6923 }
 0x697   :  { %v6714_v27 = vmul.f32 %v6924_v25, %v6521_v14 }
 0x699   :  { %v6718_v22 = vmul.f32 %v6795_v6, %v6714_v27 }
 0x69b   :  { %v6720_v15 = vsel %vm6719_vm5, %v6718_v22, 0.0 }
 0x69c   :  { %6721 = vadd.xlane.f32.xlu0 %v6720_v15 }
 0x70f   :  { %v6722_v38 = vpop.xlane.xlu0 %6721 }
 0x710   :  { %v6724_v57 = vadd.f32 %v6796_v37, %v6722_v38 }
 0x712   :  { %6726 = vst.msk [vmem:[%s8583_s5] sm:$0x3] %vm6725_vm6, %v6724_v57 }
 0x713   :  { %6731 = vsyncpa [#allocation3], 1 }
 0x714   :  { %6732 = vsyncpa [#allocation5], 1 }
 0x715   :  { %6733 = vsyncpa [#allocation8], 1 }

</bundles_post_ra>
